<compile_context>
chip_gen: v7x
topology: tpu7x:2x2x1
jax: 0.10.0
libtpu: 0.0.40
codegen_flags: <defaults>
</compile_context>

<pallas_src>
import functools

import jax
import jax.numpy as jnp
from jax import lax
from jax.experimental import pallas as pl
from jax.experimental.pallas import tpu as pltpu


N_ACTIONS = 6
HEAD_PAD = 128          # value (1) + advantages (6), zero-padded to a full lane tile
_VMEM_LIMIT = 32 * 1024 * 1024


# ----------------------------------------------------------------------------
# Kernel A: fused matmul + bias + ReLU (used for conv1 and conv2 as im2col
# matmuls).  Single grid step, every operand resident in VMEM.
# ----------------------------------------------------------------------------
def _mm_bias_relu_kernel(x_ref, w_ref, b_ref, o_ref):
    y = jnp.dot(x_ref[...], w_ref[...], preferred_element_type=jnp.float32)
    o_ref[...] = jnp.maximum(y + b_ref[...], 0.0).astype(o_ref.dtype)


def mm_bias_relu(x, w, b, out_dtype=jnp.bfloat16):
    """x: [M, K] bf16, w: [K, N] bf16, b: [1, N] f32 -> relu(x @ w + b): [M, N]."""
    M, K = x.shape
    K2, N = w.shape
    assert K == K2
    return pl.pallas_call(
        _mm_bias_relu_kernel,
        out_shape=jax.ShapeDtypeStruct((M, N), out_dtype),
        grid=(1,),
        in_specs=[
            pl.BlockSpec((M, K), lambda i: (0, 0)),
            pl.BlockSpec((K, N), lambda i: (0, 0)),
            pl.BlockSpec((1, N), lambda i: (0, 0)),
        ],
        out_specs=pl.BlockSpec((M, N), lambda i: (0, 0)),
        compiler_params=pltpu.CompilerParams(
            dimension_semantics=("arbitrary",),
            vmem_limit_bytes=_VMEM_LIMIT),
    )(x, w, b)


# ----------------------------------------------------------------------------
# Kernel B: fused lin1 + ReLU + merged value/advantage heads.
# Single grid step; lin1 weight (2592x512 bf16 = 2.65 MB) fully resident.
# ----------------------------------------------------------------------------
def _lin1_heads_kernel(x_ref, w3_ref, b3_ref, wh_ref, bh_ref, o_ref):
    h = jnp.dot(x_ref[...], w3_ref[...], preferred_element_type=jnp.float32)
    h = jnp.maximum(h + b3_ref[...], 0.0)                       # [B, 512] f32
    o_ref[...] = (jnp.dot(h.astype(wh_ref.dtype), wh_ref[...],
                          preferred_element_type=jnp.float32)
                  + bh_ref[...]).astype(o_ref.dtype)            # [B, 128] f32


def lin1_heads(feat, w3, b3, wh, bh):
    """feat: [B, 2592] bf16 -> [B, 128] f32 (col 0 = value, cols 1..6 = advantages)."""
    B, K = feat.shape
    D = w3.shape[1]
    NH = wh.shape[1]
    return pl.pallas_call(
        _lin1_heads_kernel,
        out_shape=jax.ShapeDtypeStruct((B, NH), jnp.float32),
        grid=(1,),
        in_specs=[
            pl.BlockSpec((B, K), lambda i: (0, 0)),
            pl.BlockSpec((K, D), lambda i: (0, 0)),    # lin1 weight, ONE 2.65 MB DMA
            pl.BlockSpec((1, D), lambda i: (0, 0)),
            pl.BlockSpec((D, NH), lambda i: (0, 0)),   # merged heads weight
            pl.BlockSpec((1, NH), lambda i: (0, 0)),
        ],
        out_specs=pl.BlockSpec((B, NH), lambda i: (0, 0)),       # 128-lane dense store
        compiler_params=pltpu.CompilerParams(
            dimension_semantics=("arbitrary",),
            vmem_limit_bytes=_VMEM_LIMIT),
    )(feat, w3, b3, wh, bh)


# ----------------------------------------------------------------------------
# Parameters (torch layout) and one-time kernel-layout preparation
# ----------------------------------------------------------------------------
def init_torch_params(key, kernels, kernel_dim):
    ks = jax.random.split(key, 10)
    scale = 0.05

    def init(k, shape):
        return scale * jax.random.normal(k, shape, dtype=jnp.float32)

    return {
        "conv1_w": init(ks[0], (kernels, 4, kernel_dim, kernel_dim)),
        "conv1_b": init(ks[1], (kernels,)),
        "conv2_w": init(ks[2], (32, kernels, 4, 4)),
        "conv2_b": init(ks[3], (32,)),
        "lin1_w": init(ks[4], (512, 32 * 9 * 9)),   # torch Linear: [out, in]
        "lin1_b": init(ks[5], (512,)),
        "value_w": init(ks[6], (1, 512)),
        "value_b": init(ks[7], (1,)),
        "adv_w": init(ks[8], (6, 512)),
        "adv_b": init(ks[9], (6,)),
    }


def prepare_params(tp):
    """One-time layout/dtype prep (outside the hot path).

    * conv weights -> [K, out] matching the (C, kh, kw) patch feature order of
      lax.conv_general_dilated_patches.
    * lin1 weight -> [2592, 512] with rows reordered from torch's (c, h, w)
      flatten to the channels-last (h, w, c) flatten the Pallas path uses.
    * value/advantage heads concatenated and zero-padded into a single
      [512, 128] weight (col 0 = value, cols 1..6 = advantages).
    * matmul weights bf16, biases f32.
    """
    kernels = tp["conv1_w"].shape[0]
    wh = jnp.zeros((512, HEAD_PAD), jnp.float32)
    wh = wh.at[:, 0:1].set(tp["value_w"].T)
    wh = wh.at[:, 1:1 + N_ACTIONS].set(tp["adv_w"].T)
    bh = jnp.zeros((1, HEAD_PAD), jnp.float32)
    bh = bh.at[:, 0:1].set(tp["value_b"].reshape(1, 1))
    bh = bh.at[:, 1:1 + N_ACTIONS].set(tp["adv_b"].reshape(1, -1))
    return {
        "w1": tp["conv1_w"].reshape(kernels, -1).T.astype(jnp.bfloat16),
        "b1": tp["conv1_b"].reshape(1, -1),
        "w2": tp["conv2_w"].reshape(32, -1).T.astype(jnp.bfloat16),
        "b2": tp["conv2_b"].reshape(1, -1),
        "w3": tp["lin1_w"].reshape(512, 32, 9, 9).transpose(2, 3, 1, 0)
                 .reshape(9 * 9 * 32, 512).astype(jnp.bfloat16),
        "b3": tp["lin1_b"].reshape(1, -1),
        "wh": wh.astype(jnp.bfloat16),
        "bh": bh,
    }


# ----------------------------------------------------------------------------
# Forward pass (Pallas path)
# ----------------------------------------------------------------------------
def dueling_dqn_forward(x, p, kernel_dim, stride):
    """x: [B, 4, 84, 84] float32 (PyTorch NCHW) -> (value [B,1], advantages [B,6])."""
    B = x.shape[0]
    x = jnp.transpose(x, (0, 2, 3, 1)).astype(jnp.bfloat16)          # NHWC, bf16

    # conv1 patches: [B, 20, 20, 4*kd*kd], feature order (C, kh, kw)
    patches1 = lax.conv_general_dilated_patches(
        x, filter_shape=(kernel_dim, kernel_dim),
        window_strides=(stride, stride), padding="VALID",
        dimension_numbers=("NHWC", "HWIO", "NHWC"))
    _, OH1, OW1, F1 = patches1.shape
    y1 = mm_bias_relu(patches1.reshape(B * OH1 * OW1, F1), p["w1"], p["b1"])
    y1 = y1.reshape(B, OH1, OW1, -1)                                 # [B, 20, 20, 16] bf16

    # conv2 patches: [B, 9, 9, 16*4*4] — batch-major, no transpose needed
    patches2 = lax.conv_general_dilated_patches(
        y1, filter_shape=(4, 4), window_strides=(2, 2), padding="VALID",
        dimension_numbers=("NHWC", "HWIO", "NHWC"))
    _, OH2, OW2, F2 = patches2.shape
    y2 = mm_bias_relu(patches2.reshape(B * OH2 * OW2, F2), p["w2"], p["b2"])  # [B*81, 32]

    # Flatten to the (h, w, c) order matching the reordered lin1 weight.
    # Row-major metadata-only reshape in XLA (no data movement).
    feat = y2.reshape(B, OH2 * OW2 * y2.shape[-1])                   # [B, 2592] bf16

    out = lin1_heads(feat, p["w3"], p["b3"], p["wh"], p["bh"])       # [B, 128] f32
    value = out[:, 0:1]
    advantages = out[:, 1:1 + N_ACTIONS]
    return value, advantages
    # TODO(synk): loss (MSELoss), RMSprop optimizer, target_counter and the
    # aggreagate() method (Q = V + A - mean(A)) are training-time / separate
    # methods, not part of the forward pass.


# ----------------------------------------------------------------------------
# Pure-XLA f32 reference (guards the im2col feature ordering / lin1 reorder)
# ----------------------------------------------------------------------------
def reference_forward(x, tp, stride):
    y = lax.conv_general_dilated(
        x, tp["conv1_w"], window_strides=(stride, stride), padding="VALID",
        dimension_numbers=("NCHW", "OIHW", "NCHW"))
    y = jax.nn.relu(y + tp["conv1_b"][None, :, None, None])
    y = lax.conv_general_dilated(
        y, tp["conv2_w"], window_strides=(2, 2), padding="VALID",
        dimension_numbers=("NCHW", "OIHW", "NCHW"))
    y = jax.nn.relu(y + tp["conv2_b"][None, :, None, None])
    y = y.reshape(y.shape[0], -1)                       # torch (c, h, w) flatten
    h = jax.nn.relu(y @ tp["lin1_w"].T + tp["lin1_b"])
    value = h @ tp["value_w"].T + tp["value_b"]
    adv = h @ tp["adv_w"].T + tp["adv_b"]
    return value, adv


if __name__ == "__main__":
    kernels, kernel_dim, stride = 16, 8, 4   # classic Atari DQN -> conv2 output 32 x 9 x 9
    batch = 2

    key = jax.random.PRNGKey(0)
    pkey, xkey = jax.random.split(key)
    torch_params = init_torch_params(pkey, kernels, kernel_dim)
    params = prepare_params(torch_params)    # one-time layout/dtype prep
    x = jax.random.normal(xkey, (batch, 4, 84, 84), dtype=jnp.float32)

    fwd = jax.jit(functools.partial(dueling_dqn_forward,
                                    kernel_dim=kernel_dim, stride=stride))
    value, advantages = fwd(x, params)
    jax.block_until_ready((value, advantages))
    assert value.shape == (batch, 1) and advantages.shape == (batch, N_ACTIONS)

    # Numerical check vs. the pure-XLA f32 reference (loose tolerance for the
    # bf16 matmul inputs; a layout/ordering bug would be off by ~100%).
    ref_fwd = jax.jit(functools.partial(reference_forward, stride=stride))
    ref_v, ref_a = ref_fwd(x, torch_params)
    jax.block_until_ready((ref_v, ref_a))
    assert jnp.allclose(value, ref_v, atol=5e-2, rtol=5e-2)
    assert jnp.allclose(advantages, ref_a, atol=5e-2, rtol=5e-2)

    print("KERNEL_OK")
</pallas_src>

<mosaic_0001>
module attributes {stable_mosaic.version = 11 : i64} {
  func.func @_mm_bias_relu_kernel(%arg0: i32, %arg1: memref<800x256xbf16, #tpu.memory_space<vmem>>, %arg2: memref<256x16xbf16, #tpu.memory_space<vmem>>, %arg3: memref<1x16xf32, #tpu.memory_space<vmem>>, %arg4: memref<800x16xbf16, #tpu.memory_space<vmem>>) attributes {dimension_semantics = [#tpu.dimension_semantics<arbitrary>], iteration_bounds = array<i64: 1>, scalar_prefetch = 0 : i64, scratch_operands = 0 : i64, tpu.core_type = #tpu.core_type<tc>, window_params = [{pipeline_mode = #tpu.pipeline_mode<synchronous>, transform_indices = @transform_0, window_bounds = array<i64: 800, 256>}, {pipeline_mode = #tpu.pipeline_mode<synchronous>, transform_indices = @transform_1, window_bounds = array<i64: 256, 16>}, {pipeline_mode = #tpu.pipeline_mode<synchronous>, transform_indices = @transform_2, window_bounds = array<i64: 1, 16>}, {pipeline_mode = #tpu.pipeline_mode<synchronous>, transform_indices = @transform_3, window_bounds = array<i64: 800, 16>}]} {
    %c0 = arith.constant 0 : index
    %c0_0 = arith.constant 0 : index
    %0 = vector.load %arg1[%c0, %c0_0] : memref<800x256xbf16, #tpu.memory_space<vmem>>, vector<800x256xbf16>
    %c0_1 = arith.constant 0 : index
    %c0_2 = arith.constant 0 : index
    %1 = vector.load %arg2[%c0_1, %c0_2] : memref<256x16xbf16, #tpu.memory_space<vmem>>, vector<256x16xbf16>
    %cst = arith.constant dense<0.000000e+00> : vector<800x16xf32>
    %2 = tpu.matmul %0, %1, %cst {dimension_numbers = #tpu.dot_dimension_numbers<[1], [0], [0], [1], [0, 0, 1, 1], [], []>} : vector<800x256xbf16>, vector<256x16xbf16>, vector<800x16xf32> -> vector<800x16xf32>
    %c0_3 = arith.constant 0 : index
    %c0_4 = arith.constant 0 : index
    %3 = vector.load %arg3[%c0_3, %c0_4] : memref<1x16xf32, #tpu.memory_space<vmem>>, vector<1x16xf32>
    %4 = vector.broadcast %3 : vector<1x16xf32> to vector<800x16xf32>
    %5 = arith.addf %2, %4 : vector<800x16xf32>
    %cst_5 = arith.constant 0.000000e+00 : f32
    %6 = vector.broadcast %cst_5 : f32 to vector<800x16xf32>
    %7 = arith.maximumf %5, %6 : vector<800x16xf32>
    %8 = arith.truncf %7 : vector<800x16xf32> to vector<800x16xbf16>
    %c0_6 = arith.constant 0 : index
    %c0_7 = arith.constant 0 : index
    %9 = vector.load %arg4[%c0_6, %c0_7] : memref<800x16xbf16, #tpu.memory_space<vmem>>, vector<800x16xbf16>
    tpu.vector_store %arg4[%c0_6, %c0_7], %8 {strides = array<i32>} : memref<800x16xbf16, #tpu.memory_space<vmem>>, vector<800x16xbf16>,
    return
  }
  func.func @transform_0(%arg0: i32) -> (i32, i32) {
    %c0_i32 = arith.constant 0 : i32
    %c0_i32_0 = arith.constant 0 : i32
    %c0_i32_1 = arith.constant 0 : i32
    return %c0_i32, %c0_i32_0 : i32, i32
  }
  func.func @transform_1(%arg0: i32) -> (i32, i32) {
    %c0_i32 = arith.constant 0 : i32
    %c0_i32_0 = arith.constant 0 : i32
    %c0_i32_1 = arith.constant 0 : i32
    return %c0_i32, %c0_i32_0 : i32, i32
  }
  func.func @transform_2(%arg0: i32) -> (i32, i32) {
    %c0_i32 = arith.constant 0 : i32
    %c0_i32_0 = arith.constant 0 : i32
    %c0_i32_1 = arith.constant 0 : i32
    return %c0_i32, %c0_i32_0 : i32, i32
  }
  func.func @transform_3(%arg0: i32) -> (i32, i32) {
    %c0_i32 = arith.constant 0 : i32
    %c0_i32_0 = arith.constant 0 : i32
    %c0_i32_1 = arith.constant 0 : i32
    return %c0_i32, %c0_i32_0 : i32, i32
  }
}

module attributes {stable_mosaic.version = 11 : i64} {
  func.func @_mm_bias_relu_kernel(%arg0: i32, %arg1: memref<162x256xbf16, #tpu.memory_space<vmem>>, %arg2: memref<256x32xbf16, #tpu.memory_space<vmem>>, %arg3: memref<1x32xf32, #tpu.memory_space<vmem>>, %arg4: memref<162x32xbf16, #tpu.memory_space<vmem>>) attributes {dimension_semantics = [#tpu.dimension_semantics<arbitrary>], iteration_bounds = array<i64: 1>, scalar_prefetch = 0 : i64, scratch_operands = 0 : i64, tpu.core_type = #tpu.core_type<tc>, window_params = [{pipeline_mode = #tpu.pipeline_mode<synchronous>, transform_indices = @transform_0, window_bounds = array<i64: 162, 256>}, {pipeline_mode = #tpu.pipeline_mode<synchronous>, transform_indices = @transform_1, window_bounds = array<i64: 256, 32>}, {pipeline_mode = #tpu.pipeline_mode<synchronous>, transform_indices = @transform_2, window_bounds = array<i64: 1, 32>}, {pipeline_mode = #tpu.pipeline_mode<synchronous>, transform_indices = @transform_3, window_bounds = array<i64: 162, 32>}]} {
    %c0 = arith.constant 0 : index
    %c0_0 = arith.constant 0 : index
    %0 = vector.load %arg1[%c0, %c0_0] : memref<162x256xbf16, #tpu.memory_space<vmem>>, vector<162x256xbf16>
    %c0_1 = arith.constant 0 : index
    %c0_2 = arith.constant 0 : index
    %1 = vector.load %arg2[%c0_1, %c0_2] : memref<256x32xbf16, #tpu.memory_space<vmem>>, vector<256x32xbf16>
    %cst = arith.constant dense<0.000000e+00> : vector<162x32xf32>
    %2 = tpu.matmul %0, %1, %cst {dimension_numbers = #tpu.dot_dimension_numbers<[1], [0], [0], [1], [0, 0, 1, 1], [], []>} : vector<162x256xbf16>, vector<256x32xbf16>, vector<162x32xf32> -> vector<162x32xf32>
    %c0_3 = arith.constant 0 : index
    %c0_4 = arith.constant 0 : index
    %3 = vector.load %arg3[%c0_3, %c0_4] : memref<1x32xf32, #tpu.memory_space<vmem>>, vector<1x32xf32>
    %4 = vector.broadcast %3 : vector<1x32xf32> to vector<162x32xf32>
    %5 = arith.addf %2, %4 : vector<162x32xf32>
    %cst_5 = arith.constant 0.000000e+00 : f32
    %6 = vector.broadcast %cst_5 : f32 to vector<162x32xf32>
    %7 = arith.maximumf %5, %6 : vector<162x32xf32>
    %8 = arith.truncf %7 : vector<162x32xf32> to vector<162x32xbf16>
    %c0_6 = arith.constant 0 : index
    %c0_7 = arith.constant 0 : index
    %9 = vector.load %arg4[%c0_6, %c0_7] : memref<162x32xbf16, #tpu.memory_space<vmem>>, vector<162x32xbf16>
    tpu.vector_store %arg4[%c0_6, %c0_7], %8 {strides = array<i32>} : memref<162x32xbf16, #tpu.memory_space<vmem>>, vector<162x32xbf16>,
    return
  }
  func.func @transform_0(%arg0: i32) -> (i32, i32) {
    %c0_i32 = arith.constant 0 : i32
    %c0_i32_0 = arith.constant 0 : i32
    %c0_i32_1 = arith.constant 0 : i32
    return %c0_i32, %c0_i32_0 : i32, i32
  }
  func.func @transform_1(%arg0: i32) -> (i32, i32) {
    %c0_i32 = arith.constant 0 : i32
    %c0_i32_0 = arith.constant 0 : i32
    %c0_i32_1 = arith.constant 0 : i32
    return %c0_i32, %c0_i32_0 : i32, i32
  }
  func.func @transform_2(%arg0: i32) -> (i32, i32) {
    %c0_i32 = arith.constant 0 : i32
    %c0_i32_0 = arith.constant 0 : i32
    %c0_i32_1 = arith.constant 0 : i32
    return %c0_i32, %c0_i32_0 : i32, i32
  }
  func.func @transform_3(%arg0: i32) -> (i32, i32) {
    %c0_i32 = arith.constant 0 : i32
    %c0_i32_0 = arith.constant 0 : i32
    %c0_i32_1 = arith.constant 0 : i32
    return %c0_i32, %c0_i32_0 : i32, i32
  }
}

module attributes {stable_mosaic.version = 11 : i64} {
  func.func @_lin1_heads_kernel(%arg0: i32, %arg1: memref<2x2592xbf16, #tpu.memory_space<vmem>>, %arg2: memref<2592x512xbf16, #tpu.memory_space<vmem>>, %arg3: memref<1x512xf32, #tpu.memory_space<vmem>>, %arg4: memref<512x128xbf16, #tpu.memory_space<vmem>>, %arg5: memref<1x128xf32, #tpu.memory_space<vmem>>, %arg6: memref<2x128xf32, #tpu.memory_space<vmem>>) attributes {dimension_semantics = [#tpu.dimension_semantics<arbitrary>], iteration_bounds = array<i64: 1>, scalar_prefetch = 0 : i64, scratch_operands = 0 : i64, tpu.core_type = #tpu.core_type<tc>, window_params = [{pipeline_mode = #tpu.pipeline_mode<synchronous>, transform_indices = @transform_0, window_bounds = array<i64: 2, 2592>}, {pipeline_mode = #tpu.pipeline_mode<synchronous>, transform_indices = @transform_1, window_bounds = array<i64: 2592, 512>}, {pipeline_mode = #tpu.pipeline_mode<synchronous>, transform_indices = @transform_2, window_bounds = array<i64: 1, 512>}, {pipeline_mode = #tpu.pipeline_mode<synchronous>, transform_indices = @transform_3, window_bounds = array<i64: 512, 128>}, {pipeline_mode = #tpu.pipeline_mode<synchronous>, transform_indices = @transform_4, window_bounds = array<i64: 1, 128>}, {pipeline_mode = #tpu.pipeline_mode<synchronous>, transform_indices = @transform_5, window_bounds = array<i64: 2, 128>}]} {
    %c0 = arith.constant 0 : index
    %c0_0 = arith.constant 0 : index
    %0 = vector.load %arg1[%c0, %c0_0] : memref<2x2592xbf16, #tpu.memory_space<vmem>>, vector<2x2592xbf16>
    %c0_1 = arith.constant 0 : index
    %c0_2 = arith.constant 0 : index
    %1 = vector.load %arg2[%c0_1, %c0_2] : memref<2592x512xbf16, #tpu.memory_space<vmem>>, vector<2592x512xbf16>
    %cst = arith.constant dense<0.000000e+00> : vector<2x512xf32>
    %2 = tpu.matmul %0, %1, %cst {dimension_numbers = #tpu.dot_dimension_numbers<[1], [0], [0], [1], [0, 0, 1, 1], [], []>} : vector<2x2592xbf16>, vector<2592x512xbf16>, vector<2x512xf32> -> vector<2x512xf32>
    %c0_3 = arith.constant 0 : index
    %c0_4 = arith.constant 0 : index
    %3 = vector.load %arg3[%c0_3, %c0_4] : memref<1x512xf32, #tpu.memory_space<vmem>>, vector<1x512xf32>
    %4 = vector.broadcast %3 : vector<1x512xf32> to vector<2x512xf32>
    %5 = arith.addf %2, %4 : vector<2x512xf32>
    %cst_5 = arith.constant 0.000000e+00 : f32
    %6 = vector.broadcast %cst_5 : f32 to vector<2x512xf32>
    %7 = arith.maximumf %5, %6 : vector<2x512xf32>
    %8 = arith.truncf %7 : vector<2x512xf32> to vector<2x512xbf16>
    %c0_6 = arith.constant 0 : index
    %c0_7 = arith.constant 0 : index
    %9 = vector.load %arg4[%c0_6, %c0_7] : memref<512x128xbf16, #tpu.memory_space<vmem>>, vector<512x128xbf16>
    %cst_8 = arith.constant dense<0.000000e+00> : vector<2x128xf32>
    %10 = tpu.matmul %8, %9, %cst_8 {dimension_numbers = #tpu.dot_dimension_numbers<[1], [0], [0], [1], [0, 0, 1, 1], [], []>} : vector<2x512xbf16>, vector<512x128xbf16>, vector<2x128xf32> -> vector<2x128xf32>
    %c0_9 = arith.constant 0 : index
    %c0_10 = arith.constant 0 : index
    %11 = vector.load %arg5[%c0_9, %c0_10] : memref<1x128xf32, #tpu.memory_space<vmem>>, vector<1x128xf32>
    %12 = vector.broadcast %11 : vector<1x128xf32> to vector<2x128xf32>
    %13 = arith.addf %10, %12 : vector<2x128xf32>
    %c0_11 = arith.constant 0 : index
    %c0_12 = arith.constant 0 : index
    %14 = vector.load %arg6[%c0_11, %c0_12] : memref<2x128xf32, #tpu.memory_space<vmem>>, vector<2x128xf32>
    tpu.vector_store %arg6[%c0_11, %c0_12], %13 {strides = array<i32>} : memref<2x128xf32, #tpu.memory_space<vmem>>, vector<2x128xf32>,
    return
  }
  func.func @transform_0(%arg0: i32) -> (i32, i32) {
    %c0_i32 = arith.constant 0 : i32
    %c0_i32_0 = arith.constant 0 : i32
    %c0_i32_1 = arith.constant 0 : i32
    return %c0_i32, %c0_i32_0 : i32, i32
  }
  func.func @transform_1(%arg0: i32) -> (i32, i32) {
    %c0_i32 = arith.constant 0 : i32
    %c0_i32_0 = arith.constant 0 : i32
    %c0_i32_1 = arith.constant 0 : i32
    return %c0_i32, %c0_i32_0 : i32, i32
  }
  func.func @transform_2(%arg0: i32) -> (i32, i32) {
    %c0_i32 = arith.constant 0 : i32
    %c0_i32_0 = arith.constant 0 : i32
    %c0_i32_1 = arith.constant 0 : i32
    return %c0_i32, %c0_i32_0 : i32, i32
  }
  func.func @transform_3(%arg0: i32) -> (i32, i32) {
    %c0_i32 = arith.constant 0 : i32
    %c0_i32_0 = arith.constant 0 : i32
    %c0_i32_1 = arith.constant 0 : i32
    return %c0_i32, %c0_i32_0 : i32, i32
  }
  func.func @transform_4(%arg0: i32) -> (i32, i32) {
    %c0_i32 = arith.constant 0 : i32
    %c0_i32_0 = arith.constant 0 : i32
    %c0_i32_1 = arith.constant 0 : i32
    return %c0_i32, %c0_i32_0 : i32, i32
  }
  func.func @transform_5(%arg0: i32) -> (i32, i32) {
    %c0_i32 = arith.constant 0 : i32
    %c0_i32_0 = arith.constant 0 : i32
    %c0_i32_1 = arith.constant 0 : i32
    return %c0_i32, %c0_i32_0 : i32, i32
  }
}

</mosaic_0001>

<bundles_post_ra>
// kernel: dueling_dqn_forward.3
= control target key start
LH: loop header
LB: loop body
LE: loop exit
PB: predicated region body
PF: predicated region fallthrough
CT: control target
= control target key end

     0   :  { %v2305_v0 = vmov 0   ;;  %vm1683_vm0 = vcmask 125952   ;;  %s3216_s1 = inlined_call_operand.vmem [shape: bf16[256,16], index: 1, kind: input, shape index: {}]   ;;  %s3217_s0 = inlined_call_operand.vmem [shape: bf16[800,256], index: 0, kind: input, shape index: {}]   ;;  %s3218_s2 = inlined_call_operand.vmem [shape: f32[1,16], index: 2, kind: input, shape index: {}]   ;;  %s3219_s3 = inlined_call_operand.vmem [shape: bf16[800,16], index: 3, kind: output, shape index: {}]  }
   0x1   :  { %750 = vmatprep.subr.bf16.mxu0 %v2305_v0  ;;  %2105 = vmatprep.subr.bf16.mxu1 %v2305_v0  ;;  %v2138_v1 = vld [vmem:[%s3216_s1] sm:$0xff]   ;;  %v2139_v2 = vld [vmem:[%s3216_s1 + $0x8] sm:$0xff]   ;;  %v2140_v3 = vld [vmem:[%s3216_s1 + $0x10] sm:$0xff]  }
   0x2   :  { %751 = vmatpush1.bf16.msra.mxu0 %v2138_v1  ;;  %2121 = vmatpush1.bf16.msra.mxu1 %v2138_v1  ;;  %v2141_v4 = vld [vmem:[%s3216_s1 + $0x18] sm:$0xff]   ;;  %v2142_v5 = vld [vmem:[%s3216_s1 + $0x20] sm:$0xff]   ;;  %v2143_v7 = vld [vmem:[%s3216_s1 + $0x28] sm:$0xff]  }
   0x3   :  { %752 = vmatprep.subr.bf16.mxu0 %v2305_v0  ;;  %2106 = vmatprep.subr.bf16.mxu1 %v2305_v0  ;;  %v2156_v6 = vld [vmem:[%s3217_s0 + $0x4] ss:$8 sps:$4 sm:$0xff]   ;;  %v2159_v8 = vld [vmem:[%s3217_s0 + $0x194] ss:$8 sps:$4 sm:$0xff]   ;;  %v2154_v19 = vld [vmem:[%s3217_s0] ss:$8 sps:$4 sm:$0xff]  }
   0x4   :  { %782 = vmatprep.mubr.bf16.mxu0 %v2156_v6  ;;  %982 = vmatprep.mubr.bf16.mxu1 %v2159_v8  ;;  %v2144_v9 = vld [vmem:[%s3216_s1 + $0x30] sm:$0xff]   ;;  %v2145_v10 = vld [vmem:[%s3216_s1 + $0x38] sm:$0xff]   ;;  %v2146_v11 = vld [vmem:[%s3216_s1 + $0x40] sm:$0xff]  }
   0x5   :  { %v2147_v12 = vld [vmem:[%s3216_s1 + $0x48] sm:$0xff]   ;;  %v2148_v13 = vld [vmem:[%s3216_s1 + $0x50] sm:$0xff]   ;;  %v2149_v14 = vld [vmem:[%s3216_s1 + $0x58] sm:$0xff]  }
   0x6   :  { %753 = vmatpush1.bf16.msra.mxu0 %v2139_v2  ;;  %2122 = vmatpush1.bf16.msra.mxu1 %v2139_v2  ;;  %v2150_v15 = vld [vmem:[%s3216_s1 + $0x60] sm:$0xff]   ;;  %v2151_v16 = vld [vmem:[%s3216_s1 + $0x68] sm:$0xff]   ;;  %v2152_v17 = vld [vmem:[%s3216_s1 + $0x70] sm:$0xff]  }
   0x7   :  { %754 = vmatprep.subr.bf16.mxu0 %v2305_v0  ;;  %2107 = vmatprep.subr.bf16.mxu1 %v2305_v0  ;;  %v2153_v18 = vld [vmem:[%s3216_s1 + $0x78] sm:$0xff]   ;;  %v2162_v22 = vld [vmem:[%s3217_s0 + $0x1a4] ss:$8 sps:$4 sm:$0xff]   ;;  %v2165_v24 = vld [vmem:[%s3217_s0 + $0x1a0] ss:$8 sps:$4 sm:$0xff]  }
   0x8   :  { %v2157_v20 = vld [vmem:[%s3217_s0 + $0x190] ss:$8 sps:$4 sm:$0xff]   ;;  %v2160_v21 = vld [vmem:[%s3217_s0 + $0x14] ss:$8 sps:$4 sm:$0xff]   ;;  %v2166_v25 = vld [vmem:[%s3217_s0 + $0x24] ss:$8 sps:$4 sm:$0xff]  }
   0x9   :  { %v2164_v23 = vld [vmem:[%s3217_s0 + $0x10] ss:$8 sps:$4 sm:$0xff]   ;;  %v2168_v26 = vld [vmem:[%s3217_s0 + $0x1b4] ss:$8 sps:$4 sm:$0xff]   ;;  %v2170_v27 = vld [vmem:[%s3217_s0 + $0x20] ss:$8 sps:$4 sm:$0xff]  }
   0xa   :  { %755 = vmatpush1.bf16.msra.mxu0 %v2140_v3  ;;  %2123 = vmatpush1.bf16.msra.mxu1 %v2140_v3  ;;  %v2171_v28 = vld [vmem:[%s3217_s0 + $0x1b0] ss:$8 sps:$4 sm:$0xff]   ;;  %v2172_v29 = vld [vmem:[%s3217_s0 + $0x34] ss:$8 sps:$4 sm:$0xff]   ;;  %v2174_v30 = vld [vmem:[%s3217_s0 + $0x1c4] ss:$8 sps:$4 sm:$0xff]  }
   0xb   :  { %756 = vmatprep.subr.bf16.mxu0 %v2305_v0  ;;  %2108 = vmatprep.subr.bf16.mxu1 %v2305_v0  ;;  %v2176_v31 = vld [vmem:[%s3217_s0 + $0x30] ss:$8 sps:$4 sm:$0xff]   ;;  %v2177_v32 = vld [vmem:[%s3217_s0 + $0x1c0] ss:$8 sps:$4 sm:$0xff]   ;;  %v2178_v33 = vld [vmem:[%s3217_s0 + $0x44] ss:$8 sps:$4 sm:$0xff]  }
   0xc   :  { %v2180_v34 = vld [vmem:[%s3217_s0 + $0x1d4] ss:$8 sps:$4 sm:$0xff]   ;;  %v2182_v35 = vld [vmem:[%s3217_s0 + $0x40] ss:$8 sps:$4 sm:$0xff]   ;;  %v2183_v36 = vld [vmem:[%s3217_s0 + $0x1d0] ss:$8 sps:$4 sm:$0xff]  }
   0xd   :  { %v2184_v37 = vld [vmem:[%s3217_s0 + $0x54] ss:$8 sps:$4 sm:$0xff]   ;;  %v2186_v38 = vld [vmem:[%s3217_s0 + $0x1e4] ss:$8 sps:$4 sm:$0xff]   ;;  %v2188_v39 = vld [vmem:[%s3217_s0 + $0x50] ss:$8 sps:$4 sm:$0xff]  }
   0xe   :  { %757 = vmatpush1.bf16.msra.mxu0 %v2141_v4  ;;  %2124 = vmatpush1.bf16.msra.mxu1 %v2141_v4  ;;  %v2189_v40 = vld [vmem:[%s3217_s0 + $0x1e0] ss:$8 sps:$4 sm:$0xff]   ;;  %v2190_v41 = vld [vmem:[%s3217_s0 + $0x64] ss:$8 sps:$4 sm:$0xff]   ;;  %v2192_v42 = vld [vmem:[%s3217_s0 + $0x1f4] ss:$8 sps:$4 sm:$0xff]  }
   0xf   :  { %758 = vmatprep.subr.bf16.mxu0 %v2305_v0  ;;  %2109 = vmatprep.subr.bf16.mxu1 %v2305_v0  ;;  %v2194_v43 = vld [vmem:[%s3217_s0 + $0x60] ss:$8 sps:$4 sm:$0xff]   ;;  %v2195_v44 = vld [vmem:[%s3217_s0 + $0x1f0] ss:$8 sps:$4 sm:$0xff]   ;;  %v2196_v45 = vld [vmem:[%s3217_s0 + $0x74] ss:$8 sps:$4 sm:$0xff]  }
  0x10   :  { %v2198_v46 = vld [vmem:[%s3217_s0 + $0x204] ss:$8 sps:$4 sm:$0xff]   ;;  %v2200_v47 = vld [vmem:[%s3217_s0 + $0x70] ss:$8 sps:$4 sm:$0xff]   ;;  %v2201_v48 = vld [vmem:[%s3217_s0 + $0x200] ss:$8 sps:$4 sm:$0xff]  }
  0x11   :  { %v2202_v49 = vld [vmem:[%s3217_s0 + $0x84] ss:$8 sps:$4 sm:$0xff]   ;;  %v2204_v50 = vld [vmem:[%s3217_s0 + $0x214] ss:$8 sps:$4 sm:$0xff]   ;;  %v2206_v51 = vld [vmem:[%s3217_s0 + $0x80] ss:$8 sps:$4 sm:$0xff]  }
  0x12   :  { %759 = vmatpush1.bf16.msra.mxu0 %v2142_v5  ;;  %2125 = vmatpush1.bf16.msra.mxu1 %v2142_v5  ;;  %v2207_v52 = vld [vmem:[%s3217_s0 + $0x210] ss:$8 sps:$4 sm:$0xff]   ;;  %v2208_v53 = vld [vmem:[%s3217_s0 + $0x94] ss:$8 sps:$4 sm:$0xff]   ;;  %v2210_v54 = vld [vmem:[%s3217_s0 + $0x224] ss:$8 sps:$4 sm:$0xff]  }
  0x13   :  { %760 = vmatprep.subr.bf16.mxu0 %v2305_v0  ;;  %2110 = vmatprep.subr.bf16.mxu1 %v2305_v0  ;;  %v2212_v55 = vld [vmem:[%s3217_s0 + $0x90] ss:$8 sps:$4 sm:$0xff]   ;;  %v2213_v56 = vld [vmem:[%s3217_s0 + $0x220] ss:$8 sps:$4 sm:$0xff]   ;;  %v2214_v57 = vld [vmem:[%s3217_s0 + $0xa4] ss:$8 sps:$4 sm:$0xff]  }
  0x14   :  { %v2216_v58 = vld [vmem:[%s3217_s0 + $0x234] ss:$8 sps:$4 sm:$0xff]   ;;  %v2218_v59 = vld [vmem:[%s3217_s0 + $0xa0] ss:$8 sps:$4 sm:$0xff]   ;;  %v2219_v60 = vld [vmem:[%s3217_s0 + $0x230] ss:$8 sps:$4 sm:$0xff]  }
  0x15   :  { %v2220_v61 = vld [vmem:[%s3217_s0 + $0xb4] ss:$8 sps:$4 sm:$0xff]   ;;  %v2222_v62 = vld [vmem:[%s3217_s0 + $0x244] ss:$8 sps:$4 sm:$0xff]   ;;  %v2224_v63 = vld [vmem:[%s3217_s0 + $0xb0] ss:$8 sps:$4 sm:$0xff]  }
  0x16   :  { %761 = vmatpush1.bf16.msra.mxu0 %v2143_v7  ;;  %2126 = vmatpush1.bf16.msra.mxu1 %v2143_v7  ;;  %v2226_v1 = vld [vmem:[%s3217_s0 + $0xc4] ss:$8 sps:$4 sm:$0xff]   ;;  %v2228_v2 = vld [vmem:[%s3217_s0 + $0x254] ss:$8 sps:$4 sm:$0xff]   ;;  %v2230_v3 = vld [vmem:[%s3217_s0 + $0xc0] ss:$8 sps:$4 sm:$0xff]  }
  0x17   :  { %762 = vmatprep.subr.bf16.mxu0 %v2305_v0  ;;  %2111 = vmatprep.subr.bf16.mxu1 %v2305_v0  ;;  %v2231_v4 = vld [vmem:[%s3217_s0 + $0x250] ss:$8 sps:$4 sm:$0xff]   ;;  %v2232_v5 = vld [vmem:[%s3217_s0 + $0xd4] ss:$8 sps:$4 sm:$0xff]   ;;  %v2234_v6 = vld [vmem:[%s3217_s0 + $0x264] ss:$8 sps:$4 sm:$0xff]  }
  0x18   :  { %v2236_v7 = vld [vmem:[%s3217_s0 + $0xd0] ss:$8 sps:$4 sm:$0xff]   ;;  %v2237_v8 = vld [vmem:[%s3217_s0 + $0x260] ss:$8 sps:$4 sm:$0xff]  }
  0x1a   :  { %763 = vmatpush1.bf16.msra.mxu0 %v2144_v9  ;;  %2127 = vmatpush1.bf16.msra.mxu1 %v2144_v9  ;;  %v2238_v9 = vld [vmem:[%s3217_s0 + $0xe4] ss:$8 sps:$4 sm:$0xff]  }
  0x1b   :  { %764 = vmatprep.subr.bf16.mxu0 %v2305_v0  ;;  %2112 = vmatprep.subr.bf16.mxu1 %v2305_v0 }
  0x1e   :  { %765 = vmatpush1.bf16.msra.mxu0 %v2145_v10  ;;  %2128 = vmatpush1.bf16.msra.mxu1 %v2145_v10  ;;  %v2240_v10 = vld [vmem:[%s3217_s0 + $0x274] ss:$8 sps:$4 sm:$0xff]  }
  0x1f   :  { %766 = vmatprep.subr.bf16.mxu0 %v2305_v0  ;;  %2113 = vmatprep.subr.bf16.mxu1 %v2305_v0 }
  0x22   :  { %767 = vmatpush1.bf16.msra.mxu0 %v2146_v11  ;;  %2129 = vmatpush1.bf16.msra.mxu1 %v2146_v11  ;;  %v2242_v11 = vld [vmem:[%s3217_s0 + $0xe0] ss:$8 sps:$4 sm:$0xff]  }
  0x23   :  { %768 = vmatprep.subr.bf16.mxu0 %v2305_v0  ;;  %2114 = vmatprep.subr.bf16.mxu1 %v2305_v0 }
  0x26   :  { %769 = vmatpush1.bf16.msra.mxu0 %v2147_v12  ;;  %2130 = vmatpush1.bf16.msra.mxu1 %v2147_v12  ;;  %v2243_v12 = vld [vmem:[%s3217_s0 + $0x270] ss:$8 sps:$4 sm:$0xff]  }
  0x27   :  { %770 = vmatprep.subr.bf16.mxu0 %v2305_v0  ;;  %2115 = vmatprep.subr.bf16.mxu1 %v2305_v0 }
  0x2a   :  { %771 = vmatpush1.bf16.msra.mxu0 %v2148_v13  ;;  %2131 = vmatpush1.bf16.msra.mxu1 %v2148_v13  ;;  %v2244_v13 = vld [vmem:[%s3217_s0 + $0xf4] ss:$8 sps:$4 sm:$0xff]  }
  0x2b   :  { %772 = vmatprep.subr.bf16.mxu0 %v2305_v0  ;;  %2116 = vmatprep.subr.bf16.mxu1 %v2305_v0 }
  0x2e   :  { %773 = vmatpush1.bf16.msra.mxu0 %v2149_v14  ;;  %2132 = vmatpush1.bf16.msra.mxu1 %v2149_v14  ;;  %v2246_v14 = vld [vmem:[%s3217_s0 + $0x284] ss:$8 sps:$4 sm:$0xff]  }
  0x2f   :  { %774 = vmatprep.subr.bf16.mxu0 %v2305_v0  ;;  %2117 = vmatprep.subr.bf16.mxu1 %v2305_v0 }
  0x32   :  { %775 = vmatpush1.bf16.msra.mxu0 %v2150_v15  ;;  %2133 = vmatpush1.bf16.msra.mxu1 %v2150_v15  ;;  %v2248_v15 = vld [vmem:[%s3217_s0 + $0xf0] ss:$8 sps:$4 sm:$0xff]  }
  0x33   :  { %776 = vmatprep.subr.bf16.mxu0 %v2305_v0  ;;  %2118 = vmatprep.subr.bf16.mxu1 %v2305_v0 }
  0x36   :  { %777 = vmatpush1.bf16.msra.mxu0 %v2151_v16  ;;  %2134 = vmatpush1.bf16.msra.mxu1 %v2151_v16  ;;  %v2249_v16 = vld [vmem:[%s3217_s0 + $0x280] ss:$8 sps:$4 sm:$0xff]  }
  0x37   :  { %778 = vmatprep.subr.bf16.mxu0 %v2305_v0  ;;  %2119 = vmatprep.subr.bf16.mxu1 %v2305_v0 }
  0x3a   :  { %779 = vmatpush1.bf16.msra.mxu0 %v2152_v17  ;;  %2135 = vmatpush1.bf16.msra.mxu1 %v2152_v17  ;;  %v2250_v17 = vld [vmem:[%s3217_s0 + $0x104] ss:$8 sps:$4 sm:$0xff]  }
  0x3b   :  { %780 = vmatprep.subr.bf16.mxu0 %v2305_v0  ;;  %2120 = vmatprep.subr.bf16.mxu1 %v2305_v0  ;;  %v2225_v0 = vld [vmem:[%s3217_s0 + $0x240] ss:$8 sps:$4 sm:$0xff]  }
  0x3e   :  { %781 = vmatpush1.bf16.msra.mxu0 %v2153_v18  ;;  %2136 = vmatpush1.bf16.msra.mxu1 %v2153_v18  ;;  %v2252_v18 = vld [vmem:[%s3217_s0 + $0x294] ss:$8 sps:$4 sm:$0xff]  }
  0x41   :  { %783 = vmatmul.mubr.bf16.vlgmr.msra.gmra.mrb[0].mxu0 %v2154_v19  ;;  %983 = vmatmul.mubr.bf16.vlgmr.msra.gmra.mrb[0].mxu1 %v2157_v20  ;;  %v2254_v19 = vld [vmem:[%s3217_s0 + $0x100] ss:$8 sps:$4 sm:$0xff]   ;;  %v2255_v20 = vld [vmem:[%s3217_s0 + $0x290] ss:$8 sps:$4 sm:$0xff]  }
  0x42   :  { %790 = vmatprep.mubr.bf16.mxu0 %v2160_v21  ;;  %990 = vmatprep.mubr.bf16.mxu1 %v2162_v22  ;;  %v2256_v21 = vld [vmem:[%s3217_s0 + $0x114] ss:$8 sps:$4 sm:$0xff]   ;;  %v2258_v22 = vld [vmem:[%s3217_s0 + $0x2a4] ss:$8 sps:$4 sm:$0xff]  }
  0x49   :  { %791 = vmatmul.mubr.bf16.gmra.mrb[4].mxu0 %v2164_v23  ;;  %991 = vmatmul.mubr.bf16.gmra.mrb[4].mxu1 %v2165_v24  ;;  %v2260_v23 = vld [vmem:[%s3217_s0 + $0x110] ss:$8 sps:$4 sm:$0xff]   ;;  %v2261_v24 = vld [vmem:[%s3217_s0 + $0x2a0] ss:$8 sps:$4 sm:$0xff]  }
  0x4a   :  { %798 = vmatprep.mubr.bf16.mxu0 %v2166_v25  ;;  %998 = vmatprep.mubr.bf16.mxu1 %v2168_v26  ;;  %v2262_v25 = vld [vmem:[%s3217_s0 + $0x124] ss:$8 sps:$4 sm:$0xff]   ;;  %v2264_v26 = vld [vmem:[%s3217_s0 + $0x2b4] ss:$8 sps:$4 sm:$0xff]  }
  0x51   :  { %799 = vmatmul.mubr.bf16.gmra.mrb[8].mxu0 %v2170_v27  ;;  %999 = vmatmul.mubr.bf16.gmra.mrb[8].mxu1 %v2171_v28  ;;  %v2266_v27 = vld [vmem:[%s3217_s0 + $0x120] ss:$8 sps:$4 sm:$0xff]   ;;  %v2267_v28 = vld [vmem:[%s3217_s0 + $0x2b0] ss:$8 sps:$4 sm:$0xff]  }
  0x52   :  { %806 = vmatprep.mubr.bf16.mxu0 %v2172_v29  ;;  %1006 = vmatprep.mubr.bf16.mxu1 %v2174_v30  ;;  %v2268_v29 = vld [vmem:[%s3217_s0 + $0x134] ss:$8 sps:$4 sm:$0xff]   ;;  %v2270_v30 = vld [vmem:[%s3217_s0 + $0x2c4] ss:$8 sps:$4 sm:$0xff]  }
  0x59   :  { %807 = vmatmul.mubr.bf16.gmra.mrb[12].mxu0 %v2176_v31  ;;  %1007 = vmatmul.mubr.bf16.gmra.mrb[12].mxu1 %v2177_v32  ;;  %v2272_v31 = vld [vmem:[%s3217_s0 + $0x130] ss:$8 sps:$4 sm:$0xff]   ;;  %v2273_v32 = vld [vmem:[%s3217_s0 + $0x2c0] ss:$8 sps:$4 sm:$0xff]  }
  0x5a   :  { %814 = vmatprep.mubr.bf16.mxu0 %v2178_v33  ;;  %1014 = vmatprep.mubr.bf16.mxu1 %v2180_v34  ;;  %v2274_v33 = vld [vmem:[%s3217_s0 + $0x144] ss:$8 sps:$4 sm:$0xff]   ;;  %v2276_v34 = vld [vmem:[%s3217_s0 + $0x2d4] ss:$8 sps:$4 sm:$0xff]  }
  0x61   :  { %815 = vmatmul.mubr.bf16.gmra.mrb[16].mxu0 %v2182_v35  ;;  %1015 = vmatmul.mubr.bf16.gmra.mrb[16].mxu1 %v2183_v36  ;;  %v2278_v35 = vld [vmem:[%s3217_s0 + $0x140] ss:$8 sps:$4 sm:$0xff]   ;;  %v2279_v36 = vld [vmem:[%s3217_s0 + $0x2d0] ss:$8 sps:$4 sm:$0xff]  }
  0x62   :  { %822 = vmatprep.mubr.bf16.mxu0 %v2184_v37  ;;  %1022 = vmatprep.mubr.bf16.mxu1 %v2186_v38  ;;  %v2280_v37 = vld [vmem:[%s3217_s0 + $0x154] ss:$8 sps:$4 sm:$0xff]   ;;  %v2282_v38 = vld [vmem:[%s3217_s0 + $0x2e4] ss:$8 sps:$4 sm:$0xff]  }
  0x69   :  { %823 = vmatmul.mubr.bf16.gmra.mrb[20].mxu0 %v2188_v39  ;;  %1023 = vmatmul.mubr.bf16.gmra.mrb[20].mxu1 %v2189_v40  ;;  %v2284_v39 = vld [vmem:[%s3217_s0 + $0x150] ss:$8 sps:$4 sm:$0xff]   ;;  %v2285_v40 = vld [vmem:[%s3217_s0 + $0x2e0] ss:$8 sps:$4 sm:$0xff]  }
  0x6a   :  { %830 = vmatprep.mubr.bf16.mxu0 %v2190_v41  ;;  %1030 = vmatprep.mubr.bf16.mxu1 %v2192_v42  ;;  %v2286_v41 = vld [vmem:[%s3217_s0 + $0x164] ss:$8 sps:$4 sm:$0xff]   ;;  %v2288_v42 = vld [vmem:[%s3217_s0 + $0x2f4] ss:$8 sps:$4 sm:$0xff]  }
  0x71   :  { %831 = vmatmul.mubr.bf16.gmra.mrb[24].mxu0 %v2194_v43  ;;  %1031 = vmatmul.mubr.bf16.gmra.mrb[24].mxu1 %v2195_v44  ;;  %v2290_v43 = vld [vmem:[%s3217_s0 + $0x160] ss:$8 sps:$4 sm:$0xff]   ;;  %v2291_v44 = vld [vmem:[%s3217_s0 + $0x2f0] ss:$8 sps:$4 sm:$0xff]  }
  0x72   :  { %838 = vmatprep.mubr.bf16.mxu0 %v2196_v45  ;;  %1038 = vmatprep.mubr.bf16.mxu1 %v2198_v46  ;;  %v2292_v45 = vld [vmem:[%s3217_s0 + $0x174] ss:$8 sps:$4 sm:$0xff]   ;;  %v2294_v46 = vld [vmem:[%s3217_s0 + $0x304] ss:$8 sps:$4 sm:$0xff]  }
  0x79   :  { %839 = vmatmul.mubr.bf16.gmra.mrb[28].mxu0 %v2200_v47  ;;  %1039 = vmatmul.mubr.bf16.gmra.mrb[28].mxu1 %v2201_v48  ;;  %v2296_v47 = vld [vmem:[%s3217_s0 + $0x170] ss:$8 sps:$4 sm:$0xff]   ;;  %v2297_v48 = vld [vmem:[%s3217_s0 + $0x300] ss:$8 sps:$4 sm:$0xff]  }
  0x7a   :  { %846 = vmatprep.mubr.bf16.mxu0 %v2202_v49  ;;  %1046 = vmatprep.mubr.bf16.mxu1 %v2204_v50  ;;  %v2298_v49 = vld [vmem:[%s3217_s0 + $0x184] ss:$8 sps:$4 sm:$0xff]   ;;  %v2300_v50 = vld [vmem:[%s3217_s0 + $0x314] ss:$8 sps:$4 sm:$0xff]  }
  0x81   :  { %847 = vmatmul.mubr.bf16.gmra.mrb[32].mxu0 %v2206_v51  ;;  %1047 = vmatmul.mubr.bf16.gmra.mrb[32].mxu1 %v2207_v52  ;;  %v2302_v51 = vld [vmem:[%s3217_s0 + $0x180] ss:$8 sps:$4 sm:$0xff]   ;;  %v2303_v52 = vld [vmem:[%s3217_s0 + $0x310] ss:$8 sps:$4 sm:$0xff]  }
  0x82   :  { %854 = vmatprep.mubr.bf16.mxu0 %v2208_v53  ;;  %1054 = vmatprep.mubr.bf16.mxu1 %v2210_v54  ;;  %v2709_v53 = vld [vmem:[%s3218_s2] ss:$0 sm:$0xff] }
  0x89   :  { %855 = vmatmul.mubr.bf16.gmra.mrb[36].mxu0 %v2212_v55  ;;  %1055 = vmatmul.mubr.bf16.gmra.mrb[36].mxu1 %v2213_v56 }
  0x8a   :  { %862 = vmatprep.mubr.bf16.mxu0 %v2214_v57  ;;  %1062 = vmatprep.mubr.bf16.mxu1 %v2216_v58 }
  0x91   :  { %863 = vmatmul.mubr.bf16.gmra.mrb[40].mxu0 %v2218_v59  ;;  %1063 = vmatmul.mubr.bf16.gmra.mrb[40].mxu1 %v2219_v60 }
  0x92   :  { %870 = vmatprep.mubr.bf16.mxu0 %v2220_v61  ;;  %1070 = vmatprep.mubr.bf16.mxu1 %v2222_v62 }
  0x99   :  { %871 = vmatmul.mubr.bf16.gmra.mrb[44].mxu0 %v2224_v63  ;;  %1071 = vmatmul.mubr.bf16.gmra.mrb[44].mxu1 %v2225_v0 }
  0x9a   :  { %878 = vmatprep.mubr.bf16.mxu0 %v2226_v1  ;;  %1078 = vmatprep.mubr.bf16.mxu1 %v2228_v2 }
  0xa1   :  { %879 = vmatmul.mubr.bf16.gmra.mrb[48].mxu0 %v2230_v3  ;;  %1079 = vmatmul.mubr.bf16.gmra.mrb[48].mxu1 %v2231_v4 }
  0xa2   :  { %886 = vmatprep.mubr.bf16.mxu0 %v2232_v5  ;;  %1086 = vmatprep.mubr.bf16.mxu1 %v2234_v6 }
  0xa9   :  { %887 = vmatmul.mubr.bf16.gmra.mrb[52].mxu0 %v2236_v7  ;;  %1087 = vmatmul.mubr.bf16.gmra.mrb[52].mxu1 %v2237_v8 }
  0xaa   :  { %894 = vmatprep.mubr.bf16.mxu0 %v2238_v9  ;;  %1094 = vmatprep.mubr.bf16.mxu1 %v2240_v10 }
  0xb1   :  { %895 = vmatmul.mubr.bf16.gmra.mrb[56].mxu0 %v2242_v11  ;;  %1095 = vmatmul.mubr.bf16.gmra.mrb[56].mxu1 %v2243_v12 }
  0xb2   :  { %902 = vmatprep.mubr.bf16.mxu0 %v2244_v13  ;;  %1102 = vmatprep.mubr.bf16.mxu1 %v2246_v14 }
  0xb9   :  { %903 = vmatmul.mubr.bf16.gmra.mrb[60].mxu0 %v2248_v15  ;;  %1103 = vmatmul.mubr.bf16.gmra.mrb[60].mxu1 %v2249_v16 }
  0xba   :  { %910 = vmatprep.mubr.bf16.mxu0 %v2250_v17  ;;  %1110 = vmatprep.mubr.bf16.mxu1 %v2252_v18 }
  0xc1   :  { %911 = vmatmul.mubr.bf16.gmra.mrb[64].mxu0 %v2254_v19  ;;  %1111 = vmatmul.mubr.bf16.gmra.mrb[64].mxu1 %v2255_v20 }
  0xc2   :  { %918 = vmatprep.mubr.bf16.mxu0 %v2256_v21  ;;  %1118 = vmatprep.mubr.bf16.mxu1 %v2258_v22 }
  0xc9   :  { %919 = vmatmul.mubr.bf16.gmra.mrb[68].mxu0 %v2260_v23  ;;  %1119 = vmatmul.mubr.bf16.gmra.mrb[68].mxu1 %v2261_v24 }
  0xca   :  { %926 = vmatprep.mubr.bf16.mxu0 %v2262_v25  ;;  %1126 = vmatprep.mubr.bf16.mxu1 %v2264_v26 }
  0xd1   :  { %927 = vmatmul.mubr.bf16.gmra.mrb[72].mxu0 %v2266_v27  ;;  %1127 = vmatmul.mubr.bf16.gmra.mrb[72].mxu1 %v2267_v28 }
  0xd2   :  { %934 = vmatprep.mubr.bf16.mxu0 %v2268_v29  ;;  %1134 = vmatprep.mubr.bf16.mxu1 %v2270_v30 }
  0xd9   :  { %935 = vmatmul.mubr.bf16.gmra.mrb[76].mxu0 %v2272_v31  ;;  %1135 = vmatmul.mubr.bf16.gmra.mrb[76].mxu1 %v2273_v32 }
  0xda   :  { %942 = vmatprep.mubr.bf16.mxu0 %v2274_v33  ;;  %1142 = vmatprep.mubr.bf16.mxu1 %v2276_v34 }
  0xe1   :  { %943 = vmatmul.mubr.bf16.gmra.mrb[80].mxu0 %v2278_v35  ;;  %1143 = vmatmul.mubr.bf16.gmra.mrb[80].mxu1 %v2279_v36 }
  0xe2   :  { %950 = vmatprep.mubr.bf16.mxu0 %v2280_v37  ;;  %1150 = vmatprep.mubr.bf16.mxu1 %v2282_v38 }
  0xe9   :  { %951 = vmatmul.mubr.bf16.gmra.mrb[84].mxu0 %v2284_v39  ;;  %1151 = vmatmul.mubr.bf16.gmra.mrb[84].mxu1 %v2285_v40 }
  0xea   :  { %958 = vmatprep.mubr.bf16.mxu0 %v2286_v41  ;;  %1158 = vmatprep.mubr.bf16.mxu1 %v2288_v42 }
  0xf1   :  { %959 = vmatmul.mubr.bf16.gmra.mrb[88].mxu0 %v2290_v43  ;;  %1159 = vmatmul.mubr.bf16.gmra.mrb[88].mxu1 %v2291_v44 }
  0xf2   :  { %966 = vmatprep.mubr.bf16.mxu0 %v2292_v45  ;;  %1166 = vmatprep.mubr.bf16.mxu1 %v2294_v46 }
  0xf9   :  { %967 = vmatmul.mubr.bf16.gmra.mrb[92].mxu0 %v2296_v47  ;;  %1167 = vmatmul.mubr.bf16.gmra.mrb[92].mxu1 %v2297_v48 }
  0xfa   :  { %974 = vmatprep.mubr.bf16.mxu0 %v2298_v49  ;;  %1174 = vmatprep.mubr.bf16.mxu1 %v2300_v50 }
 0x101   :  { %975 = vmatmul.mubr.bf16.gmra.mrb[96].mxu0 %v2302_v51  ;;  %1175 = vmatmul.mubr.bf16.gmra.mrb[96].mxu1 %v2303_v52 }
 0x114   :  { %v784_v54 = vpop.f32.mrb[0].mxu0  ;;  %v984_v55 = vpop.f32.mrb[0].mxu1 }
 0x115   :  { %v785_v56 = vadd.f32 %v2709_v53, %v784_v54  ;;  %v985_v57 = vadd.f32 %v2709_v53, %v984_v55  ;;  %v786_v58 = vpop.f32.mrb[1].mxu0  ;;  %v986_v59 = vpop.f32.mrb[1].mxu1 }
 0x116   :  { %v787_v60 = vpop.f32.mrb[2].mxu0  ;;  %v987_v61 = vpop.f32.mrb[2].mxu1 }
 0x117   :  { %v1183_v62 = vmax.f32 %v785_v56, 0.0  ;;  %v1233_v63 = vmax.f32 %v985_v57, 0.0  ;;  %v788_v0 = vadd.f32 %v2709_v53, %v787_v60  ;;  %v988_v1 = vadd.f32 %v2709_v53, %v987_v61  ;;  %v789_v2 = vpop.f32.mrb[3].mxu0  ;;  %v989_v3 = vpop.f32.mrb[3].mxu1 }
 0x119   :  { %v2005_v4 = vpack.c.bf16 %v1183_v62, %v1183_v62  ;;  %v2055_v5 = vpack.c.bf16 %v1233_v63, %v1233_v63  ;;  %v1184_v6 = vmax.f32 %v788_v0, 0.0  ;;  %v1234_v7 = vmax.f32 %v988_v1, 0.0 }
 0x11b   :  { %1684 = vst.msk [vmem:[%s3219_s3] sm:$0xf] %vm1683_vm0, %v2005_v4  ;;  %1734 = vst.msk [vmem:[%s3219_s3 + $0xc8] sm:$0xf] %vm1683_vm0, %v2055_v5  ;;  %v2006_v8 = vpack.c.bf16 %v1184_v6, %v1184_v6  ;;  %v2056_v9 = vpack.c.bf16 %v1234_v7, %v1234_v7 }
 0x11c   :  { %v792_v10 = vpop.f32.mrb[4].mxu0  ;;  %v992_v11 = vpop.f32.mrb[4].mxu1 }
 0x11d   :  { %1685 = vst.msk [vmem:[%s3219_s3 + $0x4] sm:$0xf] %vm1683_vm0, %v2006_v8  ;;  %1735 = vst.msk [vmem:[%s3219_s3 + $0xcc] sm:$0xf] %vm1683_vm0, %v2056_v9  ;;  %v793_v12 = vadd.f32 %v2709_v53, %v792_v10  ;;  %v993_v13 = vadd.f32 %v2709_v53, %v992_v11  ;;  %v794_v14 = vpop.f32.mrb[5].mxu0  ;;  %v994_v15 = vpop.f32.mrb[5].mxu1 }
 0x11e   :  { %v795_v16 = vpop.f32.mrb[6].mxu0  ;;  %v995_v17 = vpop.f32.mrb[6].mxu1 }
 0x11f   :  { %v1185_v18 = vmax.f32 %v793_v12, 0.0  ;;  %v1235_v19 = vmax.f32 %v993_v13, 0.0  ;;  %v796_v20 = vadd.f32 %v2709_v53, %v795_v16  ;;  %v996_v21 = vadd.f32 %v2709_v53, %v995_v17  ;;  %v797_v22 = vpop.f32.mrb[7].mxu0  ;;  %v997_v23 = vpop.f32.mrb[7].mxu1 }
 0x121   :  { %v2007_v24 = vpack.c.bf16 %v1185_v18, %v1185_v18  ;;  %v2057_v25 = vpack.c.bf16 %v1235_v19, %v1235_v19  ;;  %v1186_v26 = vmax.f32 %v796_v20, 0.0  ;;  %v1236_v27 = vmax.f32 %v996_v21, 0.0 }
 0x123   :  { %1686 = vst.msk [vmem:[%s3219_s3 + $0x8] sm:$0xf] %vm1683_vm0, %v2007_v24  ;;  %1736 = vst.msk [vmem:[%s3219_s3 + $0xd0] sm:$0xf] %vm1683_vm0, %v2057_v25  ;;  %v2008_v28 = vpack.c.bf16 %v1186_v26, %v1186_v26  ;;  %v2058_v29 = vpack.c.bf16 %v1236_v27, %v1236_v27 }
 0x124   :  { %v800_v30 = vpop.f32.mrb[8].mxu0  ;;  %v1000_v31 = vpop.f32.mrb[8].mxu1 }
 0x125   :  { %1687 = vst.msk [vmem:[%s3219_s3 + $0xc] sm:$0xf] %vm1683_vm0, %v2008_v28  ;;  %1737 = vst.msk [vmem:[%s3219_s3 + $0xd4] sm:$0xf] %vm1683_vm0, %v2058_v29  ;;  %v801_v32 = vadd.f32 %v2709_v53, %v800_v30  ;;  %v1001_v33 = vadd.f32 %v2709_v53, %v1000_v31  ;;  %v802_v34 = vpop.f32.mrb[9].mxu0  ;;  %v1002_v35 = vpop.f32.mrb[9].mxu1 }
 0x126   :  { %v803_v36 = vpop.f32.mrb[10].mxu0  ;;  %v1003_v37 = vpop.f32.mrb[10].mxu1 }
 0x127   :  { %v1187_v38 = vmax.f32 %v801_v32, 0.0  ;;  %v1237_v39 = vmax.f32 %v1001_v33, 0.0  ;;  %v804_v40 = vadd.f32 %v2709_v53, %v803_v36  ;;  %v1004_v41 = vadd.f32 %v2709_v53, %v1003_v37  ;;  %v805_v42 = vpop.f32.mrb[11].mxu0  ;;  %v1005_v43 = vpop.f32.mrb[11].mxu1 }
 0x129   :  { %v2009_v44 = vpack.c.bf16 %v1187_v38, %v1187_v38  ;;  %v2059_v45 = vpack.c.bf16 %v1237_v39, %v1237_v39  ;;  %v1188_v46 = vmax.f32 %v804_v40, 0.0  ;;  %v1238_v47 = vmax.f32 %v1004_v41, 0.0 }
 0x12b   :  { %1688 = vst.msk [vmem:[%s3219_s3 + $0x10] sm:$0xf] %vm1683_vm0, %v2009_v44  ;;  %1738 = vst.msk [vmem:[%s3219_s3 + $0xd8] sm:$0xf] %vm1683_vm0, %v2059_v45  ;;  %v2010_v48 = vpack.c.bf16 %v1188_v46, %v1188_v46  ;;  %v2060_v49 = vpack.c.bf16 %v1238_v47, %v1238_v47 }
 0x12c   :  { %v808_v50 = vpop.f32.mrb[12].mxu0  ;;  %v1008_v51 = vpop.f32.mrb[12].mxu1 }
 0x12d   :  { %1689 = vst.msk [vmem:[%s3219_s3 + $0x14] sm:$0xf] %vm1683_vm0, %v2010_v48  ;;  %1739 = vst.msk [vmem:[%s3219_s3 + $0xdc] sm:$0xf] %vm1683_vm0, %v2060_v49  ;;  %v809_v52 = vadd.f32 %v2709_v53, %v808_v50  ;;  %v1009_v54 = vadd.f32 %v2709_v53, %v1008_v51  ;;  %v810_v55 = vpop.f32.mrb[13].mxu0  ;;  %v1010_v56 = vpop.f32.mrb[13].mxu1 }
 0x12e   :  { %v811_v57 = vpop.f32.mrb[14].mxu0  ;;  %v1011_v58 = vpop.f32.mrb[14].mxu1 }
 0x12f   :  { %v1189_v59 = vmax.f32 %v809_v52, 0.0  ;;  %v1239_v60 = vmax.f32 %v1009_v54, 0.0  ;;  %v812_v61 = vadd.f32 %v2709_v53, %v811_v57  ;;  %v1012_v62 = vadd.f32 %v2709_v53, %v1011_v58  ;;  %v813_v63 = vpop.f32.mrb[15].mxu0  ;;  %v1013_v0 = vpop.f32.mrb[15].mxu1 }
 0x131   :  { %v2011_v1 = vpack.c.bf16 %v1189_v59, %v1189_v59  ;;  %v2061_v2 = vpack.c.bf16 %v1239_v60, %v1239_v60  ;;  %v1190_v3 = vmax.f32 %v812_v61, 0.0  ;;  %v1240_v4 = vmax.f32 %v1012_v62, 0.0 }
 0x133   :  { %1690 = vst.msk [vmem:[%s3219_s3 + $0x18] sm:$0xf] %vm1683_vm0, %v2011_v1  ;;  %1740 = vst.msk [vmem:[%s3219_s3 + $0xe0] sm:$0xf] %vm1683_vm0, %v2061_v2  ;;  %v2012_v5 = vpack.c.bf16 %v1190_v3, %v1190_v3  ;;  %v2062_v6 = vpack.c.bf16 %v1240_v4, %v1240_v4 }
 0x134   :  { %v816_v7 = vpop.f32.mrb[16].mxu0  ;;  %v1016_v8 = vpop.f32.mrb[16].mxu1 }
 0x135   :  { %1691 = vst.msk [vmem:[%s3219_s3 + $0x1c] sm:$0xf] %vm1683_vm0, %v2012_v5  ;;  %1741 = vst.msk [vmem:[%s3219_s3 + $0xe4] sm:$0xf] %vm1683_vm0, %v2062_v6  ;;  %v817_v9 = vadd.f32 %v2709_v53, %v816_v7  ;;  %v1017_v10 = vadd.f32 %v2709_v53, %v1016_v8  ;;  %v818_v11 = vpop.f32.mrb[17].mxu0  ;;  %v1018_v12 = vpop.f32.mrb[17].mxu1 }
 0x136   :  { %v819_v13 = vpop.f32.mrb[18].mxu0  ;;  %v1019_v14 = vpop.f32.mrb[18].mxu1 }
 0x137   :  { %v1191_v15 = vmax.f32 %v817_v9, 0.0  ;;  %v1241_v16 = vmax.f32 %v1017_v10, 0.0  ;;  %v820_v17 = vadd.f32 %v2709_v53, %v819_v13  ;;  %v1020_v18 = vadd.f32 %v2709_v53, %v1019_v14  ;;  %v821_v19 = vpop.f32.mrb[19].mxu0  ;;  %v1021_v20 = vpop.f32.mrb[19].mxu1 }
 0x139   :  { %v2013_v21 = vpack.c.bf16 %v1191_v15, %v1191_v15  ;;  %v2063_v22 = vpack.c.bf16 %v1241_v16, %v1241_v16  ;;  %v1192_v23 = vmax.f32 %v820_v17, 0.0  ;;  %v1242_v24 = vmax.f32 %v1020_v18, 0.0 }
 0x13b   :  { %1692 = vst.msk [vmem:[%s3219_s3 + $0x20] sm:$0xf] %vm1683_vm0, %v2013_v21  ;;  %1742 = vst.msk [vmem:[%s3219_s3 + $0xe8] sm:$0xf] %vm1683_vm0, %v2063_v22  ;;  %v2014_v25 = vpack.c.bf16 %v1192_v23, %v1192_v23  ;;  %v2064_v26 = vpack.c.bf16 %v1242_v24, %v1242_v24 }
 0x13c   :  { %v824_v27 = vpop.f32.mrb[20].mxu0  ;;  %v1024_v28 = vpop.f32.mrb[20].mxu1 }
 0x13d   :  { %1693 = vst.msk [vmem:[%s3219_s3 + $0x24] sm:$0xf] %vm1683_vm0, %v2014_v25  ;;  %1743 = vst.msk [vmem:[%s3219_s3 + $0xec] sm:$0xf] %vm1683_vm0, %v2064_v26  ;;  %v825_v29 = vadd.f32 %v2709_v53, %v824_v27  ;;  %v1025_v30 = vadd.f32 %v2709_v53, %v1024_v28  ;;  %v826_v31 = vpop.f32.mrb[21].mxu0  ;;  %v1026_v32 = vpop.f32.mrb[21].mxu1 }
 0x13e   :  { %v827_v33 = vpop.f32.mrb[22].mxu0  ;;  %v1027_v34 = vpop.f32.mrb[22].mxu1 }
 0x13f   :  { %v1193_v35 = vmax.f32 %v825_v29, 0.0  ;;  %v1243_v36 = vmax.f32 %v1025_v30, 0.0  ;;  %v828_v37 = vadd.f32 %v2709_v53, %v827_v33  ;;  %v1028_v38 = vadd.f32 %v2709_v53, %v1027_v34  ;;  %v829_v39 = vpop.f32.mrb[23].mxu0  ;;  %v1029_v40 = vpop.f32.mrb[23].mxu1 }
 0x141   :  { %v2015_v41 = vpack.c.bf16 %v1193_v35, %v1193_v35  ;;  %v2065_v42 = vpack.c.bf16 %v1243_v36, %v1243_v36  ;;  %v1194_v43 = vmax.f32 %v828_v37, 0.0  ;;  %v1244_v44 = vmax.f32 %v1028_v38, 0.0 }
 0x143   :  { %1694 = vst.msk [vmem:[%s3219_s3 + $0x28] sm:$0xf] %vm1683_vm0, %v2015_v41  ;;  %1744 = vst.msk [vmem:[%s3219_s3 + $0xf0] sm:$0xf] %vm1683_vm0, %v2065_v42  ;;  %v2016_v45 = vpack.c.bf16 %v1194_v43, %v1194_v43  ;;  %v2066_v46 = vpack.c.bf16 %v1244_v44, %v1244_v44 }
 0x144   :  { %v832_v47 = vpop.f32.mrb[24].mxu0  ;;  %v1032_v48 = vpop.f32.mrb[24].mxu1 }
 0x145   :  { %1695 = vst.msk [vmem:[%s3219_s3 + $0x2c] sm:$0xf] %vm1683_vm0, %v2016_v45  ;;  %1745 = vst.msk [vmem:[%s3219_s3 + $0xf4] sm:$0xf] %vm1683_vm0, %v2066_v46  ;;  %v833_v49 = vadd.f32 %v2709_v53, %v832_v47  ;;  %v1033_v50 = vadd.f32 %v2709_v53, %v1032_v48  ;;  %v834_v51 = vpop.f32.mrb[25].mxu0  ;;  %v1034_v52 = vpop.f32.mrb[25].mxu1 }
 0x146   :  { %v835_v54 = vpop.f32.mrb[26].mxu0  ;;  %v1035_v55 = vpop.f32.mrb[26].mxu1 }
 0x147   :  { %v1195_v56 = vmax.f32 %v833_v49, 0.0  ;;  %v1245_v57 = vmax.f32 %v1033_v50, 0.0  ;;  %v836_v58 = vadd.f32 %v2709_v53, %v835_v54  ;;  %v1036_v59 = vadd.f32 %v2709_v53, %v1035_v55  ;;  %v837_v60 = vpop.f32.mrb[27].mxu0  ;;  %v1037_v61 = vpop.f32.mrb[27].mxu1 }
 0x149   :  { %v2017_v62 = vpack.c.bf16 %v1195_v56, %v1195_v56  ;;  %v2067_v63 = vpack.c.bf16 %v1245_v57, %v1245_v57  ;;  %v1196_v0 = vmax.f32 %v836_v58, 0.0  ;;  %v1246_v1 = vmax.f32 %v1036_v59, 0.0 }
 0x14b   :  { %1696 = vst.msk [vmem:[%s3219_s3 + $0x30] sm:$0xf] %vm1683_vm0, %v2017_v62  ;;  %1746 = vst.msk [vmem:[%s3219_s3 + $0xf8] sm:$0xf] %vm1683_vm0, %v2067_v63  ;;  %v2018_v2 = vpack.c.bf16 %v1196_v0, %v1196_v0  ;;  %v2068_v3 = vpack.c.bf16 %v1246_v1, %v1246_v1 }
 0x14c   :  { %v840_v4 = vpop.f32.mrb[28].mxu0  ;;  %v1040_v5 = vpop.f32.mrb[28].mxu1 }
 0x14d   :  { %1697 = vst.msk [vmem:[%s3219_s3 + $0x34] sm:$0xf] %vm1683_vm0, %v2018_v2  ;;  %1747 = vst.msk [vmem:[%s3219_s3 + $0xfc] sm:$0xf] %vm1683_vm0, %v2068_v3  ;;  %v841_v6 = vadd.f32 %v2709_v53, %v840_v4  ;;  %v1041_v7 = vadd.f32 %v2709_v53, %v1040_v5  ;;  %v842_v8 = vpop.f32.mrb[29].mxu0  ;;  %v1042_v9 = vpop.f32.mrb[29].mxu1 }
 0x14e   :  { %v843_v10 = vpop.f32.mrb[30].mxu0  ;;  %v1043_v11 = vpop.f32.mrb[30].mxu1 }
 0x14f   :  { %v1197_v12 = vmax.f32 %v841_v6, 0.0  ;;  %v1247_v13 = vmax.f32 %v1041_v7, 0.0  ;;  %v844_v14 = vadd.f32 %v2709_v53, %v843_v10  ;;  %v1044_v15 = vadd.f32 %v2709_v53, %v1043_v11  ;;  %v845_v16 = vpop.f32.mrb[31].mxu0  ;;  %v1045_v17 = vpop.f32.mrb[31].mxu1 }
 0x151   :  { %v2019_v18 = vpack.c.bf16 %v1197_v12, %v1197_v12  ;;  %v2069_v19 = vpack.c.bf16 %v1247_v13, %v1247_v13  ;;  %v1198_v20 = vmax.f32 %v844_v14, 0.0  ;;  %v1248_v21 = vmax.f32 %v1044_v15, 0.0 }
 0x153   :  { %1698 = vst.msk [vmem:[%s3219_s3 + $0x38] sm:$0xf] %vm1683_vm0, %v2019_v18  ;;  %1748 = vst.msk [vmem:[%s3219_s3 + $0x100] sm:$0xf] %vm1683_vm0, %v2069_v19  ;;  %v2020_v22 = vpack.c.bf16 %v1198_v20, %v1198_v20  ;;  %v2070_v23 = vpack.c.bf16 %v1248_v21, %v1248_v21 }
 0x154   :  { %v848_v24 = vpop.f32.mrb[32].mxu0  ;;  %v1048_v25 = vpop.f32.mrb[32].mxu1 }
 0x155   :  { %1699 = vst.msk [vmem:[%s3219_s3 + $0x3c] sm:$0xf] %vm1683_vm0, %v2020_v22  ;;  %1749 = vst.msk [vmem:[%s3219_s3 + $0x104] sm:$0xf] %vm1683_vm0, %v2070_v23  ;;  %v849_v26 = vadd.f32 %v2709_v53, %v848_v24  ;;  %v1049_v27 = vadd.f32 %v2709_v53, %v1048_v25  ;;  %v850_v28 = vpop.f32.mrb[33].mxu0  ;;  %v1050_v29 = vpop.f32.mrb[33].mxu1 }
 0x156   :  { %v851_v30 = vpop.f32.mrb[34].mxu0  ;;  %v1051_v31 = vpop.f32.mrb[34].mxu1 }
 0x157   :  { %v1199_v32 = vmax.f32 %v849_v26, 0.0  ;;  %v1249_v33 = vmax.f32 %v1049_v27, 0.0  ;;  %v852_v34 = vadd.f32 %v2709_v53, %v851_v30  ;;  %v1052_v35 = vadd.f32 %v2709_v53, %v1051_v31  ;;  %v853_v36 = vpop.f32.mrb[35].mxu0  ;;  %v1053_v37 = vpop.f32.mrb[35].mxu1 }
 0x159   :  { %v2021_v38 = vpack.c.bf16 %v1199_v32, %v1199_v32  ;;  %v2071_v39 = vpack.c.bf16 %v1249_v33, %v1249_v33  ;;  %v1200_v40 = vmax.f32 %v852_v34, 0.0  ;;  %v1250_v41 = vmax.f32 %v1052_v35, 0.0 }
 0x15b   :  { %1700 = vst.msk [vmem:[%s3219_s3 + $0x40] sm:$0xf] %vm1683_vm0, %v2021_v38  ;;  %1750 = vst.msk [vmem:[%s3219_s3 + $0x108] sm:$0xf] %vm1683_vm0, %v2071_v39  ;;  %v2022_v42 = vpack.c.bf16 %v1200_v40, %v1200_v40  ;;  %v2072_v43 = vpack.c.bf16 %v1250_v41, %v1250_v41 }
 0x15c   :  { %v856_v44 = vpop.f32.mrb[36].mxu0  ;;  %v1056_v45 = vpop.f32.mrb[36].mxu1 }
 0x15d   :  { %1701 = vst.msk [vmem:[%s3219_s3 + $0x44] sm:$0xf] %vm1683_vm0, %v2022_v42  ;;  %1751 = vst.msk [vmem:[%s3219_s3 + $0x10c] sm:$0xf] %vm1683_vm0, %v2072_v43  ;;  %v857_v46 = vadd.f32 %v2709_v53, %v856_v44  ;;  %v1057_v47 = vadd.f32 %v2709_v53, %v1056_v45  ;;  %v858_v48 = vpop.f32.mrb[37].mxu0  ;;  %v1058_v49 = vpop.f32.mrb[37].mxu1 }
 0x15e   :  { %v859_v50 = vpop.f32.mrb[38].mxu0  ;;  %v1059_v51 = vpop.f32.mrb[38].mxu1 }
 0x15f   :  { %v1201_v52 = vmax.f32 %v857_v46, 0.0  ;;  %v1251_v54 = vmax.f32 %v1057_v47, 0.0  ;;  %v860_v55 = vadd.f32 %v2709_v53, %v859_v50  ;;  %v1060_v56 = vadd.f32 %v2709_v53, %v1059_v51  ;;  %v861_v57 = vpop.f32.mrb[39].mxu0  ;;  %v1061_v58 = vpop.f32.mrb[39].mxu1 }
 0x161   :  { %v2023_v59 = vpack.c.bf16 %v1201_v52, %v1201_v52  ;;  %v2073_v60 = vpack.c.bf16 %v1251_v54, %v1251_v54  ;;  %v1202_v61 = vmax.f32 %v860_v55, 0.0  ;;  %v1252_v62 = vmax.f32 %v1060_v56, 0.0 }
 0x163   :  { %1702 = vst.msk [vmem:[%s3219_s3 + $0x48] sm:$0xf] %vm1683_vm0, %v2023_v59  ;;  %1752 = vst.msk [vmem:[%s3219_s3 + $0x110] sm:$0xf] %vm1683_vm0, %v2073_v60  ;;  %v2024_v63 = vpack.c.bf16 %v1202_v61, %v1202_v61  ;;  %v2074_v0 = vpack.c.bf16 %v1252_v62, %v1252_v62 }
 0x164   :  { %v864_v1 = vpop.f32.mrb[40].mxu0  ;;  %v1064_v2 = vpop.f32.mrb[40].mxu1 }
 0x165   :  { %1703 = vst.msk [vmem:[%s3219_s3 + $0x4c] sm:$0xf] %vm1683_vm0, %v2024_v63  ;;  %1753 = vst.msk [vmem:[%s3219_s3 + $0x114] sm:$0xf] %vm1683_vm0, %v2074_v0  ;;  %v865_v3 = vadd.f32 %v2709_v53, %v864_v1  ;;  %v1065_v4 = vadd.f32 %v2709_v53, %v1064_v2  ;;  %v866_v5 = vpop.f32.mrb[41].mxu0  ;;  %v1066_v6 = vpop.f32.mrb[41].mxu1 }
 0x166   :  { %v867_v7 = vpop.f32.mrb[42].mxu0  ;;  %v1067_v8 = vpop.f32.mrb[42].mxu1 }
 0x167   :  { %v1203_v9 = vmax.f32 %v865_v3, 0.0  ;;  %v1253_v10 = vmax.f32 %v1065_v4, 0.0  ;;  %v868_v11 = vadd.f32 %v2709_v53, %v867_v7  ;;  %v1068_v12 = vadd.f32 %v2709_v53, %v1067_v8  ;;  %v869_v13 = vpop.f32.mrb[43].mxu0  ;;  %v1069_v14 = vpop.f32.mrb[43].mxu1 }
 0x169   :  { %v2025_v15 = vpack.c.bf16 %v1203_v9, %v1203_v9  ;;  %v2075_v16 = vpack.c.bf16 %v1253_v10, %v1253_v10  ;;  %v1204_v17 = vmax.f32 %v868_v11, 0.0  ;;  %v1254_v18 = vmax.f32 %v1068_v12, 0.0 }
 0x16b   :  { %1704 = vst.msk [vmem:[%s3219_s3 + $0x50] sm:$0xf] %vm1683_vm0, %v2025_v15  ;;  %1754 = vst.msk [vmem:[%s3219_s3 + $0x118] sm:$0xf] %vm1683_vm0, %v2075_v16  ;;  %v2026_v19 = vpack.c.bf16 %v1204_v17, %v1204_v17  ;;  %v2076_v20 = vpack.c.bf16 %v1254_v18, %v1254_v18 }
 0x16c   :  { %v872_v21 = vpop.f32.mrb[44].mxu0  ;;  %v1072_v22 = vpop.f32.mrb[44].mxu1 }
 0x16d   :  { %1705 = vst.msk [vmem:[%s3219_s3 + $0x54] sm:$0xf] %vm1683_vm0, %v2026_v19  ;;  %1755 = vst.msk [vmem:[%s3219_s3 + $0x11c] sm:$0xf] %vm1683_vm0, %v2076_v20  ;;  %v873_v23 = vadd.f32 %v2709_v53, %v872_v21  ;;  %v1073_v24 = vadd.f32 %v2709_v53, %v1072_v22  ;;  %v874_v25 = vpop.f32.mrb[45].mxu0  ;;  %v1074_v26 = vpop.f32.mrb[45].mxu1 }
 0x16e   :  { %v875_v27 = vpop.f32.mrb[46].mxu0  ;;  %v1075_v28 = vpop.f32.mrb[46].mxu1 }
 0x16f   :  { %v1205_v29 = vmax.f32 %v873_v23, 0.0  ;;  %v1255_v30 = vmax.f32 %v1073_v24, 0.0  ;;  %v876_v31 = vadd.f32 %v2709_v53, %v875_v27  ;;  %v1076_v32 = vadd.f32 %v2709_v53, %v1075_v28  ;;  %v877_v33 = vpop.f32.mrb[47].mxu0  ;;  %v1077_v34 = vpop.f32.mrb[47].mxu1 }
 0x171   :  { %v2027_v35 = vpack.c.bf16 %v1205_v29, %v1205_v29  ;;  %v2077_v36 = vpack.c.bf16 %v1255_v30, %v1255_v30  ;;  %v1206_v37 = vmax.f32 %v876_v31, 0.0  ;;  %v1256_v38 = vmax.f32 %v1076_v32, 0.0 }
 0x173   :  { %1706 = vst.msk [vmem:[%s3219_s3 + $0x58] sm:$0xf] %vm1683_vm0, %v2027_v35  ;;  %1756 = vst.msk [vmem:[%s3219_s3 + $0x120] sm:$0xf] %vm1683_vm0, %v2077_v36  ;;  %v2028_v39 = vpack.c.bf16 %v1206_v37, %v1206_v37  ;;  %v2078_v40 = vpack.c.bf16 %v1256_v38, %v1256_v38 }
 0x174   :  { %v880_v41 = vpop.f32.mrb[48].mxu0  ;;  %v1080_v42 = vpop.f32.mrb[48].mxu1 }
 0x175   :  { %1707 = vst.msk [vmem:[%s3219_s3 + $0x5c] sm:$0xf] %vm1683_vm0, %v2028_v39  ;;  %1757 = vst.msk [vmem:[%s3219_s3 + $0x124] sm:$0xf] %vm1683_vm0, %v2078_v40  ;;  %v881_v43 = vadd.f32 %v2709_v53, %v880_v41  ;;  %v1081_v44 = vadd.f32 %v2709_v53, %v1080_v42  ;;  %v882_v45 = vpop.f32.mrb[49].mxu0  ;;  %v1082_v46 = vpop.f32.mrb[49].mxu1 }
 0x176   :  { %v883_v47 = vpop.f32.mrb[50].mxu0  ;;  %v1083_v48 = vpop.f32.mrb[50].mxu1 }
 0x177   :  { %v1207_v49 = vmax.f32 %v881_v43, 0.0  ;;  %v1257_v50 = vmax.f32 %v1081_v44, 0.0  ;;  %v884_v51 = vadd.f32 %v2709_v53, %v883_v47  ;;  %v1084_v52 = vadd.f32 %v2709_v53, %v1083_v48  ;;  %v885_v54 = vpop.f32.mrb[51].mxu0  ;;  %v1085_v55 = vpop.f32.mrb[51].mxu1 }
 0x179   :  { %v2029_v56 = vpack.c.bf16 %v1207_v49, %v1207_v49  ;;  %v2079_v57 = vpack.c.bf16 %v1257_v50, %v1257_v50  ;;  %v1208_v58 = vmax.f32 %v884_v51, 0.0  ;;  %v1258_v59 = vmax.f32 %v1084_v52, 0.0 }
 0x17b   :  { %1708 = vst.msk [vmem:[%s3219_s3 + $0x60] sm:$0xf] %vm1683_vm0, %v2029_v56  ;;  %1758 = vst.msk [vmem:[%s3219_s3 + $0x128] sm:$0xf] %vm1683_vm0, %v2079_v57  ;;  %v2030_v60 = vpack.c.bf16 %v1208_v58, %v1208_v58  ;;  %v2080_v61 = vpack.c.bf16 %v1258_v59, %v1258_v59 }
 0x17c   :  { %v888_v62 = vpop.f32.mrb[52].mxu0  ;;  %v1088_v63 = vpop.f32.mrb[52].mxu1 }
 0x17d   :  { %1709 = vst.msk [vmem:[%s3219_s3 + $0x64] sm:$0xf] %vm1683_vm0, %v2030_v60  ;;  %1759 = vst.msk [vmem:[%s3219_s3 + $0x12c] sm:$0xf] %vm1683_vm0, %v2080_v61  ;;  %v889_v0 = vadd.f32 %v2709_v53, %v888_v62  ;;  %v1089_v1 = vadd.f32 %v2709_v53, %v1088_v63  ;;  %v890_v2 = vpop.f32.mrb[53].mxu0  ;;  %v1090_v3 = vpop.f32.mrb[53].mxu1 }
 0x17e   :  { %v891_v4 = vpop.f32.mrb[54].mxu0  ;;  %v1091_v5 = vpop.f32.mrb[54].mxu1 }
 0x17f   :  { %v1209_v6 = vmax.f32 %v889_v0, 0.0  ;;  %v1259_v7 = vmax.f32 %v1089_v1, 0.0  ;;  %v892_v8 = vadd.f32 %v2709_v53, %v891_v4  ;;  %v1092_v9 = vadd.f32 %v2709_v53, %v1091_v5  ;;  %v893_v10 = vpop.f32.mrb[55].mxu0  ;;  %v1093_v11 = vpop.f32.mrb[55].mxu1 }
 0x181   :  { %v2031_v12 = vpack.c.bf16 %v1209_v6, %v1209_v6  ;;  %v2081_v13 = vpack.c.bf16 %v1259_v7, %v1259_v7  ;;  %v1210_v14 = vmax.f32 %v892_v8, 0.0  ;;  %v1260_v15 = vmax.f32 %v1092_v9, 0.0 }
 0x183   :  { %1710 = vst.msk [vmem:[%s3219_s3 + $0x68] sm:$0xf] %vm1683_vm0, %v2031_v12  ;;  %1760 = vst.msk [vmem:[%s3219_s3 + $0x130] sm:$0xf] %vm1683_vm0, %v2081_v13  ;;  %v2032_v16 = vpack.c.bf16 %v1210_v14, %v1210_v14  ;;  %v2082_v17 = vpack.c.bf16 %v1260_v15, %v1260_v15 }
 0x184   :  { %v896_v18 = vpop.f32.mrb[56].mxu0  ;;  %v1096_v19 = vpop.f32.mrb[56].mxu1 }
 0x185   :  { %1711 = vst.msk [vmem:[%s3219_s3 + $0x6c] sm:$0xf] %vm1683_vm0, %v2032_v16  ;;  %1761 = vst.msk [vmem:[%s3219_s3 + $0x134] sm:$0xf] %vm1683_vm0, %v2082_v17  ;;  %v897_v20 = vadd.f32 %v2709_v53, %v896_v18  ;;  %v1097_v21 = vadd.f32 %v2709_v53, %v1096_v19  ;;  %v898_v22 = vpop.f32.mrb[57].mxu0  ;;  %v1098_v23 = vpop.f32.mrb[57].mxu1 }
 0x186   :  { %v899_v24 = vpop.f32.mrb[58].mxu0  ;;  %v1099_v25 = vpop.f32.mrb[58].mxu1 }
 0x187   :  { %v1211_v26 = vmax.f32 %v897_v20, 0.0  ;;  %v1261_v27 = vmax.f32 %v1097_v21, 0.0  ;;  %v900_v28 = vadd.f32 %v2709_v53, %v899_v24  ;;  %v1100_v29 = vadd.f32 %v2709_v53, %v1099_v25  ;;  %v901_v30 = vpop.f32.mrb[59].mxu0  ;;  %v1101_v31 = vpop.f32.mrb[59].mxu1 }
 0x189   :  { %v2033_v32 = vpack.c.bf16 %v1211_v26, %v1211_v26  ;;  %v2083_v33 = vpack.c.bf16 %v1261_v27, %v1261_v27  ;;  %v1212_v34 = vmax.f32 %v900_v28, 0.0  ;;  %v1262_v35 = vmax.f32 %v1100_v29, 0.0 }
 0x18b   :  { %1712 = vst.msk [vmem:[%s3219_s3 + $0x70] sm:$0xf] %vm1683_vm0, %v2033_v32  ;;  %1762 = vst.msk [vmem:[%s3219_s3 + $0x138] sm:$0xf] %vm1683_vm0, %v2083_v33  ;;  %v2034_v36 = vpack.c.bf16 %v1212_v34, %v1212_v34  ;;  %v2084_v37 = vpack.c.bf16 %v1262_v35, %v1262_v35 }
 0x18c   :  { %v904_v38 = vpop.f32.mrb[60].mxu0  ;;  %v1104_v39 = vpop.f32.mrb[60].mxu1 }
 0x18d   :  { %1713 = vst.msk [vmem:[%s3219_s3 + $0x74] sm:$0xf] %vm1683_vm0, %v2034_v36  ;;  %1763 = vst.msk [vmem:[%s3219_s3 + $0x13c] sm:$0xf] %vm1683_vm0, %v2084_v37  ;;  %v905_v40 = vadd.f32 %v2709_v53, %v904_v38  ;;  %v1105_v41 = vadd.f32 %v2709_v53, %v1104_v39  ;;  %v906_v42 = vpop.f32.mrb[61].mxu0  ;;  %v1106_v43 = vpop.f32.mrb[61].mxu1 }
 0x18e   :  { %v907_v44 = vpop.f32.mrb[62].mxu0  ;;  %v1107_v45 = vpop.f32.mrb[62].mxu1 }
 0x18f   :  { %v1213_v46 = vmax.f32 %v905_v40, 0.0  ;;  %v1263_v47 = vmax.f32 %v1105_v41, 0.0  ;;  %v908_v48 = vadd.f32 %v2709_v53, %v907_v44  ;;  %v1108_v49 = vadd.f32 %v2709_v53, %v1107_v45  ;;  %v909_v50 = vpop.f32.mrb[63].mxu0  ;;  %v1109_v51 = vpop.f32.mrb[63].mxu1 }
 0x191   :  { %v2035_v52 = vpack.c.bf16 %v1213_v46, %v1213_v46  ;;  %v2085_v54 = vpack.c.bf16 %v1263_v47, %v1263_v47  ;;  %v1214_v55 = vmax.f32 %v908_v48, 0.0  ;;  %v1264_v56 = vmax.f32 %v1108_v49, 0.0 }
 0x193   :  { %1714 = vst.msk [vmem:[%s3219_s3 + $0x78] sm:$0xf] %vm1683_vm0, %v2035_v52  ;;  %1764 = vst.msk [vmem:[%s3219_s3 + $0x140] sm:$0xf] %vm1683_vm0, %v2085_v54  ;;  %v2036_v57 = vpack.c.bf16 %v1214_v55, %v1214_v55  ;;  %v2086_v58 = vpack.c.bf16 %v1264_v56, %v1264_v56 }
 0x194   :  { %v912_v59 = vpop.f32.mrb[64].mxu0  ;;  %v1112_v60 = vpop.f32.mrb[64].mxu1 }
 0x195   :  { %1715 = vst.msk [vmem:[%s3219_s3 + $0x7c] sm:$0xf] %vm1683_vm0, %v2036_v57  ;;  %1765 = vst.msk [vmem:[%s3219_s3 + $0x144] sm:$0xf] %vm1683_vm0, %v2086_v58  ;;  %v913_v61 = vadd.f32 %v2709_v53, %v912_v59  ;;  %v1113_v62 = vadd.f32 %v2709_v53, %v1112_v60  ;;  %v914_v63 = vpop.f32.mrb[65].mxu0  ;;  %v1114_v0 = vpop.f32.mrb[65].mxu1 }
 0x196   :  { %v915_v1 = vpop.f32.mrb[66].mxu0  ;;  %v1115_v2 = vpop.f32.mrb[66].mxu1 }
 0x197   :  { %v1215_v3 = vmax.f32 %v913_v61, 0.0  ;;  %v1265_v4 = vmax.f32 %v1113_v62, 0.0  ;;  %v916_v5 = vadd.f32 %v2709_v53, %v915_v1  ;;  %v1116_v6 = vadd.f32 %v2709_v53, %v1115_v2  ;;  %v917_v7 = vpop.f32.mrb[67].mxu0  ;;  %v1117_v8 = vpop.f32.mrb[67].mxu1 }
 0x199   :  { %v2037_v9 = vpack.c.bf16 %v1215_v3, %v1215_v3  ;;  %v2087_v10 = vpack.c.bf16 %v1265_v4, %v1265_v4  ;;  %v1216_v11 = vmax.f32 %v916_v5, 0.0  ;;  %v1266_v12 = vmax.f32 %v1116_v6, 0.0 }
 0x19b   :  { %1716 = vst.msk [vmem:[%s3219_s3 + $0x80] sm:$0xf] %vm1683_vm0, %v2037_v9  ;;  %1766 = vst.msk [vmem:[%s3219_s3 + $0x148] sm:$0xf] %vm1683_vm0, %v2087_v10  ;;  %v2038_v13 = vpack.c.bf16 %v1216_v11, %v1216_v11  ;;  %v2088_v14 = vpack.c.bf16 %v1266_v12, %v1266_v12 }
 0x19c   :  { %v920_v15 = vpop.f32.mrb[68].mxu0  ;;  %v1120_v16 = vpop.f32.mrb[68].mxu1 }
 0x19d   :  { %1717 = vst.msk [vmem:[%s3219_s3 + $0x84] sm:$0xf] %vm1683_vm0, %v2038_v13  ;;  %1767 = vst.msk [vmem:[%s3219_s3 + $0x14c] sm:$0xf] %vm1683_vm0, %v2088_v14  ;;  %v921_v17 = vadd.f32 %v2709_v53, %v920_v15  ;;  %v1121_v18 = vadd.f32 %v2709_v53, %v1120_v16  ;;  %v922_v19 = vpop.f32.mrb[69].mxu0  ;;  %v1122_v20 = vpop.f32.mrb[69].mxu1 }
 0x19e   :  { %v923_v21 = vpop.f32.mrb[70].mxu0  ;;  %v1123_v22 = vpop.f32.mrb[70].mxu1 }
 0x19f   :  { %v1217_v23 = vmax.f32 %v921_v17, 0.0  ;;  %v1267_v24 = vmax.f32 %v1121_v18, 0.0  ;;  %v924_v25 = vadd.f32 %v2709_v53, %v923_v21  ;;  %v1124_v26 = vadd.f32 %v2709_v53, %v1123_v22  ;;  %v925_v27 = vpop.f32.mrb[71].mxu0  ;;  %v1125_v28 = vpop.f32.mrb[71].mxu1 }
 0x1a1   :  { %v2039_v29 = vpack.c.bf16 %v1217_v23, %v1217_v23  ;;  %v2089_v30 = vpack.c.bf16 %v1267_v24, %v1267_v24  ;;  %v1218_v31 = vmax.f32 %v924_v25, 0.0  ;;  %v1268_v32 = vmax.f32 %v1124_v26, 0.0 }
 0x1a3   :  { %1718 = vst.msk [vmem:[%s3219_s3 + $0x88] sm:$0xf] %vm1683_vm0, %v2039_v29  ;;  %1768 = vst.msk [vmem:[%s3219_s3 + $0x150] sm:$0xf] %vm1683_vm0, %v2089_v30  ;;  %v2040_v33 = vpack.c.bf16 %v1218_v31, %v1218_v31  ;;  %v2090_v34 = vpack.c.bf16 %v1268_v32, %v1268_v32 }
 0x1a4   :  { %v928_v35 = vpop.f32.mrb[72].mxu0  ;;  %v1128_v36 = vpop.f32.mrb[72].mxu1 }
 0x1a5   :  { %1719 = vst.msk [vmem:[%s3219_s3 + $0x8c] sm:$0xf] %vm1683_vm0, %v2040_v33  ;;  %1769 = vst.msk [vmem:[%s3219_s3 + $0x154] sm:$0xf] %vm1683_vm0, %v2090_v34  ;;  %v929_v37 = vadd.f32 %v2709_v53, %v928_v35  ;;  %v1129_v38 = vadd.f32 %v2709_v53, %v1128_v36  ;;  %v930_v39 = vpop.f32.mrb[73].mxu0  ;;  %v1130_v40 = vpop.f32.mrb[73].mxu1 }
 0x1a6   :  { %v931_v41 = vpop.f32.mrb[74].mxu0  ;;  %v1131_v42 = vpop.f32.mrb[74].mxu1 }
 0x1a7   :  { %v1219_v43 = vmax.f32 %v929_v37, 0.0  ;;  %v1269_v44 = vmax.f32 %v1129_v38, 0.0  ;;  %v932_v45 = vadd.f32 %v2709_v53, %v931_v41  ;;  %v1132_v46 = vadd.f32 %v2709_v53, %v1131_v42  ;;  %v933_v47 = vpop.f32.mrb[75].mxu0  ;;  %v1133_v48 = vpop.f32.mrb[75].mxu1  ;;  %v3136_v42 = vld [vmem:[%s3218_s2] ss:$0 sm:$0xff] }
 0x1a9   :  { %v2041_v49 = vpack.c.bf16 %v1219_v43, %v1219_v43  ;;  %v2091_v50 = vpack.c.bf16 %v1269_v44, %v1269_v44  ;;  %v1220_v51 = vmax.f32 %v932_v45, 0.0  ;;  %v1270_v52 = vmax.f32 %v1132_v46, 0.0 }
 0x1ab   :  { %1720 = vst.msk [vmem:[%s3219_s3 + $0x90] sm:$0xf] %vm1683_vm0, %v2041_v49  ;;  %1770 = vst.msk [vmem:[%s3219_s3 + $0x158] sm:$0xf] %vm1683_vm0, %v2091_v50  ;;  %v2042_v54 = vpack.c.bf16 %v1220_v51, %v1220_v51  ;;  %v2092_v55 = vpack.c.bf16 %v1270_v52, %v1270_v52 }
 0x1ac   :  { %v936_v56 = vpop.f32.mrb[76].mxu0  ;;  %v1136_v57 = vpop.f32.mrb[76].mxu1 }
 0x1ad   :  { %1721 = vst.msk [vmem:[%s3219_s3 + $0x94] sm:$0xf] %vm1683_vm0, %v2042_v54  ;;  %1771 = vst.msk [vmem:[%s3219_s3 + $0x15c] sm:$0xf] %vm1683_vm0, %v2092_v55  ;;  %v937_v58 = vadd.f32 %v2709_v53, %v936_v56  ;;  %v1137_v59 = vadd.f32 %v2709_v53, %v1136_v57  ;;  %v938_v60 = vpop.f32.mrb[77].mxu0  ;;  %v1138_v61 = vpop.f32.mrb[77].mxu1 }
 0x1ae   :  { %v939_v62 = vpop.f32.mrb[78].mxu0  ;;  %v1139_v63 = vpop.f32.mrb[78].mxu1 }
 0x1af   :  { %v1221_v0 = vmax.f32 %v937_v58, 0.0  ;;  %v1271_v1 = vmax.f32 %v1137_v59, 0.0  ;;  %v940_v2 = vadd.f32 %v2709_v53, %v939_v62  ;;  %v1140_v3 = vadd.f32 %v2709_v53, %v1139_v63  ;;  %v941_v4 = vpop.f32.mrb[79].mxu0  ;;  %v1141_v5 = vpop.f32.mrb[79].mxu1 }
 0x1b1   :  { %v2043_v6 = vpack.c.bf16 %v1221_v0, %v1221_v0  ;;  %v2093_v7 = vpack.c.bf16 %v1271_v1, %v1271_v1  ;;  %v1222_v8 = vmax.f32 %v940_v2, 0.0  ;;  %v1272_v9 = vmax.f32 %v1140_v3, 0.0 }
 0x1b3   :  { %1722 = vst.msk [vmem:[%s3219_s3 + $0x98] sm:$0xf] %vm1683_vm0, %v2043_v6  ;;  %1772 = vst.msk [vmem:[%s3219_s3 + $0x160] sm:$0xf] %vm1683_vm0, %v2093_v7  ;;  %v2044_v10 = vpack.c.bf16 %v1222_v8, %v1222_v8  ;;  %v2094_v11 = vpack.c.bf16 %v1272_v9, %v1272_v9 }
 0x1b4   :  { %v944_v12 = vpop.f32.mrb[80].mxu0  ;;  %v1144_v13 = vpop.f32.mrb[80].mxu1 }
 0x1b5   :  { %1723 = vst.msk [vmem:[%s3219_s3 + $0x9c] sm:$0xf] %vm1683_vm0, %v2044_v10  ;;  %1773 = vst.msk [vmem:[%s3219_s3 + $0x164] sm:$0xf] %vm1683_vm0, %v2094_v11  ;;  %v945_v14 = vadd.f32 %v2709_v53, %v944_v12  ;;  %v1145_v15 = vadd.f32 %v2709_v53, %v1144_v13  ;;  %v946_v16 = vpop.f32.mrb[81].mxu0  ;;  %v1146_v17 = vpop.f32.mrb[81].mxu1 }
 0x1b6   :  { %v947_v18 = vpop.f32.mrb[82].mxu0  ;;  %v1147_v19 = vpop.f32.mrb[82].mxu1 }
 0x1b7   :  { %v1223_v20 = vmax.f32 %v945_v14, 0.0  ;;  %v1273_v21 = vmax.f32 %v1145_v15, 0.0  ;;  %v948_v22 = vadd.f32 %v2709_v53, %v947_v18  ;;  %v1148_v23 = vadd.f32 %v2709_v53, %v1147_v19  ;;  %v949_v24 = vpop.f32.mrb[83].mxu0  ;;  %v1149_v25 = vpop.f32.mrb[83].mxu1 }
 0x1b9   :  { %v2045_v26 = vpack.c.bf16 %v1223_v20, %v1223_v20  ;;  %v2095_v27 = vpack.c.bf16 %v1273_v21, %v1273_v21  ;;  %v1224_v28 = vmax.f32 %v948_v22, 0.0  ;;  %v1274_v29 = vmax.f32 %v1148_v23, 0.0 }
 0x1bb   :  { %1724 = vst.msk [vmem:[%s3219_s3 + $0xa0] sm:$0xf] %vm1683_vm0, %v2045_v26  ;;  %1774 = vst.msk [vmem:[%s3219_s3 + $0x168] sm:$0xf] %vm1683_vm0, %v2095_v27  ;;  %v2046_v30 = vpack.c.bf16 %v1224_v28, %v1224_v28  ;;  %v2096_v31 = vpack.c.bf16 %v1274_v29, %v1274_v29 }
 0x1bc   :  { %v952_v32 = vpop.f32.mrb[84].mxu0  ;;  %v1152_v33 = vpop.f32.mrb[84].mxu1 }
 0x1bd   :  { %1725 = vst.msk [vmem:[%s3219_s3 + $0xa4] sm:$0xf] %vm1683_vm0, %v2046_v30  ;;  %1775 = vst.msk [vmem:[%s3219_s3 + $0x16c] sm:$0xf] %vm1683_vm0, %v2096_v31  ;;  %v953_v34 = vadd.f32 %v2709_v53, %v952_v32  ;;  %v1153_v35 = vadd.f32 %v2709_v53, %v1152_v33  ;;  %v954_v36 = vpop.f32.mrb[85].mxu0  ;;  %v1154_v37 = vpop.f32.mrb[85].mxu1 }
 0x1be   :  { %v955_v38 = vpop.f32.mrb[86].mxu0  ;;  %v1155_v39 = vpop.f32.mrb[86].mxu1 }
 0x1bf   :  { %v1225_v40 = vmax.f32 %v953_v34, 0.0  ;;  %v1275_v41 = vmax.f32 %v1153_v35, 0.0  ;;  %v956_v43 = vadd.f32 %v3136_v42, %v955_v38  ;;  %v1156_v44 = vadd.f32 %v3136_v42, %v1155_v39  ;;  %v957_v45 = vpop.f32.mrb[87].mxu0  ;;  %v1157_v46 = vpop.f32.mrb[87].mxu1 }
 0x1c1   :  { %v2047_v47 = vpack.c.bf16 %v1225_v40, %v1225_v40  ;;  %v2097_v48 = vpack.c.bf16 %v1275_v41, %v1275_v41  ;;  %v1226_v53 = vmax.f32 %v956_v43, 0.0  ;;  %v1276_v49 = vmax.f32 %v1156_v44, 0.0 }
 0x1c3   :  { %1726 = vst.msk [vmem:[%s3219_s3 + $0xa8] sm:$0xf] %vm1683_vm0, %v2047_v47  ;;  %1776 = vst.msk [vmem:[%s3219_s3 + $0x170] sm:$0xf] %vm1683_vm0, %v2097_v48  ;;  %v2048_v50 = vpack.c.bf16 %v1226_v53, %v1226_v53  ;;  %v2098_v51 = vpack.c.bf16 %v1276_v49, %v1276_v49 }
 0x1c4   :  { %v960_v52 = vpop.f32.mrb[88].mxu0  ;;  %v1160_v54 = vpop.f32.mrb[88].mxu1 }
 0x1c5   :  { %1727 = vst.msk [vmem:[%s3219_s3 + $0xac] sm:$0xf] %vm1683_vm0, %v2048_v50  ;;  %1777 = vst.msk [vmem:[%s3219_s3 + $0x174] sm:$0xf] %vm1683_vm0, %v2098_v51  ;;  %v961_v55 = vadd.f32 %v3136_v42, %v960_v52  ;;  %v1161_v56 = vadd.f32 %v3136_v42, %v1160_v54  ;;  %v962_v57 = vpop.f32.mrb[89].mxu0  ;;  %v1162_v58 = vpop.f32.mrb[89].mxu1 }
 0x1c6   :  { %v963_v59 = vpop.f32.mrb[90].mxu0  ;;  %v1163_v60 = vpop.f32.mrb[90].mxu1 }
 0x1c7   :  { %v1227_v61 = vmax.f32 %v961_v55, 0.0  ;;  %v1277_v62 = vmax.f32 %v1161_v56, 0.0  ;;  %v964_v63 = vadd.f32 %v3136_v42, %v963_v59  ;;  %v1164_v0 = vadd.f32 %v3136_v42, %v1163_v60  ;;  %v965_v1 = vpop.f32.mrb[91].mxu0  ;;  %v1165_v2 = vpop.f32.mrb[91].mxu1 }
 0x1c9   :  { %v2049_v3 = vpack.c.bf16 %v1227_v61, %v1227_v61  ;;  %v2099_v4 = vpack.c.bf16 %v1277_v62, %v1277_v62  ;;  %v1228_v5 = vmax.f32 %v964_v63, 0.0  ;;  %v1278_v6 = vmax.f32 %v1164_v0, 0.0 }
 0x1cb   :  { %1728 = vst.msk [vmem:[%s3219_s3 + $0xb0] sm:$0xf] %vm1683_vm0, %v2049_v3  ;;  %1778 = vst.msk [vmem:[%s3219_s3 + $0x178] sm:$0xf] %vm1683_vm0, %v2099_v4  ;;  %v2050_v7 = vpack.c.bf16 %v1228_v5, %v1228_v5  ;;  %v2100_v8 = vpack.c.bf16 %v1278_v6, %v1278_v6 }
 0x1cc   :  { %v968_v9 = vpop.f32.mrb[92].mxu0  ;;  %v1168_v10 = vpop.f32.mrb[92].mxu1 }
 0x1cd   :  { %1729 = vst.msk [vmem:[%s3219_s3 + $0xb4] sm:$0xf] %vm1683_vm0, %v2050_v7  ;;  %1779 = vst.msk [vmem:[%s3219_s3 + $0x17c] sm:$0xf] %vm1683_vm0, %v2100_v8  ;;  %v969_v11 = vadd.f32 %v3136_v42, %v968_v9  ;;  %v1169_v12 = vadd.f32 %v3136_v42, %v1168_v10  ;;  %v970_v13 = vpop.f32.mrb[93].mxu0  ;;  %v1170_v14 = vpop.f32.mrb[93].mxu1 }
 0x1ce   :  { %v971_v15 = vpop.f32.mrb[94].mxu0  ;;  %v1171_v16 = vpop.f32.mrb[94].mxu1 }
 0x1cf   :  { %v1229_v17 = vmax.f32 %v969_v11, 0.0  ;;  %v1279_v18 = vmax.f32 %v1169_v12, 0.0  ;;  %v972_v19 = vadd.f32 %v3136_v42, %v971_v15  ;;  %v1172_v20 = vadd.f32 %v3136_v42, %v1171_v16  ;;  %v973_v21 = vpop.f32.mrb[95].mxu0  ;;  %v1173_v22 = vpop.f32.mrb[95].mxu1 }
 0x1d1   :  { %v2051_v23 = vpack.c.bf16 %v1229_v17, %v1229_v17  ;;  %v2101_v24 = vpack.c.bf16 %v1279_v18, %v1279_v18  ;;  %v1230_v25 = vmax.f32 %v972_v19, 0.0  ;;  %v1280_v26 = vmax.f32 %v1172_v20, 0.0 }
 0x1d3   :  { %1730 = vst.msk [vmem:[%s3219_s3 + $0xb8] sm:$0xf] %vm1683_vm0, %v2051_v23  ;;  %1780 = vst.msk [vmem:[%s3219_s3 + $0x180] sm:$0xf] %vm1683_vm0, %v2101_v24  ;;  %v2052_v27 = vpack.c.bf16 %v1230_v25, %v1230_v25  ;;  %v2102_v28 = vpack.c.bf16 %v1280_v26, %v1280_v26 }
 0x1d4   :  { %v976_v29 = vpop.f32.mrb[96].mxu0  ;;  %v1176_v30 = vpop.f32.mrb[96].mxu1 }
 0x1d5   :  { %1731 = vst.msk [vmem:[%s3219_s3 + $0xbc] sm:$0xf] %vm1683_vm0, %v2052_v27  ;;  %1781 = vst.msk [vmem:[%s3219_s3 + $0x184] sm:$0xf] %vm1683_vm0, %v2102_v28  ;;  %v977_v31 = vadd.f32 %v3136_v42, %v976_v29  ;;  %v1177_v32 = vadd.f32 %v3136_v42, %v1176_v30  ;;  %v978_v33 = vpop.f32.mrb[97].mxu0  ;;  %v1178_v34 = vpop.f32.mrb[97].mxu1 }
 0x1d6   :  { %v979_v35 = vpop.f32.mrb[98].mxu0  ;;  %v1179_v36 = vpop.f32.mrb[98].mxu1 }
 0x1d7   :  { %v1231_v37 = vmax.f32 %v977_v31, 0.0  ;;  %v1281_v38 = vmax.f32 %v1177_v32, 0.0  ;;  %v980_v39 = vadd.f32 %v3136_v42, %v979_v35  ;;  %v1180_v40 = vadd.f32 %v3136_v42, %v1179_v36  ;;  %v981_v41 = vpop.f32.mrb[99].mxu0  ;;  %v1181_v43 = vpop.f32.mrb[99].mxu1 }
 0x1d9   :  { %v2053_v44 = vpack.c.bf16 %v1231_v37, %v1231_v37  ;;  %v2103_v45 = vpack.c.bf16 %v1281_v38, %v1281_v38  ;;  %v1232_v46 = vmax.f32 %v980_v39, 0.0  ;;  %v1282_v47 = vmax.f32 %v1180_v40, 0.0 }
 0x1db   :  { %1732 = vst.msk [vmem:[%s3219_s3 + $0xc0] sm:$0xf] %vm1683_vm0, %v2053_v44  ;;  %1782 = vst.msk [vmem:[%s3219_s3 + $0x188] sm:$0xf] %vm1683_vm0, %v2103_v45  ;;  %v2054_v48 = vpack.c.bf16 %v1232_v46, %v1232_v46  ;;  %v2104_v53 = vpack.c.bf16 %v1282_v47, %v1282_v47 }
 0x1dd   :  { %1733 = vst.msk [vmem:[%s3219_s3 + $0xc4] sm:$0xf] %vm1683_vm0, %v2054_v48  ;;  %1783 = vst.msk [vmem:[%s3219_s3 + $0x18c] sm:$0xf] %vm1683_vm0, %v2104_v53 }

// kernel: dueling_dqn_forward.4
= control target key start
LH: loop header
LB: loop body
LE: loop exit
PB: predicated region body
PF: predicated region fallthrough
CT: control target
= control target key end

     0   :  { %vm504_vm0 = vcmask 257024   ;;  %vm525_vm1 = vcmask 253952   ;;  %s998_s1 = inlined_call_operand.vmem [shape: bf16[256,32], index: 1, kind: input, shape index: {}]   ;;  %s999_s0 = inlined_call_operand.vmem [shape: bf16[162,256], index: 0, kind: input, shape index: {}]   ;;  %s1000_s2 = inlined_call_operand.vmem [shape: f32[1,32], index: 2, kind: input, shape index: {}]   ;;  %s1001_s3 = inlined_call_operand.vmem [shape: bf16[162,32], index: 3, kind: output, shape index: {}]  }
   0x1   :  { %v710_v0 = vld [vmem:[%s998_s1 + $0x40] sm:$0xff]   ;;  %v712_v2 = vld [vmem:[%s998_s1 + $0x48] sm:$0xff]   ;;  %v714_v4 = vld [vmem:[%s998_s1 + $0x50] sm:$0xff]  }
   0x2   :  { %v711_v1 = vld [vmem:[%s998_s1] sm:$0xff]   ;;  %612 = vmatprep.subr.bf16.mxu0 %v710_v0  ;;  %694 = vmatprep.subr.bf16.mxu1 %v710_v0  ;;  %v713_v3 = vld [vmem:[%s998_s1 + $0x8] sm:$0xff]   ;;  %v715_v5 = vld [vmem:[%s998_s1 + $0x10] sm:$0xff]  }
   0x3   :  { %613 = vmatpush3.bf16.msra.mxu0 %v711_v1  ;;  %702 = vmatpush3.bf16.msra.mxu1 %v711_v1  ;;  %v716_v6 = vld [vmem:[%s998_s1 + $0x58] sm:$0xff]   ;;  %v718_v8 = vld [vmem:[%s998_s1 + $0x60] sm:$0xff]   ;;  %v720_v10 = vld [vmem:[%s998_s1 + $0x68] sm:$0xff]  }
   0x4   :  { %614 = vmatprep.subr.bf16.mxu0 %v712_v2  ;;  %695 = vmatprep.subr.bf16.mxu1 %v712_v2  ;;  %v717_v7 = vld [vmem:[%s998_s1 + $0x18] sm:$0xff]   ;;  %v719_v9 = vld [vmem:[%s998_s1 + $0x20] sm:$0xff]   ;;  %v721_v13 = vld [vmem:[%s998_s1 + $0x28] sm:$0xff]  }
   0x5   :  { %v728_v11 = vld [vmem:[%s999_s0 + $0x4] ss:$8 sps:$4 sm:$0xff]   ;;  %v722_v14 = vld [vmem:[%s998_s1 + $0x70] sm:$0xff]   ;;  %v724_v16 = vld [vmem:[%s998_s1 + $0x78] sm:$0xff]  }
   0x6   :  { %v731_v12 = vld [vmem:[%s999_s0 + $0x64] ss:$8 sps:$4 sm:$0xff]   ;;  %310 = vmatprep.mubr.bf16.mxu0 %v728_v11  ;;  %v723_v15 = vld [vmem:[%s998_s1 + $0x30] sm:$0xff]   ;;  %v725_v17 = vld [vmem:[%s998_s1 + $0x38] sm:$0xff]  }
   0x7   :  { %615 = vmatpush3.bf16.msra.mxu0 %v713_v3  ;;  %703 = vmatpush3.bf16.msra.mxu1 %v713_v3  ;;  %v726_v18 = vld [vmem:[%s999_s0] ss:$8 sps:$4 sm:$0xff]   ;;  %v732_v20 = vld [vmem:[%s999_s0 + $0x14] ss:$8 sps:$4 sm:$0xff]   ;;  %v734_v22 = vld [vmem:[%s999_s0 + $0x10] ss:$8 sps:$4 sm:$0xff]  }
   0x8   :  { %616 = vmatprep.subr.bf16.mxu0 %v714_v4  ;;  %696 = vmatprep.subr.bf16.mxu1 %v714_v4  ;;  %v729_v19 = vld [vmem:[%s999_s0 + $0x60] ss:$8 sps:$4 sm:$0xff]   ;;  %v735_v21 = vld [vmem:[%s999_s0 + $0x74] ss:$8 sps:$4 sm:$0xff]   ;;  %v739_v23 = vld [vmem:[%s999_s0 + $0x70] ss:$8 sps:$4 sm:$0xff]  }
   0x9   :  { %358 = vmatprep.mubr.bf16.mxu1 %v731_v12  ;;  %v737_v24 = vld [vmem:[%s999_s0 + $0x24] ss:$8 sps:$4 sm:$0xff]   ;;  %v740_v26 = vld [vmem:[%s999_s0 + $0x20] ss:$8 sps:$4 sm:$0xff]   ;;  %v743_v28 = vld [vmem:[%s999_s0 + $0x34] ss:$8 sps:$4 sm:$0xff]  }
   0xa   :  { %v741_v25 = vld [vmem:[%s999_s0 + $0x84] ss:$8 sps:$4 sm:$0xff]   ;;  %v745_v27 = vld [vmem:[%s999_s0 + $0x80] ss:$8 sps:$4 sm:$0xff]   ;;  %v747_v29 = vld [vmem:[%s999_s0 + $0x94] ss:$8 sps:$4 sm:$0xff]  }
   0xb   :  { %617 = vmatpush3.bf16.msra.mxu0 %v715_v5  ;;  %704 = vmatpush3.bf16.msra.mxu1 %v715_v5  ;;  %v35_v30 = vld [vmem:[%s999_s0 + $0xa0] sm:$0x11]  ;;  %v746_v31 = vld [vmem:[%s999_s0 + $0x30] ss:$8 sps:$4 sm:$0xff]   ;;  %v754_v37 = vld [vmem:[%s999_s0 + $0x54] ss:$8 sps:$4 sm:$0xff]  }
   0xc   :  { %618 = vmatprep.subr.bf16.mxu0 %v716_v6  ;;  %697 = vmatprep.subr.bf16.mxu1 %v716_v6  ;;  %v751_v32 = vld [vmem:[%s999_s0 + $0x90] ss:$8 sps:$4 sm:$0xff]   ;;  %v749_v33 = vld [vmem:[%s999_s0 + $0x44] ss:$8 sps:$4 sm:$0xff]   ;;  %v553_v34 = vcombine.high %v35_v30, %v35_v30  ;;  %v752_v35 = vld [vmem:[%s999_s0 + $0x40] ss:$8 sps:$4 sm:$0xff]   ;;  %v552_v36 = vcombine.low %v35_v30, %v35_v30 }
   0xd   :  { %v757_v38 = vld [vmem:[%s999_s0 + $0x50] ss:$8 sps:$4 sm:$0xff]   ;;  %v892_v41 = vld [vmem:[%s1000_s2] ss:$0 sm:$0xff] }
   0xf   :  { %619 = vmatpush3.bf16.msra.mxu0 %v717_v7  ;;  %705 = vmatpush3.bf16.msra.mxu1 %v717_v7 }
  0x10   :  { %620 = vmatprep.subr.bf16.mxu0 %v718_v8  ;;  %698 = vmatprep.subr.bf16.mxu1 %v718_v8 }
  0x13   :  { %621 = vmatpush3.bf16.msra.mxu0 %v719_v9  ;;  %706 = vmatpush3.bf16.msra.mxu1 %v719_v9 }
  0x14   :  { %622 = vmatprep.subr.bf16.mxu0 %v720_v10  ;;  %699 = vmatprep.subr.bf16.mxu1 %v720_v10 }
  0x17   :  { %623 = vmatpush3.bf16.msra.mxu0 %v721_v13  ;;  %707 = vmatpush3.bf16.msra.mxu1 %v721_v13 }
  0x18   :  { %624 = vmatprep.subr.bf16.mxu0 %v722_v14  ;;  %700 = vmatprep.subr.bf16.mxu1 %v722_v14 }
  0x1b   :  { %625 = vmatpush3.bf16.msra.mxu0 %v723_v15  ;;  %708 = vmatpush3.bf16.msra.mxu1 %v723_v15 }
  0x1c   :  { %626 = vmatprep.subr.bf16.mxu0 %v724_v16  ;;  %701 = vmatprep.subr.bf16.mxu1 %v724_v16 }
  0x1f   :  { %627 = vmatpush3.bf16.msra.mxu0 %v725_v17  ;;  %709 = vmatpush3.bf16.msra.mxu1 %v725_v17 }
  0x22   :  { %311 = vmatmul.mubr.bf16.vlgmr.msra.gmra.mrb[0].mxu0 %v726_v18  ;;  %359 = vmatmul.mubr.bf16.vlgmr.msra.gmra.mrb[0].mxu1 %v729_v19 }
  0x23   :  { %318 = vmatprep.mubr.bf16.mxu0 %v732_v20  ;;  %366 = vmatprep.mubr.bf16.mxu1 %v735_v21 }
  0x2a   :  { %319 = vmatmul.mubr.bf16.gmra.mrb[4].mxu0 %v734_v22  ;;  %367 = vmatmul.mubr.bf16.gmra.mrb[4].mxu1 %v739_v23 }
  0x2b   :  { %326 = vmatprep.mubr.bf16.mxu0 %v737_v24  ;;  %374 = vmatprep.mubr.bf16.mxu1 %v741_v25 }
  0x32   :  { %327 = vmatmul.mubr.bf16.gmra.mrb[8].mxu0 %v740_v26  ;;  %375 = vmatmul.mubr.bf16.gmra.mrb[8].mxu1 %v745_v27 }
  0x33   :  { %334 = vmatprep.mubr.bf16.mxu0 %v743_v28  ;;  %382 = vmatprep.mubr.bf16.mxu1 %v747_v29 }
  0x3a   :  { %335 = vmatmul.mubr.bf16.gmra.mrb[12].mxu0 %v746_v31  ;;  %383 = vmatmul.mubr.bf16.gmra.mrb[12].mxu1 %v751_v32 }
  0x3b   :  { %342 = vmatprep.mubr.bf16.mxu0 %v749_v33  ;;  %390 = vmatprep.mubr.bf16.mxu1 %v553_v34 }
  0x42   :  { %343 = vmatmul.mubr.bf16.gmra.mrb[16].mxu0 %v752_v35  ;;  %391 = vmatmul.mubr.bf16.gmra.mrb[16].mxu1 %v552_v36 }
  0x43   :  { %350 = vmatprep.mubr.bf16.mxu0 %v754_v37 }
  0x4a   :  { %351 = vmatmul.mubr.bf16.gmra.mrb[20].mxu0 %v757_v38 }
  0xf5   :  { %v628_v39 = vpop.f32.mrb[0].mxu0  ;;  %v664_v40 = vpop.f32.mrb[0].mxu1 }
  0xf6   :  { %v629_v42 = vpop.f32.mrb[1].mxu0  ;;  %v665_v43 = vpop.f32.mrb[1].mxu1 }
  0xf7   :  { %v630_v44 = vadd.f32 %v629_v42, %v628_v39  ;;  %v631_v45 = vpop.f32.mrb[2].mxu0  ;;  %v666_v46 = vadd.f32 %v665_v43, %v664_v40  ;;  %v667_v47 = vpop.f32.mrb[2].mxu1 }
  0xf8   :  { %v632_v48 = vpop.f32.mrb[3].mxu0  ;;  %v668_v49 = vpop.f32.mrb[3].mxu1 }
  0xf9   :  { %v313_v50 = vadd.f32 %v630_v44, %v892_v41  ;;  %v633_v51 = vadd.f32 %v632_v48, %v631_v45  ;;  %v361_v52 = vadd.f32 %v666_v46, %v892_v41  ;;  %v669_v53 = vadd.f32 %v668_v49, %v667_v47 }
  0xfb   :  { %v398_v54 = vmax.f32 %v313_v50, 0.0  ;;  %v316_v55 = vadd.f32 %v633_v51, %v892_v41  ;;  %v410_v56 = vmax.f32 %v361_v52, 0.0  ;;  %v364_v57 = vadd.f32 %v669_v53, %v892_v41 }
  0xfd   :  { %v591_v58 = vpack.c.bf16 %v398_v54, %v398_v54  ;;  %v399_v59 = vmax.f32 %v316_v55, 0.0  ;;  %v634_v60 = vpop.f32.mrb[4].mxu0  ;;  %v603_v61 = vpack.c.bf16 %v410_v56, %v410_v56  ;;  %v411_v62 = vmax.f32 %v364_v57, 0.0  ;;  %v670_v63 = vpop.f32.mrb[4].mxu1 }
  0xfe   :  { %v635_v0 = vpop.f32.mrb[5].mxu0  ;;  %v671_v1 = vpop.f32.mrb[5].mxu1 }
  0xff   :  { %505 = vst.msk [vmem:[%s1001_s3] sm:$0xf] %vm504_vm0, %v591_v58  ;;  %v592_v2 = vpack.c.bf16 %v399_v59, %v399_v59  ;;  %517 = vst.msk [vmem:[%s1001_s3 + $0x30] sm:$0xf] %vm504_vm0, %v603_v61  ;;  %v636_v3 = vadd.f32 %v635_v0, %v634_v60  ;;  %v637_v4 = vpop.f32.mrb[6].mxu0  ;;  %v604_v5 = vpack.c.bf16 %v411_v62, %v411_v62  ;;  %v673_v7 = vpop.f32.mrb[6].mxu1 }
 0x100   :  { %v672_v6 = vadd.f32 %v671_v1, %v670_v63  ;;  %v638_v8 = vpop.f32.mrb[7].mxu0  ;;  %v674_v9 = vpop.f32.mrb[7].mxu1 }
 0x101   :  { %506 = vst.msk [vmem:[%s1001_s3 + $0x4] sm:$0xf] %vm504_vm0, %v592_v2  ;;  %v321_v10 = vadd.f32 %v636_v3, %v892_v41  ;;  %518 = vst.msk [vmem:[%s1001_s3 + $0x34] sm:$0xf] %vm504_vm0, %v604_v5  ;;  %v639_v11 = vadd.f32 %v638_v8, %v637_v4  ;;  %v675_v13 = vadd.f32 %v674_v9, %v673_v7 }
 0x102   :  { %v369_v12 = vadd.f32 %v672_v6, %v892_v41 }
 0x103   :  { %v400_v14 = vmax.f32 %v321_v10, 0.0  ;;  %v324_v15 = vadd.f32 %v639_v11, %v892_v41  ;;  %v372_v17 = vadd.f32 %v675_v13, %v892_v41 }
 0x104   :  { %v412_v16 = vmax.f32 %v369_v12, 0.0 }
 0x105   :  { %v593_v18 = vpack.c.bf16 %v400_v14, %v400_v14  ;;  %v401_v19 = vmax.f32 %v324_v15, 0.0  ;;  %v640_v20 = vpop.f32.mrb[8].mxu0  ;;  %v413_v22 = vmax.f32 %v372_v17, 0.0  ;;  %v676_v23 = vpop.f32.mrb[8].mxu1 }
 0x106   :  { %v605_v21 = vpack.c.bf16 %v412_v16, %v412_v16  ;;  %v641_v24 = vpop.f32.mrb[9].mxu0  ;;  %v677_v25 = vpop.f32.mrb[9].mxu1 }
 0x107   :  { %507 = vst.msk [vmem:[%s1001_s3 + $0x8] sm:$0xf] %vm504_vm0, %v593_v18  ;;  %v594_v26 = vpack.c.bf16 %v401_v19, %v401_v19  ;;  %v642_v27 = vadd.f32 %v641_v24, %v640_v20  ;;  %v643_v28 = vpop.f32.mrb[10].mxu0  ;;  %v606_v29 = vpack.c.bf16 %v413_v22, %v413_v22  ;;  %v678_v30 = vadd.f32 %v677_v25, %v676_v23  ;;  %v679_v31 = vpop.f32.mrb[10].mxu1 }
 0x108   :  { %519 = vst.msk [vmem:[%s1001_s3 + $0x38] sm:$0xf] %vm504_vm0, %v605_v21  ;;  %v644_v32 = vpop.f32.mrb[11].mxu0  ;;  %v680_v33 = vpop.f32.mrb[11].mxu1 }
 0x109   :  { %508 = vst.msk [vmem:[%s1001_s3 + $0xc] sm:$0xf] %vm504_vm0, %v594_v26  ;;  %v329_v34 = vadd.f32 %v642_v27, %v892_v41  ;;  %520 = vst.msk [vmem:[%s1001_s3 + $0x3c] sm:$0xf] %vm504_vm0, %v606_v29  ;;  %v645_v35 = vadd.f32 %v644_v32, %v643_v28  ;;  %v377_v36 = vadd.f32 %v678_v30, %v892_v41 }
 0x10a   :  { %v681_v37 = vadd.f32 %v680_v33, %v679_v31 }
 0x10b   :  { %v402_v38 = vmax.f32 %v329_v34, 0.0  ;;  %v332_v39 = vadd.f32 %v645_v35, %v892_v41  ;;  %v414_v40 = vmax.f32 %v377_v36, 0.0 }
 0x10c   :  { %v380_v42 = vadd.f32 %v681_v37, %v892_v41 }
 0x10d   :  { %v595_v43 = vpack.c.bf16 %v402_v38, %v402_v38  ;;  %v403_v44 = vmax.f32 %v332_v39, 0.0  ;;  %v646_v45 = vpop.f32.mrb[12].mxu0  ;;  %v607_v46 = vpack.c.bf16 %v414_v40, %v414_v40  ;;  %v682_v48 = vpop.f32.mrb[12].mxu1 }
 0x10e   :  { %v415_v47 = vmax.f32 %v380_v42, 0.0  ;;  %v647_v49 = vpop.f32.mrb[13].mxu0  ;;  %v683_v50 = vpop.f32.mrb[13].mxu1 }
 0x10f   :  { %509 = vst.msk [vmem:[%s1001_s3 + $0x10] sm:$0xf] %vm504_vm0, %v595_v43  ;;  %v596_v51 = vpack.c.bf16 %v403_v44, %v403_v44  ;;  %521 = vst.msk [vmem:[%s1001_s3 + $0x40] sm:$0xf] %vm504_vm0, %v607_v46  ;;  %v648_v52 = vadd.f32 %v647_v49, %v646_v45  ;;  %v649_v53 = vpop.f32.mrb[14].mxu0  ;;  %v684_v55 = vadd.f32 %v683_v50, %v682_v48  ;;  %v685_v56 = vpop.f32.mrb[14].mxu1 }
 0x110   :  { %v608_v54 = vpack.c.bf16 %v415_v47, %v415_v47  ;;  %v650_v57 = vpop.f32.mrb[15].mxu0  ;;  %v686_v58 = vpop.f32.mrb[15].mxu1 }
 0x111   :  { %510 = vst.msk [vmem:[%s1001_s3 + $0x14] sm:$0xf] %vm504_vm0, %v596_v51  ;;  %v337_v59 = vadd.f32 %v648_v52, %v892_v41  ;;  %v651_v60 = vadd.f32 %v650_v57, %v649_v53  ;;  %v385_v61 = vadd.f32 %v684_v55, %v892_v41  ;;  %v687_v62 = vadd.f32 %v686_v58, %v685_v56 }
 0x112   :  { %522 = vst.msk [vmem:[%s1001_s3 + $0x44] sm:$0xf] %vm504_vm0, %v608_v54 }
 0x113   :  { %v404_v63 = vmax.f32 %v337_v59, 0.0  ;;  %v340_v0 = vadd.f32 %v651_v60, %v892_v41  ;;  %v416_v1 = vmax.f32 %v385_v61, 0.0  ;;  %v388_v2 = vadd.f32 %v687_v62, %v892_v41 }
 0x115   :  { %v597_v3 = vpack.c.bf16 %v404_v63, %v404_v63  ;;  %v405_v4 = vmax.f32 %v340_v0, 0.0  ;;  %v652_v5 = vpop.f32.mrb[16].mxu0  ;;  %v609_v6 = vpack.c.bf16 %v416_v1, %v416_v1  ;;  %v417_v7 = vmax.f32 %v388_v2, 0.0  ;;  %v688_v8 = vpop.f32.mrb[16].mxu1 }
 0x116   :  { %v653_v9 = vpop.f32.mrb[17].mxu0  ;;  %v689_v10 = vpop.f32.mrb[17].mxu1 }
 0x117   :  { %511 = vst.msk [vmem:[%s1001_s3 + $0x18] sm:$0xf] %vm504_vm0, %v597_v3  ;;  %v598_v11 = vpack.c.bf16 %v405_v4, %v405_v4  ;;  %523 = vst.msk [vmem:[%s1001_s3 + $0x48] sm:$0xf] %vm504_vm0, %v609_v6  ;;  %v654_v12 = vadd.f32 %v653_v9, %v652_v5  ;;  %v655_v13 = vpop.f32.mrb[18].mxu0  ;;  %v610_v14 = vpack.c.bf16 %v417_v7, %v417_v7  ;;  %v691_v16 = vpop.f32.mrb[18].mxu1 }
 0x118   :  { %v690_v15 = vadd.f32 %v689_v10, %v688_v8  ;;  %v656_v17 = vpop.f32.mrb[19].mxu0  ;;  %v692_v18 = vpop.f32.mrb[19].mxu1 }
 0x119   :  { %512 = vst.msk [vmem:[%s1001_s3 + $0x1c] sm:$0xf] %vm504_vm0, %v598_v11  ;;  %v345_v19 = vadd.f32 %v654_v12, %v892_v41  ;;  %524 = vst.msk [vmem:[%s1001_s3 + $0x4c] sm:$0xf] %vm504_vm0, %v610_v14  ;;  %v657_v20 = vadd.f32 %v656_v17, %v655_v13 }
 0x11a   :  { %v393_v21 = vadd.f32 %v690_v15, %v892_v41 }
 0x11b   :  { %v406_v22 = vmax.f32 %v345_v19, 0.0  ;;  %v348_v23 = vadd.f32 %v657_v20, %v892_v41 }
 0x11c   :  { %v418_v24 = vmax.f32 %v393_v21, 0.0 }
 0x11d   :  { %v599_v25 = vpack.c.bf16 %v406_v22, %v406_v22  ;;  %v407_v26 = vmax.f32 %v348_v23, 0.0  ;;  %v658_v27 = vpop.f32.mrb[20].mxu0 }
 0x11e   :  { %v611_v28 = vpack.c.bf16 %v418_v24, %v418_v24  ;;  %v659_v29 = vpop.f32.mrb[21].mxu0 }
 0x11f   :  { %513 = vst.msk [vmem:[%s1001_s3 + $0x20] sm:$0xf] %vm504_vm0, %v599_v25  ;;  %v600_v30 = vpack.c.bf16 %v407_v26, %v407_v26  ;;  %v660_v31 = vadd.f32 %v659_v29, %v658_v27  ;;  %v661_v32 = vpop.f32.mrb[22].mxu0 }
 0x120   :  { %526 = vst.msk [vmem:[%s1001_s3 + $0x50] sm:$0x1] %vm525_vm1, %v611_v28  ;;  %v662_v33 = vpop.f32.mrb[23].mxu0 }
 0x121   :  { %514 = vst.msk [vmem:[%s1001_s3 + $0x24] sm:$0xf] %vm504_vm0, %v600_v30  ;;  %v353_v34 = vadd.f32 %v660_v31, %v892_v41  ;;  %v663_v35 = vadd.f32 %v662_v33, %v661_v32 }
 0x123   :  { %v408_v36 = vmax.f32 %v353_v34, 0.0  ;;  %v356_v37 = vadd.f32 %v663_v35, %v892_v41 }
 0x125   :  { %v601_v38 = vpack.c.bf16 %v408_v36, %v408_v36  ;;  %v409_v39 = vmax.f32 %v356_v37, 0.0 }
 0x127   :  { %515 = vst.msk [vmem:[%s1001_s3 + $0x28] sm:$0xf] %vm504_vm0, %v601_v38  ;;  %v602_v40 = vpack.c.bf16 %v409_v39, %v409_v39 }
 0x129   :  { %516 = vst.msk [vmem:[%s1001_s3 + $0x2c] sm:$0xf] %vm504_vm0, %v602_v40 }

// kernel: dueling_dqn_forward.5
= control target key start
LH: loop header
LB: loop body
LE: loop exit
PB: predicated region body
PF: predicated region fallthrough
CT: control target
= control target key end

     0   :  { %v674_v36 = vlaneseq  ;;  %v7178_v37 = vmov 1966171168   ;;  %vm4094_vm0 = vcmask 261120   ;;  %s9380_s1 = inlined_call_operand.vmem [shape: bf16[2592,512], index: 1, kind: input, shape index: {}]   ;;  %s9381_s0 = inlined_call_operand.vmem [shape: bf16[2,2592], index: 0, kind: input, shape index: {}]   ;;  %s9382_s3 = inlined_call_operand.vmem [shape: bf16[512,128], index: 3, kind: input, shape index: {}]   ;;  %s9383_s2 = inlined_call_operand.vmem [shape: f32[1,512], index: 2, kind: input, shape index: {}]   ;;  %s9384_s4 = inlined_call_operand.vmem [shape: f32[1,128], index: 4, kind: input, shape index: {}]   ;;  %s9385_s5 = inlined_call_operand.vmem [shape: f32[2,128], index: 5, kind: output, shape index: {}]  }
   0x1   :  { %v6169_v0 = vld [vmem:[%s9380_s1 + $0x4] ss:$16 sps:$4 sm:$0xff]   ;;  %v6171_v1 = vld [vmem:[%s9380_s1 + $0xc] ss:$16 sps:$4 sm:$0xff]   ;;  %v6173_v2 = vld [vmem:[%s9380_s1] ss:$16 sps:$4 sm:$0xff]   ;;  %v699_v38 = vunpack.c.l.s4 %v7178_v37 }
   0x2   :  { %4098 = vmatprep.subr.bf16.mxu0 %v6169_v0  ;;  %v6174_v3 = vld [vmem:[%s9380_s1 + $0x8] ss:$16 sps:$4 sm:$0xff]   ;;  %4549 = vmatprep.subr.bf16.mxu1 %v6171_v1  ;;  %v6175_v4 = vld [vmem:[%s9380_s1 + $0x24] ss:$16 sps:$4 sm:$0xff]   ;;  %v6177_v5 = vld [vmem:[%s9380_s1 + $0x2c] ss:$16 sps:$4 sm:$0xff]  }
   0x3   :  { %4099 = vmatpush1.bf16.msra.mxu0 %v6173_v2  ;;  %4550 = vmatpush1.bf16.msra.mxu1 %v6174_v3  ;;  %v6179_v6 = vld [vmem:[%s9380_s1 + $0x20] ss:$16 sps:$4 sm:$0xff]   ;;  %v6180_v7 = vld [vmem:[%s9380_s1 + $0x28] ss:$16 sps:$4 sm:$0xff]   ;;  %v6181_v8 = vld [vmem:[%s9380_s1 + $0x44] ss:$16 sps:$4 sm:$0xff]   ;;  %v700_v43 = vunpack.c.0.s8 %v699_v38 }
   0x4   :  { %4100 = vmatprep.subr.bf16.mxu0 %v6175_v4  ;;  %4551 = vmatprep.subr.bf16.mxu1 %v6177_v5  ;;  %v6183_v9 = vld [vmem:[%s9380_s1 + $0x4c] ss:$16 sps:$4 sm:$0xff]   ;;  %v6185_v10 = vld [vmem:[%s9380_s1 + $0x40] ss:$16 sps:$4 sm:$0xff]   ;;  %v6186_v11 = vld [vmem:[%s9380_s1 + $0x48] ss:$16 sps:$4 sm:$0xff]  }
   0x5   :  { %v6187_v12 = vld [vmem:[%s9380_s1 + $0x64] ss:$16 sps:$4 sm:$0xff]   ;;  %v6189_v13 = vld [vmem:[%s9380_s1 + $0x6c] ss:$16 sps:$4 sm:$0xff]   ;;  %v6191_v14 = vld [vmem:[%s9380_s1 + $0x60] ss:$16 sps:$4 sm:$0xff]  }
   0x6   :  { %v6192_v15 = vld [vmem:[%s9380_s1 + $0x68] ss:$16 sps:$4 sm:$0xff]   ;;  %v6193_v16 = vld [vmem:[%s9380_s1 + $0x84] ss:$16 sps:$4 sm:$0xff]   ;;  %v6195_v17 = vld [vmem:[%s9380_s1 + $0x8c] ss:$16 sps:$4 sm:$0xff]  }
   0x7   :  { %4101 = vmatpush1.bf16.msra.mxu0 %v6179_v6  ;;  %4552 = vmatpush1.bf16.msra.mxu1 %v6180_v7  ;;  %v6197_v18 = vld [vmem:[%s9380_s1 + $0x80] ss:$16 sps:$4 sm:$0xff]   ;;  %v6198_v19 = vld [vmem:[%s9380_s1 + $0x88] ss:$16 sps:$4 sm:$0xff]   ;;  %v6199_v20 = vld [vmem:[%s9380_s1 + $0xa4] ss:$16 sps:$4 sm:$0xff]  }
   0x8   :  { %4102 = vmatprep.subr.bf16.mxu0 %v6181_v8  ;;  %4553 = vmatprep.subr.bf16.mxu1 %v6183_v9  ;;  %v6201_v21 = vld [vmem:[%s9380_s1 + $0xac] ss:$16 sps:$4 sm:$0xff]   ;;  %v6203_v22 = vld [vmem:[%s9380_s1 + $0xa0] ss:$16 sps:$4 sm:$0xff]   ;;  %v6204_v23 = vld [vmem:[%s9380_s1 + $0xa8] ss:$16 sps:$4 sm:$0xff]  }
   0x9   :  { %v6205_v24 = vld [vmem:[%s9380_s1 + $0xc4] ss:$16 sps:$4 sm:$0xff]   ;;  %v6207_v25 = vld [vmem:[%s9380_s1 + $0xcc] ss:$16 sps:$4 sm:$0xff]   ;;  %v6209_v26 = vld [vmem:[%s9380_s1 + $0xc0] ss:$16 sps:$4 sm:$0xff]  }
   0xa   :  { %v6210_v27 = vld [vmem:[%s9380_s1 + $0xc8] ss:$16 sps:$4 sm:$0xff]   ;;  %v6211_v28 = vld [vmem:[%s9380_s1 + $0xe4] ss:$16 sps:$4 sm:$0xff]   ;;  %v6213_v29 = vld [vmem:[%s9380_s1 + $0xec] ss:$16 sps:$4 sm:$0xff]  }
   0xb   :  { %4103 = vmatpush1.bf16.msra.mxu0 %v6185_v10  ;;  %4554 = vmatpush1.bf16.msra.mxu1 %v6186_v11  ;;  %v6215_v30 = vld [vmem:[%s9380_s1 + $0xe0] ss:$16 sps:$4 sm:$0xff]   ;;  %v6216_v31 = vld [vmem:[%s9380_s1 + $0xe8] ss:$16 sps:$4 sm:$0xff]   ;;  %v6217_v32 = vld [vmem:[%s9380_s1 + $0x104] ss:$16 sps:$4 sm:$0xff]  }
   0xc   :  { %4104 = vmatprep.subr.bf16.mxu0 %v6187_v12  ;;  %4555 = vmatprep.subr.bf16.mxu1 %v6189_v13  ;;  %v6219_v33 = vld [vmem:[%s9380_s1 + $0x10c] ss:$16 sps:$4 sm:$0xff]   ;;  %v6221_v34 = vld [vmem:[%s9380_s1 + $0x100] ss:$16 sps:$4 sm:$0xff]   ;;  %v6222_v35 = vld [vmem:[%s9380_s1 + $0x108] ss:$16 sps:$4 sm:$0xff]  }
   0xd   :  { %v6223_v39 = vld [vmem:[%s9380_s1 + $0x124] ss:$16 sps:$4 sm:$0xff]   ;;  %v6225_v40 = vld [vmem:[%s9380_s1 + $0x12c] ss:$16 sps:$4 sm:$0xff]   ;;  %v6227_v41 = vld [vmem:[%s9380_s1 + $0x120] ss:$16 sps:$4 sm:$0xff]  }
   0xe   :  { %v7327_v42 = vshrl.u32 %v674_v36, 7  ;;  %v6228_v44 = vld [vmem:[%s9380_s1 + $0x128] ss:$16 sps:$4 sm:$0xff]   ;;  %v6229_v45 = vld [vmem:[%s9380_s1 + $0x144] ss:$16 sps:$4 sm:$0xff]  }
   0xf   :  { %4105 = vmatpush1.bf16.msra.mxu0 %v6191_v14  ;;  %4556 = vmatpush1.bf16.msra.mxu1 %v6192_v15  ;;  %v6231_v46 = vld [vmem:[%s9380_s1 + $0x14c] ss:$16 sps:$4 sm:$0xff]   ;;  %v6233_v47 = vld [vmem:[%s9380_s1 + $0x140] ss:$16 sps:$4 sm:$0xff]   ;;  %v6234_v48 = vld [vmem:[%s9380_s1 + $0x148] ss:$16 sps:$4 sm:$0xff]  }
  0x10   :  { %4106 = vmatprep.subr.bf16.mxu0 %v6193_v16  ;;  %4557 = vmatprep.subr.bf16.mxu1 %v6195_v17  ;;  %v7345_v49 = vsub.s32 %v700_v43, %v7327_v42  ;;  %v6235_v50 = vld [vmem:[%s9380_s1 + $0x164] ss:$16 sps:$4 sm:$0xff]   ;;  %v6237_v51 = vld [vmem:[%s9380_s1 + $0x16c] ss:$16 sps:$4 sm:$0xff]   ;;  %v6239_v53 = vld [vmem:[%s9380_s1 + $0x160] ss:$16 sps:$4 sm:$0xff]  }
  0x11   :  { %v7356_v52 = vld [vmem:[%s9381_s0] sm:$0xff]  ;;  %v6240_v55 = vld [vmem:[%s9380_s1 + $0x168] ss:$16 sps:$4 sm:$0xff]   ;;  %v6243_v57 = vld [vmem:[%s9380_s1 + $0x18c] ss:$16 sps:$4 sm:$0xff]  }
  0x12   :  { %v704_v54 = vrot.slane %v7356_v52, %v7345_v49  ;;  %v6241_v56 = vld [vmem:[%s9380_s1 + $0x184] ss:$16 sps:$4 sm:$0xff]   ;;  %v6245_v59 = vld [vmem:[%s9380_s1 + $0x180] ss:$16 sps:$4 sm:$0xff]   ;;  %v6246_v61 = vld [vmem:[%s9380_s1 + $0x188] ss:$16 sps:$4 sm:$0xff]  }
  0x13   :  { %4107 = vmatpush1.bf16.msra.mxu0 %v6197_v18  ;;  %4558 = vmatpush1.bf16.msra.mxu1 %v6198_v19  ;;  %v6247_v62 = vld [vmem:[%s9380_s1 + $0x1a4] ss:$16 sps:$4 sm:$0xff]   ;;  %v6249_v63 = vld [vmem:[%s9380_s1 + $0x1ac] ss:$16 sps:$4 sm:$0xff]   ;;  %v6251_v0 = vld [vmem:[%s9380_s1 + $0x1a0] ss:$16 sps:$4 sm:$0xff]  }
  0x14   :  { %4108 = vmatprep.subr.bf16.mxu0 %v6199_v20  ;;  %4559 = vmatprep.subr.bf16.mxu1 %v6201_v21  ;;  %v712_v58 = vcombine.high %v704_v54, %v704_v54  ;;  %v6252_v1 = vld [vmem:[%s9380_s1 + $0x1a8] ss:$16 sps:$4 sm:$0xff]   ;;  %v6253_v2 = vld [vmem:[%s9380_s1 + $0x1c4] ss:$16 sps:$4 sm:$0xff]   ;;  %v6255_v3 = vld [vmem:[%s9380_s1 + $0x1cc] ss:$16 sps:$4 sm:$0xff]   ;;  %v7425_v13 = vrot.slane %v704_v54, %v7345_v49 }
  0x15   :  { %v6257_v4 = vld [vmem:[%s9380_s1 + $0x1c0] ss:$16 sps:$4 sm:$0xff]   ;;  %v6258_v5 = vld [vmem:[%s9380_s1 + $0x1c8] ss:$16 sps:$4 sm:$0xff]   ;;  %v6259_v6 = vld [vmem:[%s9380_s1 + $0x1e4] ss:$16 sps:$4 sm:$0xff]  }
  0x16   :  { %v734_v60 = vrot.slane %v712_v58, %v7345_v49  ;;  %v6261_v7 = vld [vmem:[%s9380_s1 + $0x1ec] ss:$16 sps:$4 sm:$0xff]   ;;  %v6263_v8 = vld [vmem:[%s9380_s1 + $0x1e0] ss:$16 sps:$4 sm:$0xff]   ;;  %v6264_v9 = vld [vmem:[%s9380_s1 + $0x1e8] ss:$16 sps:$4 sm:$0xff]  }
  0x17   :  { %4109 = vmatpush1.bf16.msra.mxu0 %v6203_v22  ;;  %4560 = vmatpush1.bf16.msra.mxu1 %v6204_v23  ;;  %v6267_v10 = vld [vmem:[%s9380_s1 + $0x204] ss:$16 sps:$4 sm:$0xff]   ;;  %v6270_v11 = vld [vmem:[%s9380_s1 + $0x20c] ss:$16 sps:$4 sm:$0xff]   ;;  %v6265_v12 = vld [vmem:[%s9380_s1 + $0x200] ss:$16 sps:$4 sm:$0xff]  }
  0x18   :  { %4110 = vmatprep.subr.bf16.mxu0 %v6205_v24  ;;  %4561 = vmatprep.subr.bf16.mxu1 %v6207_v25  ;;  %v6268_v14 = vld [vmem:[%s9380_s1 + $0x208] ss:$16 sps:$4 sm:$0xff]   ;;  %v6273_v15 = vld [vmem:[%s9380_s1 + $0x224] ss:$16 sps:$4 sm:$0xff]   ;;  %v6276_v16 = vld [vmem:[%s9380_s1 + $0x22c] ss:$16 sps:$4 sm:$0xff]   ;;  %v744_v17 = vcombine.high %v734_v60, %v734_v60 }
  0x19   :  { %4130 = vmatprep.mubr.bf16.mxu0 %v734_v60  ;;  %4581 = vmatprep.mubr.bf16.mxu1 %v734_v60  ;;  %v6271_v18 = vld [vmem:[%s9380_s1 + $0x220] ss:$16 sps:$4 sm:$0xff]   ;;  %v6274_v19 = vld [vmem:[%s9380_s1 + $0x228] ss:$16 sps:$4 sm:$0xff]   ;;  %v6279_v20 = vld [vmem:[%s9380_s1 + $0x244] ss:$16 sps:$4 sm:$0xff]  }
  0x1a   :  { %v6282_v21 = vld [vmem:[%s9380_s1 + $0x24c] ss:$16 sps:$4 sm:$0xff]   ;;  %v6277_v22 = vld [vmem:[%s9380_s1 + $0x240] ss:$16 sps:$4 sm:$0xff]   ;;  %v6280_v23 = vld [vmem:[%s9380_s1 + $0x248] ss:$16 sps:$4 sm:$0xff]  }
  0x1b   :  { %4111 = vmatpush1.bf16.msra.mxu0 %v6209_v26  ;;  %4562 = vmatpush1.bf16.msra.mxu1 %v6210_v27  ;;  %v6285_v24 = vld [vmem:[%s9380_s1 + $0x264] ss:$16 sps:$4 sm:$0xff]   ;;  %v6288_v25 = vld [vmem:[%s9380_s1 + $0x26c] ss:$16 sps:$4 sm:$0xff]   ;;  %v6283_v26 = vld [vmem:[%s9380_s1 + $0x260] ss:$16 sps:$4 sm:$0xff]  }
  0x1c   :  { %4112 = vmatprep.subr.bf16.mxu0 %v6211_v28  ;;  %4563 = vmatprep.subr.bf16.mxu1 %v6213_v29  ;;  %v6286_v27 = vld [vmem:[%s9380_s1 + $0x268] ss:$16 sps:$4 sm:$0xff]   ;;  %v6291_v28 = vld [vmem:[%s9380_s1 + $0x284] ss:$16 sps:$4 sm:$0xff]   ;;  %v6294_v29 = vld [vmem:[%s9380_s1 + $0x28c] ss:$16 sps:$4 sm:$0xff]  }
  0x1d   :  { %v6303_v36 = vld [vmem:[%s9380_s1 + $0x2c4] ss:$16 sps:$4 sm:$0xff]   ;;  %v6306_v37 = vld [vmem:[%s9380_s1 + $0x2cc] ss:$16 sps:$4 sm:$0xff]   ;;  %v6301_v38 = vld [vmem:[%s9380_s1 + $0x2c0] ss:$16 sps:$4 sm:$0xff]  }
  0x1e   :  { %v6307_v43 = vld [vmem:[%s9380_s1 + $0x2e0] ss:$16 sps:$4 sm:$0xff]   ;;  %v6322_v54 = vld [vmem:[%s9380_s1 + $0x328] ss:$16 sps:$4 sm:$0xff]   ;;  %v6336_v60 = vld [vmem:[%s9380_s1 + $0x36c] ss:$16 sps:$4 sm:$0xff]  }
  0x1f   :  { %4113 = vmatpush1.bf16.msra.mxu0 %v6215_v30  ;;  %4564 = vmatpush1.bf16.msra.mxu1 %v6216_v31  ;;  %v6289_v30 = vld [vmem:[%s9380_s1 + $0x280] ss:$16 sps:$4 sm:$0xff]   ;;  %v6292_v31 = vld [vmem:[%s9380_s1 + $0x288] ss:$16 sps:$4 sm:$0xff]  }
  0x20   :  { %4114 = vmatprep.subr.bf16.mxu0 %v6217_v32  ;;  %4565 = vmatprep.subr.bf16.mxu1 %v6219_v33  ;;  %v6297_v32 = vld [vmem:[%s9380_s1 + $0x2a4] ss:$16 sps:$4 sm:$0xff]   ;;  %v6300_v33 = vld [vmem:[%s9380_s1 + $0x2ac] ss:$16 sps:$4 sm:$0xff]   ;;  %v6328_v58 = vld [vmem:[%s9380_s1 + $0x348] ss:$16 sps:$4 sm:$0xff]  }
  0x23   :  { %4115 = vmatpush1.bf16.msra.mxu0 %v6221_v34  ;;  %4566 = vmatpush1.bf16.msra.mxu1 %v6222_v35  ;;  %v6295_v34 = vld [vmem:[%s9380_s1 + $0x2a0] ss:$16 sps:$4 sm:$0xff]   ;;  %v6298_v35 = vld [vmem:[%s9380_s1 + $0x2a8] ss:$16 sps:$4 sm:$0xff]  }
  0x24   :  { %4116 = vmatprep.subr.bf16.mxu0 %v6223_v39  ;;  %4567 = vmatprep.subr.bf16.mxu1 %v6225_v40  ;;  %v6304_v39 = vld [vmem:[%s9380_s1 + $0x2c8] ss:$16 sps:$4 sm:$0xff]   ;;  %v6309_v40 = vld [vmem:[%s9380_s1 + $0x2e4] ss:$16 sps:$4 sm:$0xff]  }
  0x27   :  { %4117 = vmatpush1.bf16.msra.mxu0 %v6227_v41  ;;  %4568 = vmatpush1.bf16.msra.mxu1 %v6228_v44  ;;  %v6312_v41 = vld [vmem:[%s9380_s1 + $0x2ec] ss:$16 sps:$4 sm:$0xff]   ;;  %v6310_v44 = vld [vmem:[%s9380_s1 + $0x2e8] ss:$16 sps:$4 sm:$0xff]  }
  0x28   :  { %4118 = vmatprep.subr.bf16.mxu0 %v6229_v45  ;;  %4569 = vmatprep.subr.bf16.mxu1 %v6231_v46  ;;  %v6315_v45 = vld [vmem:[%s9380_s1 + $0x304] ss:$16 sps:$4 sm:$0xff]   ;;  %v6318_v46 = vld [vmem:[%s9380_s1 + $0x30c] ss:$16 sps:$4 sm:$0xff]  }
  0x2b   :  { %4119 = vmatpush1.bf16.msra.mxu0 %v6233_v47  ;;  %4570 = vmatpush1.bf16.msra.mxu1 %v6234_v48  ;;  %v6313_v47 = vld [vmem:[%s9380_s1 + $0x300] ss:$16 sps:$4 sm:$0xff]   ;;  %v6316_v48 = vld [vmem:[%s9380_s1 + $0x308] ss:$16 sps:$4 sm:$0xff]  }
  0x2c   :  { %4120 = vmatprep.subr.bf16.mxu0 %v6235_v50  ;;  %4571 = vmatprep.subr.bf16.mxu1 %v6237_v51  ;;  %v6321_v50 = vld [vmem:[%s9380_s1 + $0x324] ss:$16 sps:$4 sm:$0xff]   ;;  %v6324_v51 = vld [vmem:[%s9380_s1 + $0x32c] ss:$16 sps:$4 sm:$0xff]  }
  0x2f   :  { %4121 = vmatpush1.bf16.msra.mxu0 %v6239_v53  ;;  %4572 = vmatpush1.bf16.msra.mxu1 %v6240_v55  ;;  %v6319_v53 = vld [vmem:[%s9380_s1 + $0x320] ss:$16 sps:$4 sm:$0xff]   ;;  %v6327_v55 = vld [vmem:[%s9380_s1 + $0x344] ss:$16 sps:$4 sm:$0xff]  }
  0x30   :  { %4122 = vmatprep.subr.bf16.mxu0 %v6241_v56  ;;  %4573 = vmatprep.subr.bf16.mxu1 %v6243_v57  ;;  %v6330_v56 = vld [vmem:[%s9380_s1 + $0x34c] ss:$16 sps:$4 sm:$0xff]   ;;  %v6325_v57 = vld [vmem:[%s9380_s1 + $0x340] ss:$16 sps:$4 sm:$0xff]  }
  0x33   :  { %4123 = vmatpush1.bf16.msra.mxu0 %v6245_v59  ;;  %4574 = vmatpush1.bf16.msra.mxu1 %v6246_v61  ;;  %v6333_v59 = vld [vmem:[%s9380_s1 + $0x364] ss:$16 sps:$4 sm:$0xff]   ;;  %v6331_v61 = vld [vmem:[%s9380_s1 + $0x360] ss:$16 sps:$4 sm:$0xff]  }
  0x34   :  { %4124 = vmatprep.subr.bf16.mxu0 %v6247_v62  ;;  %4575 = vmatprep.subr.bf16.mxu1 %v6249_v63  ;;  %v6334_v62 = vld [vmem:[%s9380_s1 + $0x368] ss:$16 sps:$4 sm:$0xff]   ;;  %v6339_v63 = vld [vmem:[%s9380_s1 + $0x384] ss:$16 sps:$4 sm:$0xff]  }
  0x37   :  { %4125 = vmatpush1.bf16.msra.mxu0 %v6251_v0  ;;  %4576 = vmatpush1.bf16.msra.mxu1 %v6252_v1  ;;  %v6342_v0 = vld [vmem:[%s9380_s1 + $0x38c] ss:$16 sps:$4 sm:$0xff]   ;;  %v6337_v1 = vld [vmem:[%s9380_s1 + $0x380] ss:$16 sps:$4 sm:$0xff]  }
  0x38   :  { %4126 = vmatprep.subr.bf16.mxu0 %v6253_v2  ;;  %4577 = vmatprep.subr.bf16.mxu1 %v6255_v3  ;;  %v6340_v2 = vld [vmem:[%s9380_s1 + $0x388] ss:$16 sps:$4 sm:$0xff]   ;;  %v6345_v3 = vld [vmem:[%s9380_s1 + $0x3a4] ss:$16 sps:$4 sm:$0xff]  }
  0x3b   :  { %4127 = vmatpush1.bf16.msra.mxu0 %v6257_v4  ;;  %4578 = vmatpush1.bf16.msra.mxu1 %v6258_v5  ;;  %v6348_v4 = vld [vmem:[%s9380_s1 + $0x3ac] ss:$16 sps:$4 sm:$0xff]   ;;  %v6343_v5 = vld [vmem:[%s9380_s1 + $0x3a0] ss:$16 sps:$4 sm:$0xff]  }
  0x3c   :  { %4128 = vmatprep.subr.bf16.mxu0 %v6259_v6  ;;  %4579 = vmatprep.subr.bf16.mxu1 %v6261_v7  ;;  %v6346_v6 = vld [vmem:[%s9380_s1 + $0x3a8] ss:$16 sps:$4 sm:$0xff]   ;;  %v6351_v7 = vld [vmem:[%s9380_s1 + $0x3c4] ss:$16 sps:$4 sm:$0xff]  }
  0x3f   :  { %4129 = vmatpush1.bf16.msra.mxu0 %v6263_v8  ;;  %4580 = vmatpush1.bf16.msra.mxu1 %v6264_v9  ;;  %v6354_v8 = vld [vmem:[%s9380_s1 + $0x3cc] ss:$16 sps:$4 sm:$0xff]   ;;  %v697_v9 = vcombine.high %v7356_v52, %v7356_v52 }
  0x40   :  { %4139 = vmatprep.subr.bf16.mxu0 %v6267_v10  ;;  %4590 = vmatprep.subr.bf16.mxu1 %v6270_v11  ;;  %v6349_v10 = vld [vmem:[%s9380_s1 + $0x3c0] ss:$16 sps:$4 sm:$0xff]   ;;  %v6352_v11 = vld [vmem:[%s9380_s1 + $0x3c8] ss:$16 sps:$4 sm:$0xff]   ;;  %v6360_v52 = vld [vmem:[%s9380_s1 + $0x3ec] ss:$16 sps:$4 sm:$0xff]  }
  0x42   :  { %4131 = vmatmul.mubr.bf16.vlgmr.msra.gmra.mrb[0].mxu0 %v7425_v13  ;;  %4582 = vmatmul.mubr.bf16.vlgmr.msra.gmra.mrb[0].mxu1 %v7425_v13 }
  0x43   :  { %4140 = vmatpush1.bf16.msra.mxu0 %v6265_v12  ;;  %4591 = vmatpush1.bf16.msra.mxu1 %v6268_v14  ;;  %v6357_v12 = vld [vmem:[%s9380_s1 + $0x3e4] ss:$16 sps:$4 sm:$0xff]   ;;  %v7609_v14 = vrot.slane %v697_v9, %v7345_v49  ;;  %v6436_v9 = vld [vmem:[%s9380_s1 + $0x588] ss:$16 sps:$4 sm:$0xff]  }
  0x44   :  { %4141 = vmatprep.subr.bf16.mxu0 %v6273_v15  ;;  %4592 = vmatprep.subr.bf16.mxu1 %v6276_v16  ;;  %v6355_v15 = vld [vmem:[%s9380_s1 + $0x3e0] ss:$16 sps:$4 sm:$0xff]   ;;  %v6358_v16 = vld [vmem:[%s9380_s1 + $0x3e8] ss:$16 sps:$4 sm:$0xff]  }
  0x45   :  { %4171 = vmatprep.mubr.bf16.mxu0 %v744_v17  ;;  %4622 = vmatprep.mubr.bf16.mxu1 %v744_v17  ;;  %v6363_v17 = vld [vmem:[%s9380_s1 + $0x404] ss:$16 sps:$4 sm:$0xff]  }
  0x47   :  { %4142 = vmatpush1.bf16.msra.mxu0 %v6271_v18  ;;  %4593 = vmatpush1.bf16.msra.mxu1 %v6274_v19  ;;  %v6366_v18 = vld [vmem:[%s9380_s1 + $0x40c] ss:$16 sps:$4 sm:$0xff]   ;;  %v713_v19 = vcombine.high %v7609_v14, %v7609_v14 }
  0x48   :  { %4143 = vmatprep.subr.bf16.mxu0 %v6279_v20  ;;  %4594 = vmatprep.subr.bf16.mxu1 %v6282_v21  ;;  %v6361_v20 = vld [vmem:[%s9380_s1 + $0x400] ss:$16 sps:$4 sm:$0xff]   ;;  %v742_v21 = vcombine.high %v7425_v13, %v7425_v13 }
  0x49   :  { %v6367_v13 = vld [vmem:[%s9380_s1 + $0x420] ss:$16 sps:$4 sm:$0xff]  }
  0x4b   :  { %4144 = vmatpush1.bf16.msra.mxu0 %v6277_v22  ;;  %4595 = vmatpush1.bf16.msra.mxu1 %v6280_v23  ;;  %v6364_v22 = vld [vmem:[%s9380_s1 + $0x408] ss:$16 sps:$4 sm:$0xff]   ;;  %v6369_v23 = vld [vmem:[%s9380_s1 + $0x424] ss:$16 sps:$4 sm:$0xff]  }
  0x4c   :  { %4145 = vmatprep.subr.bf16.mxu0 %v6285_v24  ;;  %4596 = vmatprep.subr.bf16.mxu1 %v6288_v25  ;;  %v6372_v24 = vld [vmem:[%s9380_s1 + $0x42c] ss:$16 sps:$4 sm:$0xff]   ;;  %v7640_v25 = vrot.slane %v713_v19, %v7345_v49  ;;  %v6453_v19 = vld [vmem:[%s9380_s1 + $0x5e4] ss:$16 sps:$4 sm:$0xff]  }
  0x4f   :  { %4146 = vmatpush1.bf16.msra.mxu0 %v6283_v26  ;;  %4597 = vmatpush1.bf16.msra.mxu1 %v6286_v27  ;;  %v6370_v26 = vld [vmem:[%s9380_s1 + $0x428] ss:$16 sps:$4 sm:$0xff]   ;;  %v6375_v27 = vld [vmem:[%s9380_s1 + $0x444] ss:$16 sps:$4 sm:$0xff]  }
  0x50   :  { %4147 = vmatprep.subr.bf16.mxu0 %v6291_v28  ;;  %4598 = vmatprep.subr.bf16.mxu1 %v6294_v29  ;;  %v6378_v28 = vld [vmem:[%s9380_s1 + $0x44c] ss:$16 sps:$4 sm:$0xff]   ;;  %v6373_v29 = vld [vmem:[%s9380_s1 + $0x440] ss:$16 sps:$4 sm:$0xff]  }
  0x53   :  { %4148 = vmatpush1.bf16.msra.mxu0 %v6289_v30  ;;  %4599 = vmatpush1.bf16.msra.mxu1 %v6292_v31  ;;  %v6376_v30 = vld [vmem:[%s9380_s1 + $0x448] ss:$16 sps:$4 sm:$0xff]   ;;  %v6381_v31 = vld [vmem:[%s9380_s1 + $0x464] ss:$16 sps:$4 sm:$0xff]  }
  0x54   :  { %4149 = vmatprep.subr.bf16.mxu0 %v6297_v32  ;;  %4600 = vmatprep.subr.bf16.mxu1 %v6300_v33  ;;  %v6384_v32 = vld [vmem:[%s9380_s1 + $0x46c] ss:$16 sps:$4 sm:$0xff]   ;;  %v6379_v33 = vld [vmem:[%s9380_s1 + $0x460] ss:$16 sps:$4 sm:$0xff]  }
  0x57   :  { %4150 = vmatpush1.bf16.msra.mxu0 %v6295_v34  ;;  %4601 = vmatpush1.bf16.msra.mxu1 %v6298_v35  ;;  %v6382_v34 = vld [vmem:[%s9380_s1 + $0x468] ss:$16 sps:$4 sm:$0xff]   ;;  %v6387_v35 = vld [vmem:[%s9380_s1 + $0x484] ss:$16 sps:$4 sm:$0xff]  }
  0x58   :  { %4151 = vmatprep.subr.bf16.mxu0 %v6303_v36  ;;  %4602 = vmatprep.subr.bf16.mxu1 %v6306_v37  ;;  %v6390_v36 = vld [vmem:[%s9380_s1 + $0x48c] ss:$16 sps:$4 sm:$0xff]   ;;  %v6385_v37 = vld [vmem:[%s9380_s1 + $0x480] ss:$16 sps:$4 sm:$0xff]  }
  0x5b   :  { %4152 = vmatpush1.bf16.msra.mxu0 %v6301_v38  ;;  %4603 = vmatpush1.bf16.msra.mxu1 %v6304_v39  ;;  %v6388_v38 = vld [vmem:[%s9380_s1 + $0x488] ss:$16 sps:$4 sm:$0xff]   ;;  %v6393_v39 = vld [vmem:[%s9380_s1 + $0x4a4] ss:$16 sps:$4 sm:$0xff]  }
  0x5c   :  { %4153 = vmatprep.subr.bf16.mxu0 %v6309_v40  ;;  %4604 = vmatprep.subr.bf16.mxu1 %v6312_v41  ;;  %v6396_v40 = vld [vmem:[%s9380_s1 + $0x4ac] ss:$16 sps:$4 sm:$0xff]   ;;  %v6391_v41 = vld [vmem:[%s9380_s1 + $0x4a0] ss:$16 sps:$4 sm:$0xff]  }
  0x5f   :  { %4154 = vmatpush1.bf16.msra.mxu0 %v6307_v43  ;;  %4605 = vmatpush1.bf16.msra.mxu1 %v6310_v44  ;;  %v6394_v43 = vld [vmem:[%s9380_s1 + $0x4a8] ss:$16 sps:$4 sm:$0xff]   ;;  %v6399_v44 = vld [vmem:[%s9380_s1 + $0x4c4] ss:$16 sps:$4 sm:$0xff]  }
  0x60   :  { %4155 = vmatprep.subr.bf16.mxu0 %v6315_v45  ;;  %4606 = vmatprep.subr.bf16.mxu1 %v6318_v46  ;;  %v6402_v45 = vld [vmem:[%s9380_s1 + $0x4cc] ss:$16 sps:$4 sm:$0xff]   ;;  %v6397_v46 = vld [vmem:[%s9380_s1 + $0x4c0] ss:$16 sps:$4 sm:$0xff]  }
  0x63   :  { %4156 = vmatpush1.bf16.msra.mxu0 %v6313_v47  ;;  %4607 = vmatpush1.bf16.msra.mxu1 %v6316_v48  ;;  %v6400_v47 = vld [vmem:[%s9380_s1 + $0x4c8] ss:$16 sps:$4 sm:$0xff]   ;;  %v6405_v48 = vld [vmem:[%s9380_s1 + $0x4e4] ss:$16 sps:$4 sm:$0xff]  }
  0x64   :  { %4157 = vmatprep.subr.bf16.mxu0 %v6321_v50  ;;  %4608 = vmatprep.subr.bf16.mxu1 %v6324_v51  ;;  %v6408_v50 = vld [vmem:[%s9380_s1 + $0x4ec] ss:$16 sps:$4 sm:$0xff]   ;;  %v6403_v51 = vld [vmem:[%s9380_s1 + $0x4e0] ss:$16 sps:$4 sm:$0xff]  }
  0x67   :  { %4158 = vmatpush1.bf16.msra.mxu0 %v6319_v53  ;;  %4609 = vmatpush1.bf16.msra.mxu1 %v6322_v54  ;;  %v6406_v53 = vld [vmem:[%s9380_s1 + $0x4e8] ss:$16 sps:$4 sm:$0xff]   ;;  %v6411_v54 = vld [vmem:[%s9380_s1 + $0x504] ss:$16 sps:$4 sm:$0xff]  }
  0x68   :  { %4159 = vmatprep.subr.bf16.mxu0 %v6327_v55  ;;  %4610 = vmatprep.subr.bf16.mxu1 %v6330_v56  ;;  %v6414_v55 = vld [vmem:[%s9380_s1 + $0x50c] ss:$16 sps:$4 sm:$0xff]   ;;  %v6409_v56 = vld [vmem:[%s9380_s1 + $0x500] ss:$16 sps:$4 sm:$0xff]  }
  0x6b   :  { %4160 = vmatpush1.bf16.msra.mxu0 %v6325_v57  ;;  %4611 = vmatpush1.bf16.msra.mxu1 %v6328_v58  ;;  %v6412_v57 = vld [vmem:[%s9380_s1 + $0x508] ss:$16 sps:$4 sm:$0xff]   ;;  %v6417_v58 = vld [vmem:[%s9380_s1 + $0x524] ss:$16 sps:$4 sm:$0xff]  }
  0x6c   :  { %4161 = vmatprep.subr.bf16.mxu0 %v6333_v59  ;;  %4612 = vmatprep.subr.bf16.mxu1 %v6336_v60  ;;  %v6420_v59 = vld [vmem:[%s9380_s1 + $0x52c] ss:$16 sps:$4 sm:$0xff]   ;;  %v6415_v60 = vld [vmem:[%s9380_s1 + $0x520] ss:$16 sps:$4 sm:$0xff]  }
  0x6f   :  { %4162 = vmatpush1.bf16.msra.mxu0 %v6331_v61  ;;  %4613 = vmatpush1.bf16.msra.mxu1 %v6334_v62  ;;  %v6418_v61 = vld [vmem:[%s9380_s1 + $0x528] ss:$16 sps:$4 sm:$0xff]   ;;  %v6423_v62 = vld [vmem:[%s9380_s1 + $0x544] ss:$16 sps:$4 sm:$0xff]  }
  0x70   :  { %4163 = vmatprep.subr.bf16.mxu0 %v6339_v63  ;;  %4614 = vmatprep.subr.bf16.mxu1 %v6342_v0  ;;  %v6426_v63 = vld [vmem:[%s9380_s1 + $0x54c] ss:$16 sps:$4 sm:$0xff]   ;;  %v6421_v0 = vld [vmem:[%s9380_s1 + $0x540] ss:$16 sps:$4 sm:$0xff]  }
  0x73   :  { %4164 = vmatpush1.bf16.msra.mxu0 %v6337_v1  ;;  %4615 = vmatpush1.bf16.msra.mxu1 %v6340_v2  ;;  %v6424_v1 = vld [vmem:[%s9380_s1 + $0x548] ss:$16 sps:$4 sm:$0xff]   ;;  %v6429_v2 = vld [vmem:[%s9380_s1 + $0x564] ss:$16 sps:$4 sm:$0xff]  }
  0x74   :  { %4165 = vmatprep.subr.bf16.mxu0 %v6345_v3  ;;  %4616 = vmatprep.subr.bf16.mxu1 %v6348_v4  ;;  %v6432_v3 = vld [vmem:[%s9380_s1 + $0x56c] ss:$16 sps:$4 sm:$0xff]   ;;  %v6427_v4 = vld [vmem:[%s9380_s1 + $0x560] ss:$16 sps:$4 sm:$0xff]  }
  0x77   :  { %4166 = vmatpush1.bf16.msra.mxu0 %v6343_v5  ;;  %4617 = vmatpush1.bf16.msra.mxu1 %v6346_v6  ;;  %v6430_v5 = vld [vmem:[%s9380_s1 + $0x568] ss:$16 sps:$4 sm:$0xff]   ;;  %v6435_v6 = vld [vmem:[%s9380_s1 + $0x584] ss:$16 sps:$4 sm:$0xff]  }
  0x78   :  { %4167 = vmatprep.subr.bf16.mxu0 %v6351_v7  ;;  %4618 = vmatprep.subr.bf16.mxu1 %v6354_v8  ;;  %v6438_v7 = vld [vmem:[%s9380_s1 + $0x58c] ss:$16 sps:$4 sm:$0xff]   ;;  %v6433_v8 = vld [vmem:[%s9380_s1 + $0x580] ss:$16 sps:$4 sm:$0xff]  }
  0x7b   :  { %4168 = vmatpush1.bf16.msra.mxu0 %v6349_v10  ;;  %4619 = vmatpush1.bf16.msra.mxu1 %v6352_v11  ;;  %v6441_v10 = vld [vmem:[%s9380_s1 + $0x5a4] ss:$16 sps:$4 sm:$0xff]   ;;  %v6444_v11 = vld [vmem:[%s9380_s1 + $0x5ac] ss:$16 sps:$4 sm:$0xff]  }
  0x7c   :  { %4169 = vmatprep.subr.bf16.mxu0 %v6357_v12  ;;  %4620 = vmatprep.subr.bf16.mxu1 %v6360_v52  ;;  %v6439_v12 = vld [vmem:[%s9380_s1 + $0x5a0] ss:$16 sps:$4 sm:$0xff]   ;;  %v6442_v52 = vld [vmem:[%s9380_s1 + $0x5a8] ss:$16 sps:$4 sm:$0xff]  }
  0x7f   :  { %4170 = vmatpush1.bf16.msra.mxu0 %v6355_v15  ;;  %4621 = vmatpush1.bf16.msra.mxu1 %v6358_v16  ;;  %v6447_v15 = vld [vmem:[%s9380_s1 + $0x5c4] ss:$16 sps:$4 sm:$0xff]   ;;  %v6450_v16 = vld [vmem:[%s9380_s1 + $0x5cc] ss:$16 sps:$4 sm:$0xff]  }
  0x80   :  { %4180 = vmatprep.subr.bf16.mxu0 %v6363_v17  ;;  %4631 = vmatprep.subr.bf16.mxu1 %v6366_v18  ;;  %v6445_v17 = vld [vmem:[%s9380_s1 + $0x5c0] ss:$16 sps:$4 sm:$0xff]   ;;  %v6448_v18 = vld [vmem:[%s9380_s1 + $0x5c8] ss:$16 sps:$4 sm:$0xff]  }
  0x82   :  { %4172 = vmatmul.mubr.bf16.vlgmr.msra.gmra.mrb[0].mxu0 %v742_v21  ;;  %4623 = vmatmul.mubr.bf16.vlgmr.msra.gmra.mrb[0].mxu1 %v742_v21  ;;  %v6451_v21 = vld [vmem:[%s9380_s1 + $0x5e0] ss:$16 sps:$4 sm:$0xff]  }
  0x83   :  { %4181 = vmatpush1.bf16.msra.mxu0 %v6361_v20  ;;  %4632 = vmatpush1.bf16.msra.mxu1 %v6364_v22  ;;  %v6456_v20 = vld [vmem:[%s9380_s1 + $0x5ec] ss:$16 sps:$4 sm:$0xff]   ;;  %v6454_v22 = vld [vmem:[%s9380_s1 + $0x5e8] ss:$16 sps:$4 sm:$0xff]  }
  0x84   :  { %4182 = vmatprep.subr.bf16.mxu0 %v6369_v23  ;;  %4633 = vmatprep.subr.bf16.mxu1 %v6372_v24  ;;  %v6460_v23 = vld [vmem:[%s9380_s1 + $0x604] ss:$16 sps:$4 sm:$0xff]   ;;  %v6463_v24 = vld [vmem:[%s9380_s1 + $0x60c] ss:$16 sps:$4 sm:$0xff]  }
  0x85   :  { %4212 = vmatprep.mubr.bf16.mxu0 %v7640_v25  ;;  %4663 = vmatprep.mubr.bf16.mxu1 %v7640_v25 }
  0x87   :  { %4183 = vmatpush1.bf16.msra.mxu0 %v6367_v13  ;;  %4634 = vmatpush1.bf16.msra.mxu1 %v6370_v26  ;;  %v6458_v13 = vld [vmem:[%s9380_s1 + $0x600] ss:$16 sps:$4 sm:$0xff]   ;;  %v7829_v26 = vrot.slane %v7609_v14, %v7345_v49  ;;  %v745_v14 = vcombine.high %v7640_v25, %v7640_v25  ;;  %v6472_v25 = vld [vmem:[%s9380_s1 + $0x644] ss:$16 sps:$4 sm:$0xff]  }
  0x88   :  { %4184 = vmatprep.subr.bf16.mxu0 %v6375_v27  ;;  %4635 = vmatprep.subr.bf16.mxu1 %v6378_v28  ;;  %v6461_v27 = vld [vmem:[%s9380_s1 + $0x608] ss:$16 sps:$4 sm:$0xff]   ;;  %v6466_v28 = vld [vmem:[%s9380_s1 + $0x624] ss:$16 sps:$4 sm:$0xff]  }
  0x8b   :  { %4185 = vmatpush1.bf16.msra.mxu0 %v6373_v29  ;;  %4636 = vmatpush1.bf16.msra.mxu1 %v6376_v30  ;;  %v6469_v29 = vld [vmem:[%s9380_s1 + $0x62c] ss:$16 sps:$4 sm:$0xff]   ;;  %v6464_v30 = vld [vmem:[%s9380_s1 + $0x620] ss:$16 sps:$4 sm:$0xff]  }
  0x8c   :  { %4186 = vmatprep.subr.bf16.mxu0 %v6381_v31  ;;  %4637 = vmatprep.subr.bf16.mxu1 %v6384_v32  ;;  %v6467_v31 = vld [vmem:[%s9380_s1 + $0x628] ss:$16 sps:$4 sm:$0xff]   ;;  %v6475_v32 = vld [vmem:[%s9380_s1 + $0x64c] ss:$16 sps:$4 sm:$0xff]  }
  0x8f   :  { %4187 = vmatpush1.bf16.msra.mxu0 %v6379_v33  ;;  %4638 = vmatpush1.bf16.msra.mxu1 %v6382_v34  ;;  %v6470_v33 = vld [vmem:[%s9380_s1 + $0x640] ss:$16 sps:$4 sm:$0xff]   ;;  %v6473_v34 = vld [vmem:[%s9380_s1 + $0x648] ss:$16 sps:$4 sm:$0xff]  }
  0x90   :  { %4188 = vmatprep.subr.bf16.mxu0 %v6387_v35  ;;  %4639 = vmatprep.subr.bf16.mxu1 %v6390_v36  ;;  %v6478_v35 = vld [vmem:[%s9380_s1 + $0x664] ss:$16 sps:$4 sm:$0xff]   ;;  %v6481_v36 = vld [vmem:[%s9380_s1 + $0x66c] ss:$16 sps:$4 sm:$0xff]  }
  0x93   :  { %4189 = vmatpush1.bf16.msra.mxu0 %v6385_v37  ;;  %4640 = vmatpush1.bf16.msra.mxu1 %v6388_v38  ;;  %v6476_v37 = vld [vmem:[%s9380_s1 + $0x660] ss:$16 sps:$4 sm:$0xff]   ;;  %v6479_v38 = vld [vmem:[%s9380_s1 + $0x668] ss:$16 sps:$4 sm:$0xff]  }
  0x94   :  { %4190 = vmatprep.subr.bf16.mxu0 %v6393_v39  ;;  %4641 = vmatprep.subr.bf16.mxu1 %v6396_v40  ;;  %v6484_v39 = vld [vmem:[%s9380_s1 + $0x684] ss:$16 sps:$4 sm:$0xff]   ;;  %v6487_v40 = vld [vmem:[%s9380_s1 + $0x68c] ss:$16 sps:$4 sm:$0xff]  }
  0x97   :  { %4191 = vmatpush1.bf16.msra.mxu0 %v6391_v41  ;;  %4642 = vmatpush1.bf16.msra.mxu1 %v6394_v43  ;;  %v6482_v41 = vld [vmem:[%s9380_s1 + $0x680] ss:$16 sps:$4 sm:$0xff]   ;;  %v6485_v43 = vld [vmem:[%s9380_s1 + $0x688] ss:$16 sps:$4 sm:$0xff]  }
  0x98   :  { %4192 = vmatprep.subr.bf16.mxu0 %v6399_v44  ;;  %4643 = vmatprep.subr.bf16.mxu1 %v6402_v45  ;;  %v6490_v44 = vld [vmem:[%s9380_s1 + $0x6a4] ss:$16 sps:$4 sm:$0xff]   ;;  %v6493_v45 = vld [vmem:[%s9380_s1 + $0x6ac] ss:$16 sps:$4 sm:$0xff]  }
  0x9b   :  { %4193 = vmatpush1.bf16.msra.mxu0 %v6397_v46  ;;  %4644 = vmatpush1.bf16.msra.mxu1 %v6400_v47  ;;  %v6488_v46 = vld [vmem:[%s9380_s1 + $0x6a0] ss:$16 sps:$4 sm:$0xff]   ;;  %v6491_v47 = vld [vmem:[%s9380_s1 + $0x6a8] ss:$16 sps:$4 sm:$0xff]  }
  0x9c   :  { %4194 = vmatprep.subr.bf16.mxu0 %v6405_v48  ;;  %4645 = vmatprep.subr.bf16.mxu1 %v6408_v50  ;;  %v6496_v48 = vld [vmem:[%s9380_s1 + $0x6c4] ss:$16 sps:$4 sm:$0xff]   ;;  %v6499_v50 = vld [vmem:[%s9380_s1 + $0x6cc] ss:$16 sps:$4 sm:$0xff]  }
  0x9f   :  { %4195 = vmatpush1.bf16.msra.mxu0 %v6403_v51  ;;  %4646 = vmatpush1.bf16.msra.mxu1 %v6406_v53  ;;  %v6494_v51 = vld [vmem:[%s9380_s1 + $0x6c0] ss:$16 sps:$4 sm:$0xff]   ;;  %v6497_v53 = vld [vmem:[%s9380_s1 + $0x6c8] ss:$16 sps:$4 sm:$0xff]  }
  0xa0   :  { %4196 = vmatprep.subr.bf16.mxu0 %v6411_v54  ;;  %4647 = vmatprep.subr.bf16.mxu1 %v6414_v55  ;;  %v6502_v54 = vld [vmem:[%s9380_s1 + $0x6e4] ss:$16 sps:$4 sm:$0xff]   ;;  %v6505_v55 = vld [vmem:[%s9380_s1 + $0x6ec] ss:$16 sps:$4 sm:$0xff]  }
  0xa3   :  { %4197 = vmatpush1.bf16.msra.mxu0 %v6409_v56  ;;  %4648 = vmatpush1.bf16.msra.mxu1 %v6412_v57  ;;  %v6500_v56 = vld [vmem:[%s9380_s1 + $0x6e0] ss:$16 sps:$4 sm:$0xff]   ;;  %v6503_v57 = vld [vmem:[%s9380_s1 + $0x6e8] ss:$16 sps:$4 sm:$0xff]  }
  0xa4   :  { %4198 = vmatprep.subr.bf16.mxu0 %v6417_v58  ;;  %4649 = vmatprep.subr.bf16.mxu1 %v6420_v59  ;;  %v6508_v58 = vld [vmem:[%s9380_s1 + $0x704] ss:$16 sps:$4 sm:$0xff]   ;;  %v6511_v59 = vld [vmem:[%s9380_s1 + $0x70c] ss:$16 sps:$4 sm:$0xff]  }
  0xa7   :  { %4199 = vmatpush1.bf16.msra.mxu0 %v6415_v60  ;;  %4650 = vmatpush1.bf16.msra.mxu1 %v6418_v61  ;;  %v6506_v60 = vld [vmem:[%s9380_s1 + $0x700] ss:$16 sps:$4 sm:$0xff]   ;;  %v6509_v61 = vld [vmem:[%s9380_s1 + $0x708] ss:$16 sps:$4 sm:$0xff]  }
  0xa8   :  { %4200 = vmatprep.subr.bf16.mxu0 %v6423_v62  ;;  %4651 = vmatprep.subr.bf16.mxu1 %v6426_v63  ;;  %v6514_v62 = vld [vmem:[%s9380_s1 + $0x724] ss:$16 sps:$4 sm:$0xff]   ;;  %v6517_v63 = vld [vmem:[%s9380_s1 + $0x72c] ss:$16 sps:$4 sm:$0xff]  }
  0xab   :  { %4201 = vmatpush1.bf16.msra.mxu0 %v6421_v0  ;;  %4652 = vmatpush1.bf16.msra.mxu1 %v6424_v1  ;;  %v6512_v0 = vld [vmem:[%s9380_s1 + $0x720] ss:$16 sps:$4 sm:$0xff]   ;;  %v6515_v1 = vld [vmem:[%s9380_s1 + $0x728] ss:$16 sps:$4 sm:$0xff]  }
  0xac   :  { %4202 = vmatprep.subr.bf16.mxu0 %v6429_v2  ;;  %4653 = vmatprep.subr.bf16.mxu1 %v6432_v3  ;;  %v6520_v2 = vld [vmem:[%s9380_s1 + $0x744] ss:$16 sps:$4 sm:$0xff]   ;;  %v6523_v3 = vld [vmem:[%s9380_s1 + $0x74c] ss:$16 sps:$4 sm:$0xff]  }
  0xaf   :  { %4203 = vmatpush1.bf16.msra.mxu0 %v6427_v4  ;;  %4654 = vmatpush1.bf16.msra.mxu1 %v6430_v5  ;;  %v6518_v4 = vld [vmem:[%s9380_s1 + $0x740] ss:$16 sps:$4 sm:$0xff]   ;;  %v6521_v5 = vld [vmem:[%s9380_s1 + $0x748] ss:$16 sps:$4 sm:$0xff]  }
  0xb0   :  { %4204 = vmatprep.subr.bf16.mxu0 %v6435_v6  ;;  %4655 = vmatprep.subr.bf16.mxu1 %v6438_v7  ;;  %v6526_v6 = vld [vmem:[%s9380_s1 + $0x764] ss:$16 sps:$4 sm:$0xff]   ;;  %v6529_v7 = vld [vmem:[%s9380_s1 + $0x76c] ss:$16 sps:$4 sm:$0xff]  }
  0xb3   :  { %4205 = vmatpush1.bf16.msra.mxu0 %v6433_v8  ;;  %4656 = vmatpush1.bf16.msra.mxu1 %v6436_v9  ;;  %v6524_v8 = vld [vmem:[%s9380_s1 + $0x760] ss:$16 sps:$4 sm:$0xff]   ;;  %v6527_v9 = vld [vmem:[%s9380_s1 + $0x768] ss:$16 sps:$4 sm:$0xff]  }
  0xb4   :  { %4206 = vmatprep.subr.bf16.mxu0 %v6441_v10  ;;  %4657 = vmatprep.subr.bf16.mxu1 %v6444_v11  ;;  %v6532_v10 = vld [vmem:[%s9380_s1 + $0x784] ss:$16 sps:$4 sm:$0xff]   ;;  %v6535_v11 = vld [vmem:[%s9380_s1 + $0x78c] ss:$16 sps:$4 sm:$0xff]  }
  0xb7   :  { %4207 = vmatpush1.bf16.msra.mxu0 %v6439_v12  ;;  %4658 = vmatpush1.bf16.msra.mxu1 %v6442_v52  ;;  %v6530_v12 = vld [vmem:[%s9380_s1 + $0x780] ss:$16 sps:$4 sm:$0xff]   ;;  %v6533_v52 = vld [vmem:[%s9380_s1 + $0x788] ss:$16 sps:$4 sm:$0xff]  }
  0xb8   :  { %4208 = vmatprep.subr.bf16.mxu0 %v6447_v15  ;;  %4659 = vmatprep.subr.bf16.mxu1 %v6450_v16  ;;  %v6538_v15 = vld [vmem:[%s9380_s1 + $0x7a4] ss:$16 sps:$4 sm:$0xff]   ;;  %v6541_v16 = vld [vmem:[%s9380_s1 + $0x7ac] ss:$16 sps:$4 sm:$0xff]  }
  0xbb   :  { %4209 = vmatpush1.bf16.msra.mxu0 %v6445_v17  ;;  %4660 = vmatpush1.bf16.msra.mxu1 %v6448_v18  ;;  %v6536_v17 = vld [vmem:[%s9380_s1 + $0x7a0] ss:$16 sps:$4 sm:$0xff]   ;;  %v6539_v18 = vld [vmem:[%s9380_s1 + $0x7a8] ss:$16 sps:$4 sm:$0xff]  }
  0xbc   :  { %4210 = vmatprep.subr.bf16.mxu0 %v6453_v19  ;;  %4661 = vmatprep.subr.bf16.mxu1 %v6456_v20  ;;  %v6544_v19 = vld [vmem:[%s9380_s1 + $0x7c4] ss:$16 sps:$4 sm:$0xff]   ;;  %v6547_v20 = vld [vmem:[%s9380_s1 + $0x7cc] ss:$16 sps:$4 sm:$0xff]  }
  0xbf   :  { %4211 = vmatpush1.bf16.msra.mxu0 %v6451_v21  ;;  %4662 = vmatpush1.bf16.msra.mxu1 %v6454_v22  ;;  %v8003_v21 = vld.sshfl [vmem:[%s9381_s0 + $0x8] sm:$0xff pattern:$0x75316420]  ;;  %v6542_v22 = vld [vmem:[%s9380_s1 + $0x7c0] ss:$16 sps:$4 sm:$0xff]  }
  0xc0   :  { %4221 = vmatprep.subr.bf16.mxu0 %v6460_v23  ;;  %4672 = vmatprep.subr.bf16.mxu1 %v6463_v24  ;;  %v6545_v23 = vld [vmem:[%s9380_s1 + $0x7c8] ss:$16 sps:$4 sm:$0xff]   ;;  %v6550_v24 = vld [vmem:[%s9380_s1 + $0x7e4] ss:$16 sps:$4 sm:$0xff]  }
  0xc2   :  { %4213 = vmatmul.mubr.bf16.vlgmr.msra.gmra.mrb[0].mxu0 %v7829_v26  ;;  %4664 = vmatmul.mubr.bf16.vlgmr.msra.gmra.mrb[0].mxu1 %v7829_v26 }
  0xc3   :  { %4222 = vmatpush1.bf16.msra.mxu0 %v6458_v13  ;;  %4673 = vmatpush1.bf16.msra.mxu1 %v6461_v27  ;;  %v6553_v13 = vld [vmem:[%s9380_s1 + $0x7ec] ss:$16 sps:$4 sm:$0xff]   ;;  %v6548_v27 = vld [vmem:[%s9380_s1 + $0x7e0] ss:$16 sps:$4 sm:$0xff]  }
  0xc4   :  { %4223 = vmatprep.subr.bf16.mxu0 %v6466_v28  ;;  %4674 = vmatprep.subr.bf16.mxu1 %v6469_v29  ;;  %v6551_v28 = vld [vmem:[%s9380_s1 + $0x7e8] ss:$16 sps:$4 sm:$0xff]   ;;  %v6556_v29 = vld [vmem:[%s9380_s1 + $0x804] ss:$16 sps:$4 sm:$0xff]  }
  0xc5   :  { %4253 = vmatprep.mubr.bf16.mxu0 %v745_v14  ;;  %4704 = vmatprep.mubr.bf16.mxu1 %v745_v14  ;;  %v6559_v14 = vld [vmem:[%s9380_s1 + $0x80c] ss:$16 sps:$4 sm:$0xff]  }
  0xc7   :  { %4224 = vmatpush1.bf16.msra.mxu0 %v6464_v30  ;;  %4675 = vmatpush1.bf16.msra.mxu1 %v6467_v31  ;;  %v761_v30 = vcombine.high %v8003_v21, %v8003_v21  ;;  %v743_v31 = vcombine.high %v7829_v26, %v7829_v26  ;;  %v6565_v26 = vld [vmem:[%s9380_s1 + $0x82c] ss:$16 sps:$4 sm:$0xff]  }
  0xc8   :  { %4225 = vmatprep.subr.bf16.mxu0 %v6472_v25  ;;  %4676 = vmatprep.subr.bf16.mxu1 %v6475_v32  ;;  %v6554_v25 = vld [vmem:[%s9380_s1 + $0x800] ss:$16 sps:$4 sm:$0xff]   ;;  %v6557_v32 = vld [vmem:[%s9380_s1 + $0x808] ss:$16 sps:$4 sm:$0xff]  }
  0xcb   :  { %4226 = vmatpush1.bf16.msra.mxu0 %v6470_v33  ;;  %4677 = vmatpush1.bf16.msra.mxu1 %v6473_v34  ;;  %v6562_v33 = vld [vmem:[%s9380_s1 + $0x824] ss:$16 sps:$4 sm:$0xff]   ;;  %v8046_v34 = vrot.slane %v761_v30, %v7345_v49 }
  0xcc   :  { %4227 = vmatprep.subr.bf16.mxu0 %v6478_v35  ;;  %4678 = vmatprep.subr.bf16.mxu1 %v6481_v36  ;;  %v6560_v35 = vld [vmem:[%s9380_s1 + $0x820] ss:$16 sps:$4 sm:$0xff]   ;;  %v6563_v36 = vld [vmem:[%s9380_s1 + $0x828] ss:$16 sps:$4 sm:$0xff]   ;;  %v6646_v30 = vld [vmem:[%s9380_s1 + $0x9e4] ss:$16 sps:$4 sm:$0xff]  }
  0xcf   :  { %4228 = vmatpush1.bf16.msra.mxu0 %v6476_v37  ;;  %4679 = vmatpush1.bf16.msra.mxu1 %v6479_v38  ;;  %v6568_v37 = vld [vmem:[%s9380_s1 + $0x844] ss:$16 sps:$4 sm:$0xff]   ;;  %v6571_v38 = vld [vmem:[%s9380_s1 + $0x84c] ss:$16 sps:$4 sm:$0xff]  }
  0xd0   :  { %4229 = vmatprep.subr.bf16.mxu0 %v6484_v39  ;;  %4680 = vmatprep.subr.bf16.mxu1 %v6487_v40  ;;  %v6566_v39 = vld [vmem:[%s9380_s1 + $0x840] ss:$16 sps:$4 sm:$0xff]   ;;  %v6569_v40 = vld [vmem:[%s9380_s1 + $0x848] ss:$16 sps:$4 sm:$0xff]  }
  0xd3   :  { %4230 = vmatpush1.bf16.msra.mxu0 %v6482_v41  ;;  %4681 = vmatpush1.bf16.msra.mxu1 %v6485_v43  ;;  %v6574_v41 = vld [vmem:[%s9380_s1 + $0x864] ss:$16 sps:$4 sm:$0xff]   ;;  %v6577_v43 = vld [vmem:[%s9380_s1 + $0x86c] ss:$16 sps:$4 sm:$0xff]  }
  0xd4   :  { %4231 = vmatprep.subr.bf16.mxu0 %v6490_v44  ;;  %4682 = vmatprep.subr.bf16.mxu1 %v6493_v45  ;;  %v6572_v44 = vld [vmem:[%s9380_s1 + $0x860] ss:$16 sps:$4 sm:$0xff]   ;;  %v6575_v45 = vld [vmem:[%s9380_s1 + $0x868] ss:$16 sps:$4 sm:$0xff]  }
  0xd7   :  { %4232 = vmatpush1.bf16.msra.mxu0 %v6488_v46  ;;  %4683 = vmatpush1.bf16.msra.mxu1 %v6491_v47  ;;  %v6580_v46 = vld [vmem:[%s9380_s1 + $0x884] ss:$16 sps:$4 sm:$0xff]   ;;  %v6583_v47 = vld [vmem:[%s9380_s1 + $0x88c] ss:$16 sps:$4 sm:$0xff]  }
  0xd8   :  { %4233 = vmatprep.subr.bf16.mxu0 %v6496_v48  ;;  %4684 = vmatprep.subr.bf16.mxu1 %v6499_v50  ;;  %v6578_v48 = vld [vmem:[%s9380_s1 + $0x880] ss:$16 sps:$4 sm:$0xff]   ;;  %v6581_v50 = vld [vmem:[%s9380_s1 + $0x888] ss:$16 sps:$4 sm:$0xff]  }
  0xdb   :  { %4234 = vmatpush1.bf16.msra.mxu0 %v6494_v51  ;;  %4685 = vmatpush1.bf16.msra.mxu1 %v6497_v53  ;;  %v6586_v51 = vld [vmem:[%s9380_s1 + $0x8a4] ss:$16 sps:$4 sm:$0xff]   ;;  %v6589_v53 = vld [vmem:[%s9380_s1 + $0x8ac] ss:$16 sps:$4 sm:$0xff]  }
  0xdc   :  { %4235 = vmatprep.subr.bf16.mxu0 %v6502_v54  ;;  %4686 = vmatprep.subr.bf16.mxu1 %v6505_v55  ;;  %v6584_v54 = vld [vmem:[%s9380_s1 + $0x8a0] ss:$16 sps:$4 sm:$0xff]   ;;  %v6587_v55 = vld [vmem:[%s9380_s1 + $0x8a8] ss:$16 sps:$4 sm:$0xff]  }
  0xdf   :  { %4236 = vmatpush1.bf16.msra.mxu0 %v6500_v56  ;;  %4687 = vmatpush1.bf16.msra.mxu1 %v6503_v57  ;;  %v6592_v56 = vld [vmem:[%s9380_s1 + $0x8c4] ss:$16 sps:$4 sm:$0xff]   ;;  %v6595_v57 = vld [vmem:[%s9380_s1 + $0x8cc] ss:$16 sps:$4 sm:$0xff]  }
  0xe0   :  { %4237 = vmatprep.subr.bf16.mxu0 %v6508_v58  ;;  %4688 = vmatprep.subr.bf16.mxu1 %v6511_v59  ;;  %v6590_v58 = vld [vmem:[%s9380_s1 + $0x8c0] ss:$16 sps:$4 sm:$0xff]   ;;  %v6593_v59 = vld [vmem:[%s9380_s1 + $0x8c8] ss:$16 sps:$4 sm:$0xff]  }
  0xe3   :  { %4238 = vmatpush1.bf16.msra.mxu0 %v6506_v60  ;;  %4689 = vmatpush1.bf16.msra.mxu1 %v6509_v61  ;;  %v6598_v60 = vld [vmem:[%s9380_s1 + $0x8e4] ss:$16 sps:$4 sm:$0xff]   ;;  %v6601_v61 = vld [vmem:[%s9380_s1 + $0x8ec] ss:$16 sps:$4 sm:$0xff]  }
  0xe4   :  { %4239 = vmatprep.subr.bf16.mxu0 %v6514_v62  ;;  %4690 = vmatprep.subr.bf16.mxu1 %v6517_v63  ;;  %v6596_v62 = vld [vmem:[%s9380_s1 + $0x8e0] ss:$16 sps:$4 sm:$0xff]   ;;  %v6599_v63 = vld [vmem:[%s9380_s1 + $0x8e8] ss:$16 sps:$4 sm:$0xff]  }
  0xe7   :  { %4240 = vmatpush1.bf16.msra.mxu0 %v6512_v0  ;;  %4691 = vmatpush1.bf16.msra.mxu1 %v6515_v1  ;;  %v6604_v0 = vld [vmem:[%s9380_s1 + $0x904] ss:$16 sps:$4 sm:$0xff]   ;;  %v6607_v1 = vld [vmem:[%s9380_s1 + $0x90c] ss:$16 sps:$4 sm:$0xff]  }
  0xe8   :  { %4241 = vmatprep.subr.bf16.mxu0 %v6520_v2  ;;  %4692 = vmatprep.subr.bf16.mxu1 %v6523_v3  ;;  %v6602_v2 = vld [vmem:[%s9380_s1 + $0x900] ss:$16 sps:$4 sm:$0xff]   ;;  %v6605_v3 = vld [vmem:[%s9380_s1 + $0x908] ss:$16 sps:$4 sm:$0xff]  }
  0xeb   :  { %4242 = vmatpush1.bf16.msra.mxu0 %v6518_v4  ;;  %4693 = vmatpush1.bf16.msra.mxu1 %v6521_v5  ;;  %v6610_v4 = vld [vmem:[%s9380_s1 + $0x924] ss:$16 sps:$4 sm:$0xff]   ;;  %v6613_v5 = vld [vmem:[%s9380_s1 + $0x92c] ss:$16 sps:$4 sm:$0xff]  }
  0xec   :  { %4243 = vmatprep.subr.bf16.mxu0 %v6526_v6  ;;  %4694 = vmatprep.subr.bf16.mxu1 %v6529_v7  ;;  %v6608_v6 = vld [vmem:[%s9380_s1 + $0x920] ss:$16 sps:$4 sm:$0xff]   ;;  %v6611_v7 = vld [vmem:[%s9380_s1 + $0x928] ss:$16 sps:$4 sm:$0xff]  }
  0xef   :  { %4244 = vmatpush1.bf16.msra.mxu0 %v6524_v8  ;;  %4695 = vmatpush1.bf16.msra.mxu1 %v6527_v9  ;;  %v6616_v8 = vld [vmem:[%s9380_s1 + $0x944] ss:$16 sps:$4 sm:$0xff]   ;;  %v6619_v9 = vld [vmem:[%s9380_s1 + $0x94c] ss:$16 sps:$4 sm:$0xff]  }
  0xf0   :  { %4245 = vmatprep.subr.bf16.mxu0 %v6532_v10  ;;  %4696 = vmatprep.subr.bf16.mxu1 %v6535_v11  ;;  %v6614_v10 = vld [vmem:[%s9380_s1 + $0x940] ss:$16 sps:$4 sm:$0xff]   ;;  %v6617_v11 = vld [vmem:[%s9380_s1 + $0x948] ss:$16 sps:$4 sm:$0xff]  }
  0xf3   :  { %4246 = vmatpush1.bf16.msra.mxu0 %v6530_v12  ;;  %4697 = vmatpush1.bf16.msra.mxu1 %v6533_v52  ;;  %v6622_v12 = vld [vmem:[%s9380_s1 + $0x964] ss:$16 sps:$4 sm:$0xff]   ;;  %v6625_v52 = vld [vmem:[%s9380_s1 + $0x96c] ss:$16 sps:$4 sm:$0xff]  }
  0xf4   :  { %4247 = vmatprep.subr.bf16.mxu0 %v6538_v15  ;;  %4698 = vmatprep.subr.bf16.mxu1 %v6541_v16  ;;  %v6620_v15 = vld [vmem:[%s9380_s1 + $0x960] ss:$16 sps:$4 sm:$0xff]   ;;  %v6623_v16 = vld [vmem:[%s9380_s1 + $0x968] ss:$16 sps:$4 sm:$0xff]  }
  0xf7   :  { %4248 = vmatpush1.bf16.msra.mxu0 %v6536_v17  ;;  %4699 = vmatpush1.bf16.msra.mxu1 %v6539_v18  ;;  %v6628_v17 = vld [vmem:[%s9380_s1 + $0x984] ss:$16 sps:$4 sm:$0xff]   ;;  %v6631_v18 = vld [vmem:[%s9380_s1 + $0x98c] ss:$16 sps:$4 sm:$0xff]  }
  0xf8   :  { %4249 = vmatprep.subr.bf16.mxu0 %v6544_v19  ;;  %4700 = vmatprep.subr.bf16.mxu1 %v6547_v20  ;;  %v6626_v19 = vld [vmem:[%s9380_s1 + $0x980] ss:$16 sps:$4 sm:$0xff]   ;;  %v6629_v20 = vld [vmem:[%s9380_s1 + $0x988] ss:$16 sps:$4 sm:$0xff]  }
  0xfb   :  { %4250 = vmatpush1.bf16.msra.mxu0 %v6542_v22  ;;  %4701 = vmatpush1.bf16.msra.mxu1 %v6545_v23  ;;  %v6634_v22 = vld [vmem:[%s9380_s1 + $0x9a4] ss:$16 sps:$4 sm:$0xff]   ;;  %v6637_v23 = vld [vmem:[%s9380_s1 + $0x9ac] ss:$16 sps:$4 sm:$0xff]  }
  0xfc   :  { %4251 = vmatprep.subr.bf16.mxu0 %v6550_v24  ;;  %4702 = vmatprep.subr.bf16.mxu1 %v6553_v13  ;;  %v6632_v24 = vld [vmem:[%s9380_s1 + $0x9a0] ss:$16 sps:$4 sm:$0xff]   ;;  %v6635_v13 = vld [vmem:[%s9380_s1 + $0x9a8] ss:$16 sps:$4 sm:$0xff]  }
  0xff   :  { %4252 = vmatpush1.bf16.msra.mxu0 %v6548_v27  ;;  %4703 = vmatpush1.bf16.msra.mxu1 %v6551_v28  ;;  %v6640_v27 = vld [vmem:[%s9380_s1 + $0x9c4] ss:$16 sps:$4 sm:$0xff]   ;;  %v6643_v28 = vld [vmem:[%s9380_s1 + $0x9cc] ss:$16 sps:$4 sm:$0xff]  }
 0x100   :  { %4262 = vmatprep.subr.bf16.mxu0 %v6556_v29  ;;  %4713 = vmatprep.subr.bf16.mxu1 %v6559_v14  ;;  %v6638_v29 = vld [vmem:[%s9380_s1 + $0x9c0] ss:$16 sps:$4 sm:$0xff]   ;;  %v6641_v14 = vld [vmem:[%s9380_s1 + $0x9c8] ss:$16 sps:$4 sm:$0xff]  }
 0x102   :  { %4254 = vmatmul.mubr.bf16.vlgmr.msra.gmra.mrb[0].mxu0 %v743_v31  ;;  %4705 = vmatmul.mubr.bf16.vlgmr.msra.gmra.mrb[0].mxu1 %v743_v31  ;;  %v6649_v31 = vld [vmem:[%s9380_s1 + $0x9ec] ss:$16 sps:$4 sm:$0xff]  }
 0x103   :  { %4263 = vmatpush1.bf16.msra.mxu0 %v6554_v25  ;;  %4714 = vmatpush1.bf16.msra.mxu1 %v6557_v32  ;;  %v6644_v25 = vld [vmem:[%s9380_s1 + $0x9e0] ss:$16 sps:$4 sm:$0xff]   ;;  %v6647_v32 = vld [vmem:[%s9380_s1 + $0x9e8] ss:$16 sps:$4 sm:$0xff]  }
 0x104   :  { %4264 = vmatprep.subr.bf16.mxu0 %v6562_v33  ;;  %4715 = vmatprep.subr.bf16.mxu1 %v6565_v26  ;;  %v6652_v33 = vld [vmem:[%s9380_s1 + $0xa04] ss:$16 sps:$4 sm:$0xff]   ;;  %v6655_v26 = vld [vmem:[%s9380_s1 + $0xa0c] ss:$16 sps:$4 sm:$0xff]  }
 0x105   :  { %4294 = vmatprep.mubr.bf16.mxu0 %v8046_v34  ;;  %4745 = vmatprep.mubr.bf16.mxu1 %v8046_v34 }
 0x107   :  { %4265 = vmatpush1.bf16.msra.mxu0 %v6560_v35  ;;  %4716 = vmatpush1.bf16.msra.mxu1 %v6563_v36  ;;  %v8232_v35 = vrot.slane %v8003_v21, %v7345_v49  ;;  %v6650_v36 = vld [vmem:[%s9380_s1 + $0xa00] ss:$16 sps:$4 sm:$0xff]   ;;  %v6661_v21 = vld [vmem:[%s9380_s1 + $0xa2c] ss:$16 sps:$4 sm:$0xff]  }
 0x108   :  { %4266 = vmatprep.subr.bf16.mxu0 %v6568_v37  ;;  %4717 = vmatprep.subr.bf16.mxu1 %v6571_v38  ;;  %v6653_v37 = vld [vmem:[%s9380_s1 + $0xa08] ss:$16 sps:$4 sm:$0xff]   ;;  %v6658_v38 = vld [vmem:[%s9380_s1 + $0xa24] ss:$16 sps:$4 sm:$0xff]  }
 0x10b   :  { %4267 = vmatpush1.bf16.msra.mxu0 %v6566_v39  ;;  %4718 = vmatpush1.bf16.msra.mxu1 %v6569_v40  ;;  %v793_v39 = vcombine.high %v8046_v34, %v8046_v34  ;;  %v6656_v40 = vld [vmem:[%s9380_s1 + $0xa20] ss:$16 sps:$4 sm:$0xff]   ;;  %v6664_v34 = vld [vmem:[%s9380_s1 + $0xa44] ss:$16 sps:$4 sm:$0xff]  }
 0x10c   :  { %4268 = vmatprep.subr.bf16.mxu0 %v6574_v41  ;;  %4719 = vmatprep.subr.bf16.mxu1 %v6577_v43  ;;  %v6659_v41 = vld [vmem:[%s9380_s1 + $0xa28] ss:$16 sps:$4 sm:$0xff]   ;;  %v6667_v43 = vld [vmem:[%s9380_s1 + $0xa4c] ss:$16 sps:$4 sm:$0xff]  }
 0x10f   :  { %4269 = vmatpush1.bf16.msra.mxu0 %v6572_v44  ;;  %4720 = vmatpush1.bf16.msra.mxu1 %v6575_v45  ;;  %v6662_v44 = vld [vmem:[%s9380_s1 + $0xa40] ss:$16 sps:$4 sm:$0xff]   ;;  %v6665_v45 = vld [vmem:[%s9380_s1 + $0xa48] ss:$16 sps:$4 sm:$0xff]  }
 0x110   :  { %4270 = vmatprep.subr.bf16.mxu0 %v6580_v46  ;;  %4721 = vmatprep.subr.bf16.mxu1 %v6583_v47  ;;  %v6670_v46 = vld [vmem:[%s9380_s1 + $0xa64] ss:$16 sps:$4 sm:$0xff]   ;;  %v6673_v47 = vld [vmem:[%s9380_s1 + $0xa6c] ss:$16 sps:$4 sm:$0xff]  }
 0x113   :  { %4271 = vmatpush1.bf16.msra.mxu0 %v6578_v48  ;;  %4722 = vmatpush1.bf16.msra.mxu1 %v6581_v50  ;;  %v6668_v48 = vld [vmem:[%s9380_s1 + $0xa60] ss:$16 sps:$4 sm:$0xff]   ;;  %v6671_v50 = vld [vmem:[%s9380_s1 + $0xa68] ss:$16 sps:$4 sm:$0xff]  }
 0x114   :  { %4272 = vmatprep.subr.bf16.mxu0 %v6586_v51  ;;  %4723 = vmatprep.subr.bf16.mxu1 %v6589_v53  ;;  %v6676_v51 = vld [vmem:[%s9380_s1 + $0xa84] ss:$16 sps:$4 sm:$0xff]   ;;  %v6679_v53 = vld [vmem:[%s9380_s1 + $0xa8c] ss:$16 sps:$4 sm:$0xff]  }
 0x117   :  { %4273 = vmatpush1.bf16.msra.mxu0 %v6584_v54  ;;  %4724 = vmatpush1.bf16.msra.mxu1 %v6587_v55  ;;  %v6674_v54 = vld [vmem:[%s9380_s1 + $0xa80] ss:$16 sps:$4 sm:$0xff]   ;;  %v6677_v55 = vld [vmem:[%s9380_s1 + $0xa88] ss:$16 sps:$4 sm:$0xff]  }
 0x118   :  { %4274 = vmatprep.subr.bf16.mxu0 %v6592_v56  ;;  %4725 = vmatprep.subr.bf16.mxu1 %v6595_v57  ;;  %v6682_v56 = vld [vmem:[%s9380_s1 + $0xaa4] ss:$16 sps:$4 sm:$0xff]   ;;  %v6685_v57 = vld [vmem:[%s9380_s1 + $0xaac] ss:$16 sps:$4 sm:$0xff]  }
 0x11b   :  { %4275 = vmatpush1.bf16.msra.mxu0 %v6590_v58  ;;  %4726 = vmatpush1.bf16.msra.mxu1 %v6593_v59  ;;  %v6680_v58 = vld [vmem:[%s9380_s1 + $0xaa0] ss:$16 sps:$4 sm:$0xff]   ;;  %v6683_v59 = vld [vmem:[%s9380_s1 + $0xaa8] ss:$16 sps:$4 sm:$0xff]  }
 0x11c   :  { %4276 = vmatprep.subr.bf16.mxu0 %v6598_v60  ;;  %4727 = vmatprep.subr.bf16.mxu1 %v6601_v61  ;;  %v6688_v60 = vld [vmem:[%s9380_s1 + $0xac4] ss:$16 sps:$4 sm:$0xff]   ;;  %v6691_v61 = vld [vmem:[%s9380_s1 + $0xacc] ss:$16 sps:$4 sm:$0xff]  }
 0x11f   :  { %4277 = vmatpush1.bf16.msra.mxu0 %v6596_v62  ;;  %4728 = vmatpush1.bf16.msra.mxu1 %v6599_v63  ;;  %v6686_v62 = vld [vmem:[%s9380_s1 + $0xac0] ss:$16 sps:$4 sm:$0xff]   ;;  %v6689_v63 = vld [vmem:[%s9380_s1 + $0xac8] ss:$16 sps:$4 sm:$0xff]  }
 0x120   :  { %4278 = vmatprep.subr.bf16.mxu0 %v6604_v0  ;;  %4729 = vmatprep.subr.bf16.mxu1 %v6607_v1  ;;  %v6694_v0 = vld [vmem:[%s9380_s1 + $0xae4] ss:$16 sps:$4 sm:$0xff]   ;;  %v6697_v1 = vld [vmem:[%s9380_s1 + $0xaec] ss:$16 sps:$4 sm:$0xff]  }
 0x123   :  { %4279 = vmatpush1.bf16.msra.mxu0 %v6602_v2  ;;  %4730 = vmatpush1.bf16.msra.mxu1 %v6605_v3  ;;  %v6692_v2 = vld [vmem:[%s9380_s1 + $0xae0] ss:$16 sps:$4 sm:$0xff]   ;;  %v6695_v3 = vld [vmem:[%s9380_s1 + $0xae8] ss:$16 sps:$4 sm:$0xff]  }
 0x124   :  { %4280 = vmatprep.subr.bf16.mxu0 %v6610_v4  ;;  %4731 = vmatprep.subr.bf16.mxu1 %v6613_v5  ;;  %v6700_v4 = vld [vmem:[%s9380_s1 + $0xb04] ss:$16 sps:$4 sm:$0xff]   ;;  %v6703_v5 = vld [vmem:[%s9380_s1 + $0xb0c] ss:$16 sps:$4 sm:$0xff]  }
 0x127   :  { %4281 = vmatpush1.bf16.msra.mxu0 %v6608_v6  ;;  %4732 = vmatpush1.bf16.msra.mxu1 %v6611_v7  ;;  %v6698_v6 = vld [vmem:[%s9380_s1 + $0xb00] ss:$16 sps:$4 sm:$0xff]   ;;  %v6701_v7 = vld [vmem:[%s9380_s1 + $0xb08] ss:$16 sps:$4 sm:$0xff]  }
 0x128   :  { %4282 = vmatprep.subr.bf16.mxu0 %v6616_v8  ;;  %4733 = vmatprep.subr.bf16.mxu1 %v6619_v9  ;;  %v6706_v8 = vld [vmem:[%s9380_s1 + $0xb24] ss:$16 sps:$4 sm:$0xff]   ;;  %v6709_v9 = vld [vmem:[%s9380_s1 + $0xb2c] ss:$16 sps:$4 sm:$0xff]  }
 0x12b   :  { %4283 = vmatpush1.bf16.msra.mxu0 %v6614_v10  ;;  %4734 = vmatpush1.bf16.msra.mxu1 %v6617_v11  ;;  %v6704_v10 = vld [vmem:[%s9380_s1 + $0xb20] ss:$16 sps:$4 sm:$0xff]   ;;  %v6707_v11 = vld [vmem:[%s9380_s1 + $0xb28] ss:$16 sps:$4 sm:$0xff]  }
 0x12c   :  { %4284 = vmatprep.subr.bf16.mxu0 %v6622_v12  ;;  %4735 = vmatprep.subr.bf16.mxu1 %v6625_v52  ;;  %v6712_v12 = vld [vmem:[%s9380_s1 + $0xb44] ss:$16 sps:$4 sm:$0xff]   ;;  %v6715_v52 = vld [vmem:[%s9380_s1 + $0xb4c] ss:$16 sps:$4 sm:$0xff]  }
 0x12f   :  { %4285 = vmatpush1.bf16.msra.mxu0 %v6620_v15  ;;  %4736 = vmatpush1.bf16.msra.mxu1 %v6623_v16  ;;  %v6710_v15 = vld [vmem:[%s9380_s1 + $0xb40] ss:$16 sps:$4 sm:$0xff]   ;;  %v6713_v16 = vld [vmem:[%s9380_s1 + $0xb48] ss:$16 sps:$4 sm:$0xff]  }
 0x130   :  { %4286 = vmatprep.subr.bf16.mxu0 %v6628_v17  ;;  %4737 = vmatprep.subr.bf16.mxu1 %v6631_v18  ;;  %v6718_v17 = vld [vmem:[%s9380_s1 + $0xb64] ss:$16 sps:$4 sm:$0xff]   ;;  %v6721_v18 = vld [vmem:[%s9380_s1 + $0xb6c] ss:$16 sps:$4 sm:$0xff]  }
 0x133   :  { %4287 = vmatpush1.bf16.msra.mxu0 %v6626_v19  ;;  %4738 = vmatpush1.bf16.msra.mxu1 %v6629_v20  ;;  %v6716_v19 = vld [vmem:[%s9380_s1 + $0xb60] ss:$16 sps:$4 sm:$0xff]   ;;  %v6719_v20 = vld [vmem:[%s9380_s1 + $0xb68] ss:$16 sps:$4 sm:$0xff]  }
 0x134   :  { %4288 = vmatprep.subr.bf16.mxu0 %v6634_v22  ;;  %4739 = vmatprep.subr.bf16.mxu1 %v6637_v23  ;;  %v6724_v22 = vld [vmem:[%s9380_s1 + $0xb84] ss:$16 sps:$4 sm:$0xff]   ;;  %v6727_v23 = vld [vmem:[%s9380_s1 + $0xb8c] ss:$16 sps:$4 sm:$0xff]  }
 0x137   :  { %4289 = vmatpush1.bf16.msra.mxu0 %v6632_v24  ;;  %4740 = vmatpush1.bf16.msra.mxu1 %v6635_v13  ;;  %v6722_v24 = vld [vmem:[%s9380_s1 + $0xb80] ss:$16 sps:$4 sm:$0xff]   ;;  %v6725_v13 = vld [vmem:[%s9380_s1 + $0xb88] ss:$16 sps:$4 sm:$0xff]  }
 0x138   :  { %4290 = vmatprep.subr.bf16.mxu0 %v6640_v27  ;;  %4741 = vmatprep.subr.bf16.mxu1 %v6643_v28  ;;  %v6730_v27 = vld [vmem:[%s9380_s1 + $0xba4] ss:$16 sps:$4 sm:$0xff]   ;;  %v6733_v28 = vld [vmem:[%s9380_s1 + $0xbac] ss:$16 sps:$4 sm:$0xff]  }
 0x13b   :  { %4291 = vmatpush1.bf16.msra.mxu0 %v6638_v29  ;;  %4742 = vmatpush1.bf16.msra.mxu1 %v6641_v14  ;;  %v6728_v29 = vld [vmem:[%s9380_s1 + $0xba0] ss:$16 sps:$4 sm:$0xff]   ;;  %v6731_v14 = vld [vmem:[%s9380_s1 + $0xba8] ss:$16 sps:$4 sm:$0xff]  }
 0x13c   :  { %4292 = vmatprep.subr.bf16.mxu0 %v6646_v30  ;;  %4743 = vmatprep.subr.bf16.mxu1 %v6649_v31  ;;  %v6736_v30 = vld [vmem:[%s9380_s1 + $0xbc4] ss:$16 sps:$4 sm:$0xff]   ;;  %v6739_v31 = vld [vmem:[%s9380_s1 + $0xbcc] ss:$16 sps:$4 sm:$0xff]  }
 0x13f   :  { %4293 = vmatpush1.bf16.msra.mxu0 %v6644_v25  ;;  %4744 = vmatpush1.bf16.msra.mxu1 %v6647_v32  ;;  %v7176_v25 = vld [vmem:[%s9381_s0 + $0x8] sm:$0xff] }
 0x140   :  { %4303 = vmatprep.subr.bf16.mxu0 %v6652_v33  ;;  %4754 = vmatprep.subr.bf16.mxu1 %v6655_v26  ;;  %v746_v32 = vcombine.high %v7176_v25, %v7176_v25  ;;  %v6734_v33 = vld [vmem:[%s9380_s1 + $0xbc0] ss:$16 sps:$4 sm:$0xff]   ;;  %v6737_v26 = vld [vmem:[%s9380_s1 + $0xbc8] ss:$16 sps:$4 sm:$0xff]  }
 0x141   :  { %v6818_v25 = vld [vmem:[%s9380_s1 + $0xd80] ss:$16 sps:$4 sm:$0xff]  }
 0x142   :  { %4295 = vmatmul.mubr.bf16.vlgmr.msra.gmra.mrb[0].mxu0 %v8232_v35  ;;  %4746 = vmatmul.mubr.bf16.vlgmr.msra.gmra.mrb[0].mxu1 %v8232_v35 }
 0x143   :  { %4304 = vmatpush1.bf16.msra.mxu0 %v6650_v36  ;;  %4755 = vmatpush1.bf16.msra.mxu1 %v6653_v37  ;;  %v6742_v36 = vld [vmem:[%s9380_s1 + $0xbe4] ss:$16 sps:$4 sm:$0xff]   ;;  %v6745_v37 = vld [vmem:[%s9380_s1 + $0xbec] ss:$16 sps:$4 sm:$0xff]  }
 0x144   :  { %4305 = vmatprep.subr.bf16.mxu0 %v6658_v38  ;;  %4756 = vmatprep.subr.bf16.mxu1 %v6661_v21  ;;  %v8422_v38 = vrot.slane %v746_v32, %v7345_v49  ;;  %v6740_v21 = vld [vmem:[%s9380_s1 + $0xbe0] ss:$16 sps:$4 sm:$0xff]   ;;  %v6821_v32 = vld [vmem:[%s9380_s1 + $0xd88] ss:$16 sps:$4 sm:$0xff]  }
 0x145   :  { %4335 = vmatprep.mubr.bf16.mxu0 %v793_v39  ;;  %4786 = vmatprep.mubr.bf16.mxu1 %v793_v39  ;;  %v6743_v39 = vld [vmem:[%s9380_s1 + $0xbe8] ss:$16 sps:$4 sm:$0xff]  }
 0x147   :  { %4306 = vmatpush1.bf16.msra.mxu0 %v6656_v40  ;;  %4757 = vmatpush1.bf16.msra.mxu1 %v6659_v41  ;;  %v6748_v40 = vld [vmem:[%s9380_s1 + $0xc04] ss:$16 sps:$4 sm:$0xff]   ;;  %v6751_v41 = vld [vmem:[%s9380_s1 + $0xc0c] ss:$16 sps:$4 sm:$0xff]  }
 0x148   :  { %4307 = vmatprep.subr.bf16.mxu0 %v6664_v34  ;;  %4758 = vmatprep.subr.bf16.mxu1 %v6667_v43  ;;  %v762_v34 = vcombine.high %v8422_v38, %v8422_v38  ;;  %v791_v43 = vcombine.high %v8232_v35, %v8232_v35  ;;  %v6757_v35 = vld [vmem:[%s9380_s1 + $0xc2c] ss:$16 sps:$4 sm:$0xff]  }
 0x14b   :  { %4308 = vmatpush1.bf16.msra.mxu0 %v6662_v44  ;;  %4759 = vmatpush1.bf16.msra.mxu1 %v6665_v45  ;;  %v6746_v44 = vld [vmem:[%s9380_s1 + $0xc00] ss:$16 sps:$4 sm:$0xff]   ;;  %v6749_v45 = vld [vmem:[%s9380_s1 + $0xc08] ss:$16 sps:$4 sm:$0xff]  }
 0x14c   :  { %4309 = vmatprep.subr.bf16.mxu0 %v6670_v46  ;;  %4760 = vmatprep.subr.bf16.mxu1 %v6673_v47  ;;  %v6754_v46 = vld [vmem:[%s9380_s1 + $0xc24] ss:$16 sps:$4 sm:$0xff]   ;;  %v8453_v47 = vrot.slane %v762_v34, %v7345_v49 }
 0x14d   :  { %v6838_v34 = vld [vmem:[%s9380_s1 + $0xde4] ss:$16 sps:$4 sm:$0xff]  }
 0x14f   :  { %4310 = vmatpush1.bf16.msra.mxu0 %v6668_v48  ;;  %4761 = vmatpush1.bf16.msra.mxu1 %v6671_v50  ;;  %v6752_v48 = vld [vmem:[%s9380_s1 + $0xc20] ss:$16 sps:$4 sm:$0xff]   ;;  %v6755_v50 = vld [vmem:[%s9380_s1 + $0xc28] ss:$16 sps:$4 sm:$0xff]  }
 0x150   :  { %4311 = vmatprep.subr.bf16.mxu0 %v6676_v51  ;;  %4762 = vmatprep.subr.bf16.mxu1 %v6679_v53  ;;  %v6760_v51 = vld [vmem:[%s9380_s1 + $0xc44] ss:$16 sps:$4 sm:$0xff]   ;;  %v6763_v53 = vld [vmem:[%s9380_s1 + $0xc4c] ss:$16 sps:$4 sm:$0xff]  }
 0x153   :  { %4312 = vmatpush1.bf16.msra.mxu0 %v6674_v54  ;;  %4763 = vmatpush1.bf16.msra.mxu1 %v6677_v55  ;;  %v6758_v54 = vld [vmem:[%s9380_s1 + $0xc40] ss:$16 sps:$4 sm:$0xff]   ;;  %v6761_v55 = vld [vmem:[%s9380_s1 + $0xc48] ss:$16 sps:$4 sm:$0xff]  }
 0x154   :  { %4313 = vmatprep.subr.bf16.mxu0 %v6682_v56  ;;  %4764 = vmatprep.subr.bf16.mxu1 %v6685_v57  ;;  %v6766_v56 = vld [vmem:[%s9380_s1 + $0xc64] ss:$16 sps:$4 sm:$0xff]   ;;  %v6769_v57 = vld [vmem:[%s9380_s1 + $0xc6c] ss:$16 sps:$4 sm:$0xff]  }
 0x157   :  { %4314 = vmatpush1.bf16.msra.mxu0 %v6680_v58  ;;  %4765 = vmatpush1.bf16.msra.mxu1 %v6683_v59  ;;  %v6764_v58 = vld [vmem:[%s9380_s1 + $0xc60] ss:$16 sps:$4 sm:$0xff]   ;;  %v6767_v59 = vld [vmem:[%s9380_s1 + $0xc68] ss:$16 sps:$4 sm:$0xff]  }
 0x158   :  { %4315 = vmatprep.subr.bf16.mxu0 %v6688_v60  ;;  %4766 = vmatprep.subr.bf16.mxu1 %v6691_v61  ;;  %v6772_v60 = vld [vmem:[%s9380_s1 + $0xc84] ss:$16 sps:$4 sm:$0xff]   ;;  %v6775_v61 = vld [vmem:[%s9380_s1 + $0xc8c] ss:$16 sps:$4 sm:$0xff]  }
 0x15b   :  { %4316 = vmatpush1.bf16.msra.mxu0 %v6686_v62  ;;  %4767 = vmatpush1.bf16.msra.mxu1 %v6689_v63  ;;  %v6770_v62 = vld [vmem:[%s9380_s1 + $0xc80] ss:$16 sps:$4 sm:$0xff]   ;;  %v6773_v63 = vld [vmem:[%s9380_s1 + $0xc88] ss:$16 sps:$4 sm:$0xff]  }
 0x15c   :  { %4317 = vmatprep.subr.bf16.mxu0 %v6694_v0  ;;  %4768 = vmatprep.subr.bf16.mxu1 %v6697_v1  ;;  %v6778_v0 = vld [vmem:[%s9380_s1 + $0xca4] ss:$16 sps:$4 sm:$0xff]   ;;  %v6781_v1 = vld [vmem:[%s9380_s1 + $0xcac] ss:$16 sps:$4 sm:$0xff]  }
 0x15f   :  { %4318 = vmatpush1.bf16.msra.mxu0 %v6692_v2  ;;  %4769 = vmatpush1.bf16.msra.mxu1 %v6695_v3  ;;  %v6776_v2 = vld [vmem:[%s9380_s1 + $0xca0] ss:$16 sps:$4 sm:$0xff]   ;;  %v6779_v3 = vld [vmem:[%s9380_s1 + $0xca8] ss:$16 sps:$4 sm:$0xff]  }
 0x160   :  { %4319 = vmatprep.subr.bf16.mxu0 %v6700_v4  ;;  %4770 = vmatprep.subr.bf16.mxu1 %v6703_v5  ;;  %v6784_v4 = vld [vmem:[%s9380_s1 + $0xcc4] ss:$16 sps:$4 sm:$0xff]   ;;  %v6787_v5 = vld [vmem:[%s9380_s1 + $0xccc] ss:$16 sps:$4 sm:$0xff]  }
 0x163   :  { %4320 = vmatpush1.bf16.msra.mxu0 %v6698_v6  ;;  %4771 = vmatpush1.bf16.msra.mxu1 %v6701_v7  ;;  %v6782_v6 = vld [vmem:[%s9380_s1 + $0xcc0] ss:$16 sps:$4 sm:$0xff]   ;;  %v6785_v7 = vld [vmem:[%s9380_s1 + $0xcc8] ss:$16 sps:$4 sm:$0xff]  }
 0x164   :  { %4321 = vmatprep.subr.bf16.mxu0 %v6706_v8  ;;  %4772 = vmatprep.subr.bf16.mxu1 %v6709_v9  ;;  %v6790_v8 = vld [vmem:[%s9380_s1 + $0xce4] ss:$16 sps:$4 sm:$0xff]   ;;  %v6793_v9 = vld [vmem:[%s9380_s1 + $0xcec] ss:$16 sps:$4 sm:$0xff]  }
 0x167   :  { %4322 = vmatpush1.bf16.msra.mxu0 %v6704_v10  ;;  %4773 = vmatpush1.bf16.msra.mxu1 %v6707_v11  ;;  %v6788_v10 = vld [vmem:[%s9380_s1 + $0xce0] ss:$16 sps:$4 sm:$0xff]   ;;  %v6791_v11 = vld [vmem:[%s9380_s1 + $0xce8] ss:$16 sps:$4 sm:$0xff]  }
 0x168   :  { %4323 = vmatprep.subr.bf16.mxu0 %v6712_v12  ;;  %4774 = vmatprep.subr.bf16.mxu1 %v6715_v52  ;;  %v6796_v12 = vld [vmem:[%s9380_s1 + $0xd04] ss:$16 sps:$4 sm:$0xff]   ;;  %v6799_v52 = vld [vmem:[%s9380_s1 + $0xd0c] ss:$16 sps:$4 sm:$0xff]  }
 0x16b   :  { %4324 = vmatpush1.bf16.msra.mxu0 %v6710_v15  ;;  %4775 = vmatpush1.bf16.msra.mxu1 %v6713_v16  ;;  %v6794_v15 = vld [vmem:[%s9380_s1 + $0xd00] ss:$16 sps:$4 sm:$0xff]   ;;  %v6797_v16 = vld [vmem:[%s9380_s1 + $0xd08] ss:$16 sps:$4 sm:$0xff]  }
 0x16c   :  { %4325 = vmatprep.subr.bf16.mxu0 %v6718_v17  ;;  %4776 = vmatprep.subr.bf16.mxu1 %v6721_v18  ;;  %v6802_v17 = vld [vmem:[%s9380_s1 + $0xd24] ss:$16 sps:$4 sm:$0xff]   ;;  %v6805_v18 = vld [vmem:[%s9380_s1 + $0xd2c] ss:$16 sps:$4 sm:$0xff]  }
 0x16f   :  { %4326 = vmatpush1.bf16.msra.mxu0 %v6716_v19  ;;  %4777 = vmatpush1.bf16.msra.mxu1 %v6719_v20  ;;  %v6800_v19 = vld [vmem:[%s9380_s1 + $0xd20] ss:$16 sps:$4 sm:$0xff]   ;;  %v6803_v20 = vld [vmem:[%s9380_s1 + $0xd28] ss:$16 sps:$4 sm:$0xff]  }
 0x170   :  { %4327 = vmatprep.subr.bf16.mxu0 %v6724_v22  ;;  %4778 = vmatprep.subr.bf16.mxu1 %v6727_v23  ;;  %v6808_v22 = vld [vmem:[%s9380_s1 + $0xd44] ss:$16 sps:$4 sm:$0xff]   ;;  %v6811_v23 = vld [vmem:[%s9380_s1 + $0xd4c] ss:$16 sps:$4 sm:$0xff]  }
 0x173   :  { %4328 = vmatpush1.bf16.msra.mxu0 %v6722_v24  ;;  %4779 = vmatpush1.bf16.msra.mxu1 %v6725_v13  ;;  %v6806_v24 = vld [vmem:[%s9380_s1 + $0xd40] ss:$16 sps:$4 sm:$0xff]   ;;  %v6809_v13 = vld [vmem:[%s9380_s1 + $0xd48] ss:$16 sps:$4 sm:$0xff]  }
 0x174   :  { %4329 = vmatprep.subr.bf16.mxu0 %v6730_v27  ;;  %4780 = vmatprep.subr.bf16.mxu1 %v6733_v28  ;;  %v6814_v27 = vld [vmem:[%s9380_s1 + $0xd64] ss:$16 sps:$4 sm:$0xff]   ;;  %v6817_v28 = vld [vmem:[%s9380_s1 + $0xd6c] ss:$16 sps:$4 sm:$0xff]  }
 0x177   :  { %4330 = vmatpush1.bf16.msra.mxu0 %v6728_v29  ;;  %4781 = vmatpush1.bf16.msra.mxu1 %v6731_v14  ;;  %v6812_v29 = vld [vmem:[%s9380_s1 + $0xd60] ss:$16 sps:$4 sm:$0xff]   ;;  %v6815_v14 = vld [vmem:[%s9380_s1 + $0xd68] ss:$16 sps:$4 sm:$0xff]  }
 0x178   :  { %4331 = vmatprep.subr.bf16.mxu0 %v6736_v30  ;;  %4782 = vmatprep.subr.bf16.mxu1 %v6739_v31  ;;  %v6820_v30 = vld [vmem:[%s9380_s1 + $0xd84] ss:$16 sps:$4 sm:$0xff]   ;;  %v6823_v31 = vld [vmem:[%s9380_s1 + $0xd8c] ss:$16 sps:$4 sm:$0xff]  }
 0x17b   :  { %4332 = vmatpush1.bf16.msra.mxu0 %v6734_v33  ;;  %4783 = vmatpush1.bf16.msra.mxu1 %v6737_v26  ;;  %v6826_v33 = vld [vmem:[%s9380_s1 + $0xda4] ss:$16 sps:$4 sm:$0xff]   ;;  %v6829_v26 = vld [vmem:[%s9380_s1 + $0xdac] ss:$16 sps:$4 sm:$0xff]  }
 0x17c   :  { %4333 = vmatprep.subr.bf16.mxu0 %v6742_v36  ;;  %4784 = vmatprep.subr.bf16.mxu1 %v6745_v37  ;;  %v6824_v36 = vld [vmem:[%s9380_s1 + $0xda0] ss:$16 sps:$4 sm:$0xff]   ;;  %v6827_v37 = vld [vmem:[%s9380_s1 + $0xda8] ss:$16 sps:$4 sm:$0xff]  }
 0x17f   :  { %4334 = vmatpush1.bf16.msra.mxu0 %v6740_v21  ;;  %4785 = vmatpush1.bf16.msra.mxu1 %v6743_v39  ;;  %v6832_v21 = vld [vmem:[%s9380_s1 + $0xdc4] ss:$16 sps:$4 sm:$0xff]   ;;  %v6835_v39 = vld [vmem:[%s9380_s1 + $0xdcc] ss:$16 sps:$4 sm:$0xff]  }
 0x180   :  { %4344 = vmatprep.subr.bf16.mxu0 %v6748_v40  ;;  %4795 = vmatprep.subr.bf16.mxu1 %v6751_v41  ;;  %v6830_v40 = vld [vmem:[%s9380_s1 + $0xdc0] ss:$16 sps:$4 sm:$0xff]   ;;  %v6833_v41 = vld [vmem:[%s9380_s1 + $0xdc8] ss:$16 sps:$4 sm:$0xff]  }
 0x182   :  { %4336 = vmatmul.mubr.bf16.vlgmr.msra.gmra.mrb[0].mxu0 %v791_v43  ;;  %4787 = vmatmul.mubr.bf16.vlgmr.msra.gmra.mrb[0].mxu1 %v791_v43  ;;  %v6841_v43 = vld [vmem:[%s9380_s1 + $0xdec] ss:$16 sps:$4 sm:$0xff]  }
 0x183   :  { %4345 = vmatpush1.bf16.msra.mxu0 %v6746_v44  ;;  %4796 = vmatpush1.bf16.msra.mxu1 %v6749_v45  ;;  %v6836_v44 = vld [vmem:[%s9380_s1 + $0xde0] ss:$16 sps:$4 sm:$0xff]   ;;  %v6839_v45 = vld [vmem:[%s9380_s1 + $0xde8] ss:$16 sps:$4 sm:$0xff]  }
 0x184   :  { %4346 = vmatprep.subr.bf16.mxu0 %v6754_v46  ;;  %4797 = vmatprep.subr.bf16.mxu1 %v6757_v35  ;;  %v6845_v46 = vld [vmem:[%s9380_s1 + $0xe04] ss:$16 sps:$4 sm:$0xff]   ;;  %v6848_v35 = vld [vmem:[%s9380_s1 + $0xe0c] ss:$16 sps:$4 sm:$0xff]  }
 0x185   :  { %4376 = vmatprep.mubr.bf16.mxu0 %v8453_v47  ;;  %4827 = vmatprep.mubr.bf16.mxu1 %v8453_v47 }
 0x187   :  { %4347 = vmatpush1.bf16.msra.mxu0 %v6752_v48  ;;  %4798 = vmatpush1.bf16.msra.mxu1 %v6755_v50  ;;  %v8639_v48 = vrot.slane %v8422_v38, %v7345_v49  ;;  %v6843_v50 = vld [vmem:[%s9380_s1 + $0xe00] ss:$16 sps:$4 sm:$0xff]   ;;  %v6854_v38 = vld [vmem:[%s9380_s1 + $0xe2c] ss:$16 sps:$4 sm:$0xff]  }
 0x188   :  { %4348 = vmatprep.subr.bf16.mxu0 %v6760_v51  ;;  %4799 = vmatprep.subr.bf16.mxu1 %v6763_v53  ;;  %v6846_v51 = vld [vmem:[%s9380_s1 + $0xe08] ss:$16 sps:$4 sm:$0xff]   ;;  %v6851_v53 = vld [vmem:[%s9380_s1 + $0xe24] ss:$16 sps:$4 sm:$0xff]  }
 0x18b   :  { %4349 = vmatpush1.bf16.msra.mxu0 %v6758_v54  ;;  %4800 = vmatpush1.bf16.msra.mxu1 %v6761_v55  ;;  %v794_v54 = vcombine.high %v8453_v47, %v8453_v47  ;;  %v6849_v55 = vld [vmem:[%s9380_s1 + $0xe20] ss:$16 sps:$4 sm:$0xff]   ;;  %v6857_v47 = vld [vmem:[%s9380_s1 + $0xe44] ss:$16 sps:$4 sm:$0xff]  }
 0x18c   :  { %4350 = vmatprep.subr.bf16.mxu0 %v6766_v56  ;;  %4801 = vmatprep.subr.bf16.mxu1 %v6769_v57  ;;  %v6852_v56 = vld [vmem:[%s9380_s1 + $0xe28] ss:$16 sps:$4 sm:$0xff]   ;;  %v6860_v57 = vld [vmem:[%s9380_s1 + $0xe4c] ss:$16 sps:$4 sm:$0xff]  }
 0x18f   :  { %4351 = vmatpush1.bf16.msra.mxu0 %v6764_v58  ;;  %4802 = vmatpush1.bf16.msra.mxu1 %v6767_v59  ;;  %v6855_v58 = vld [vmem:[%s9380_s1 + $0xe40] ss:$16 sps:$4 sm:$0xff]   ;;  %v6858_v59 = vld [vmem:[%s9380_s1 + $0xe48] ss:$16 sps:$4 sm:$0xff]  }
 0x190   :  { %4352 = vmatprep.subr.bf16.mxu0 %v6772_v60  ;;  %4803 = vmatprep.subr.bf16.mxu1 %v6775_v61  ;;  %v6863_v60 = vld [vmem:[%s9380_s1 + $0xe64] ss:$16 sps:$4 sm:$0xff]   ;;  %v6866_v61 = vld [vmem:[%s9380_s1 + $0xe6c] ss:$16 sps:$4 sm:$0xff]  }
 0x193   :  { %4353 = vmatpush1.bf16.msra.mxu0 %v6770_v62  ;;  %4804 = vmatpush1.bf16.msra.mxu1 %v6773_v63  ;;  %v6861_v62 = vld [vmem:[%s9380_s1 + $0xe60] ss:$16 sps:$4 sm:$0xff]   ;;  %v6864_v63 = vld [vmem:[%s9380_s1 + $0xe68] ss:$16 sps:$4 sm:$0xff]  }
 0x194   :  { %4354 = vmatprep.subr.bf16.mxu0 %v6778_v0  ;;  %4805 = vmatprep.subr.bf16.mxu1 %v6781_v1  ;;  %v6869_v0 = vld [vmem:[%s9380_s1 + $0xe84] ss:$16 sps:$4 sm:$0xff]   ;;  %v6872_v1 = vld [vmem:[%s9380_s1 + $0xe8c] ss:$16 sps:$4 sm:$0xff]  }
 0x197   :  { %4355 = vmatpush1.bf16.msra.mxu0 %v6776_v2  ;;  %4806 = vmatpush1.bf16.msra.mxu1 %v6779_v3  ;;  %v6867_v2 = vld [vmem:[%s9380_s1 + $0xe80] ss:$16 sps:$4 sm:$0xff]   ;;  %v6870_v3 = vld [vmem:[%s9380_s1 + $0xe88] ss:$16 sps:$4 sm:$0xff]  }
 0x198   :  { %4356 = vmatprep.subr.bf16.mxu0 %v6784_v4  ;;  %4807 = vmatprep.subr.bf16.mxu1 %v6787_v5  ;;  %v6875_v4 = vld [vmem:[%s9380_s1 + $0xea4] ss:$16 sps:$4 sm:$0xff]   ;;  %v6878_v5 = vld [vmem:[%s9380_s1 + $0xeac] ss:$16 sps:$4 sm:$0xff]  }
 0x19b   :  { %4357 = vmatpush1.bf16.msra.mxu0 %v6782_v6  ;;  %4808 = vmatpush1.bf16.msra.mxu1 %v6785_v7  ;;  %v6873_v6 = vld [vmem:[%s9380_s1 + $0xea0] ss:$16 sps:$4 sm:$0xff]   ;;  %v6876_v7 = vld [vmem:[%s9380_s1 + $0xea8] ss:$16 sps:$4 sm:$0xff]  }
 0x19c   :  { %4358 = vmatprep.subr.bf16.mxu0 %v6790_v8  ;;  %4809 = vmatprep.subr.bf16.mxu1 %v6793_v9  ;;  %v6881_v8 = vld [vmem:[%s9380_s1 + $0xec4] ss:$16 sps:$4 sm:$0xff]   ;;  %v6884_v9 = vld [vmem:[%s9380_s1 + $0xecc] ss:$16 sps:$4 sm:$0xff]  }
 0x19f   :  { %4359 = vmatpush1.bf16.msra.mxu0 %v6788_v10  ;;  %4810 = vmatpush1.bf16.msra.mxu1 %v6791_v11  ;;  %v6879_v10 = vld [vmem:[%s9380_s1 + $0xec0] ss:$16 sps:$4 sm:$0xff]   ;;  %v6882_v11 = vld [vmem:[%s9380_s1 + $0xec8] ss:$16 sps:$4 sm:$0xff]  }
 0x1a0   :  { %4360 = vmatprep.subr.bf16.mxu0 %v6796_v12  ;;  %4811 = vmatprep.subr.bf16.mxu1 %v6799_v52  ;;  %v6887_v12 = vld [vmem:[%s9380_s1 + $0xee4] ss:$16 sps:$4 sm:$0xff]   ;;  %v6890_v52 = vld [vmem:[%s9380_s1 + $0xeec] ss:$16 sps:$4 sm:$0xff]  }
 0x1a3   :  { %4361 = vmatpush1.bf16.msra.mxu0 %v6794_v15  ;;  %4812 = vmatpush1.bf16.msra.mxu1 %v6797_v16  ;;  %v6885_v15 = vld [vmem:[%s9380_s1 + $0xee0] ss:$16 sps:$4 sm:$0xff]   ;;  %v6888_v16 = vld [vmem:[%s9380_s1 + $0xee8] ss:$16 sps:$4 sm:$0xff]  }
 0x1a4   :  { %4362 = vmatprep.subr.bf16.mxu0 %v6802_v17  ;;  %4813 = vmatprep.subr.bf16.mxu1 %v6805_v18  ;;  %v6893_v17 = vld [vmem:[%s9380_s1 + $0xf04] ss:$16 sps:$4 sm:$0xff]   ;;  %v6896_v18 = vld [vmem:[%s9380_s1 + $0xf0c] ss:$16 sps:$4 sm:$0xff]  }
 0x1a7   :  { %4363 = vmatpush1.bf16.msra.mxu0 %v6800_v19  ;;  %4814 = vmatpush1.bf16.msra.mxu1 %v6803_v20  ;;  %v6891_v19 = vld [vmem:[%s9380_s1 + $0xf00] ss:$16 sps:$4 sm:$0xff]   ;;  %v6894_v20 = vld [vmem:[%s9380_s1 + $0xf08] ss:$16 sps:$4 sm:$0xff]  }
 0x1a8   :  { %4364 = vmatprep.subr.bf16.mxu0 %v6808_v22  ;;  %4815 = vmatprep.subr.bf16.mxu1 %v6811_v23  ;;  %v6899_v22 = vld [vmem:[%s9380_s1 + $0xf24] ss:$16 sps:$4 sm:$0xff]   ;;  %v6902_v23 = vld [vmem:[%s9380_s1 + $0xf2c] ss:$16 sps:$4 sm:$0xff]  }
 0x1ab   :  { %4365 = vmatpush1.bf16.msra.mxu0 %v6806_v24  ;;  %4816 = vmatpush1.bf16.msra.mxu1 %v6809_v13  ;;  %v6897_v24 = vld [vmem:[%s9380_s1 + $0xf20] ss:$16 sps:$4 sm:$0xff]   ;;  %v6900_v13 = vld [vmem:[%s9380_s1 + $0xf28] ss:$16 sps:$4 sm:$0xff]  }
 0x1ac   :  { %4366 = vmatprep.subr.bf16.mxu0 %v6814_v27  ;;  %4817 = vmatprep.subr.bf16.mxu1 %v6817_v28  ;;  %v6905_v27 = vld [vmem:[%s9380_s1 + $0xf44] ss:$16 sps:$4 sm:$0xff]   ;;  %v6908_v28 = vld [vmem:[%s9380_s1 + $0xf4c] ss:$16 sps:$4 sm:$0xff]  }
 0x1af   :  { %4367 = vmatpush1.bf16.msra.mxu0 %v6812_v29  ;;  %4818 = vmatpush1.bf16.msra.mxu1 %v6815_v14  ;;  %v6903_v29 = vld [vmem:[%s9380_s1 + $0xf40] ss:$16 sps:$4 sm:$0xff]   ;;  %v6906_v14 = vld [vmem:[%s9380_s1 + $0xf48] ss:$16 sps:$4 sm:$0xff]  }
 0x1b0   :  { %4368 = vmatprep.subr.bf16.mxu0 %v6820_v30  ;;  %4819 = vmatprep.subr.bf16.mxu1 %v6823_v31  ;;  %v6911_v30 = vld [vmem:[%s9380_s1 + $0xf64] ss:$16 sps:$4 sm:$0xff]   ;;  %v6914_v31 = vld [vmem:[%s9380_s1 + $0xf6c] ss:$16 sps:$4 sm:$0xff]  }
 0x1b3   :  { %4369 = vmatpush1.bf16.msra.mxu0 %v6818_v25  ;;  %4820 = vmatpush1.bf16.msra.mxu1 %v6821_v32  ;;  %v6909_v25 = vld [vmem:[%s9380_s1 + $0xf60] ss:$16 sps:$4 sm:$0xff]   ;;  %v6912_v32 = vld [vmem:[%s9380_s1 + $0xf68] ss:$16 sps:$4 sm:$0xff]  }
 0x1b4   :  { %4370 = vmatprep.subr.bf16.mxu0 %v6826_v33  ;;  %4821 = vmatprep.subr.bf16.mxu1 %v6829_v26  ;;  %v6917_v33 = vld [vmem:[%s9380_s1 + $0xf84] ss:$16 sps:$4 sm:$0xff]   ;;  %v6920_v26 = vld [vmem:[%s9380_s1 + $0xf8c] ss:$16 sps:$4 sm:$0xff]  }
 0x1b7   :  { %4371 = vmatpush1.bf16.msra.mxu0 %v6824_v36  ;;  %4822 = vmatpush1.bf16.msra.mxu1 %v6827_v37  ;;  %v6915_v36 = vld [vmem:[%s9380_s1 + $0xf80] ss:$16 sps:$4 sm:$0xff]   ;;  %v6918_v37 = vld [vmem:[%s9380_s1 + $0xf88] ss:$16 sps:$4 sm:$0xff]  }
 0x1b8   :  { %4372 = vmatprep.subr.bf16.mxu0 %v6832_v21  ;;  %4823 = vmatprep.subr.bf16.mxu1 %v6835_v39  ;;  %v6923_v21 = vld [vmem:[%s9380_s1 + $0xfa4] ss:$16 sps:$4 sm:$0xff]   ;;  %v6926_v39 = vld [vmem:[%s9380_s1 + $0xfac] ss:$16 sps:$4 sm:$0xff]  }
 0x1bb   :  { %4373 = vmatpush1.bf16.msra.mxu0 %v6830_v40  ;;  %4824 = vmatpush1.bf16.msra.mxu1 %v6833_v41  ;;  %v6921_v40 = vld [vmem:[%s9380_s1 + $0xfa0] ss:$16 sps:$4 sm:$0xff]   ;;  %v6924_v41 = vld [vmem:[%s9380_s1 + $0xfa8] ss:$16 sps:$4 sm:$0xff]  }
 0x1bc   :  { %4374 = vmatprep.subr.bf16.mxu0 %v6838_v34  ;;  %4825 = vmatprep.subr.bf16.mxu1 %v6841_v43  ;;  %v6929_v34 = vld [vmem:[%s9380_s1 + $0xfc4] ss:$16 sps:$4 sm:$0xff]   ;;  %v6932_v43 = vld [vmem:[%s9380_s1 + $0xfcc] ss:$16 sps:$4 sm:$0xff]  }
 0x1bf   :  { %4375 = vmatpush1.bf16.msra.mxu0 %v6836_v44  ;;  %4826 = vmatpush1.bf16.msra.mxu1 %v6839_v45  ;;  %v8816_v44 = vld [vmem:[%s9381_s0 + $0x10] sm:$0x1f] }
 0x1c0   :  { %4385 = vmatprep.subr.bf16.mxu0 %v6845_v46  ;;  %4836 = vmatprep.subr.bf16.mxu1 %v6848_v35  ;;  %v6927_v45 = vld [vmem:[%s9380_s1 + $0xfc0] ss:$16 sps:$4 sm:$0xff]   ;;  %v6930_v46 = vld [vmem:[%s9380_s1 + $0xfc8] ss:$16 sps:$4 sm:$0xff]   ;;  %v6935_v35 = vld [vmem:[%s9380_s1 + $0xfe4] ss:$16 sps:$4 sm:$0xff]  }
 0x1c2   :  { %4377 = vmatmul.mubr.bf16.vlgmr.msra.gmra.mrb[0].mxu0 %v8639_v48  ;;  %4828 = vmatmul.mubr.bf16.vlgmr.msra.gmra.mrb[0].mxu1 %v8639_v48 }
 0x1c3   :  { %4386 = vmatpush1.bf16.msra.mxu0 %v6843_v50  ;;  %4837 = vmatpush1.bf16.msra.mxu1 %v6846_v51  ;;  %v6938_v50 = vld [vmem:[%s9380_s1 + $0xfec] ss:$16 sps:$4 sm:$0xff]   ;;  %v8832_v51 = vrot.slane %v8816_v44, %v7345_v49 }
 0x1c4   :  { %4387 = vmatprep.subr.bf16.mxu0 %v6851_v53  ;;  %4838 = vmatprep.subr.bf16.mxu1 %v6854_v38  ;;  %v6933_v53 = vld [vmem:[%s9380_s1 + $0xfe0] ss:$16 sps:$4 sm:$0xff]   ;;  %v6936_v38 = vld [vmem:[%s9380_s1 + $0xfe8] ss:$16 sps:$4 sm:$0xff]  }
 0x1c5   :  { %4417 = vmatprep.mubr.bf16.mxu0 %v794_v54  ;;  %4868 = vmatprep.mubr.bf16.mxu1 %v794_v54  ;;  %v6941_v54 = vld [vmem:[%s9380_s1 + $0x1004] ss:$16 sps:$4 sm:$0xff]  }
 0x1c7   :  { %4388 = vmatpush1.bf16.msra.mxu0 %v6849_v55  ;;  %4839 = vmatpush1.bf16.msra.mxu1 %v6852_v56  ;;  %v6944_v55 = vld [vmem:[%s9380_s1 + $0x100c] ss:$16 sps:$4 sm:$0xff]   ;;  %v810_v56 = vcombine.high %v8832_v51, %v8832_v51 }
 0x1c8   :  { %4389 = vmatprep.subr.bf16.mxu0 %v6857_v47  ;;  %4840 = vmatprep.subr.bf16.mxu1 %v6860_v57  ;;  %v792_v47 = vcombine.high %v8639_v48, %v8639_v48  ;;  %v6939_v57 = vld [vmem:[%s9380_s1 + $0x1000] ss:$16 sps:$4 sm:$0xff]   ;;  %v6950_v48 = vld [vmem:[%s9380_s1 + $0x102c] ss:$16 sps:$4 sm:$0xff]  }
 0x1cb   :  { %4390 = vmatpush1.bf16.msra.mxu0 %v6855_v58  ;;  %4841 = vmatpush1.bf16.msra.mxu1 %v6858_v59  ;;  %v6942_v58 = vld [vmem:[%s9380_s1 + $0x1008] ss:$16 sps:$4 sm:$0xff]   ;;  %v6947_v59 = vld [vmem:[%s9380_s1 + $0x1024] ss:$16 sps:$4 sm:$0xff]  }
 0x1cc   :  { %4391 = vmatprep.subr.bf16.mxu0 %v6863_v60  ;;  %4842 = vmatprep.subr.bf16.mxu1 %v6866_v61  ;;  %v8863_v60 = vrot.slane %v810_v56, %v7345_v49  ;;  %v6945_v61 = vld [vmem:[%s9380_s1 + $0x1020] ss:$16 sps:$4 sm:$0xff]   ;;  %v7026_v56 = vld [vmem:[%s9380_s1 + $0x11c8] ss:$16 sps:$4 sm:$0xff]  }
 0x1cf   :  { %4392 = vmatpush1.bf16.msra.mxu0 %v6861_v62  ;;  %4843 = vmatpush1.bf16.msra.mxu1 %v6864_v63  ;;  %v6948_v62 = vld [vmem:[%s9380_s1 + $0x1028] ss:$16 sps:$4 sm:$0xff]   ;;  %v6953_v63 = vld [vmem:[%s9380_s1 + $0x1044] ss:$16 sps:$4 sm:$0xff]  }
 0x1d0   :  { %4393 = vmatprep.subr.bf16.mxu0 %v6869_v0  ;;  %4844 = vmatprep.subr.bf16.mxu1 %v6872_v1  ;;  %v6956_v0 = vld [vmem:[%s9380_s1 + $0x104c] ss:$16 sps:$4 sm:$0xff]   ;;  %v6951_v1 = vld [vmem:[%s9380_s1 + $0x1040] ss:$16 sps:$4 sm:$0xff]  }
 0x1d3   :  { %4394 = vmatpush1.bf16.msra.mxu0 %v6867_v2  ;;  %4845 = vmatpush1.bf16.msra.mxu1 %v6870_v3  ;;  %v6954_v2 = vld [vmem:[%s9380_s1 + $0x1048] ss:$16 sps:$4 sm:$0xff]   ;;  %v6959_v3 = vld [vmem:[%s9380_s1 + $0x1064] ss:$16 sps:$4 sm:$0xff]  }
 0x1d4   :  { %4395 = vmatprep.subr.bf16.mxu0 %v6875_v4  ;;  %4846 = vmatprep.subr.bf16.mxu1 %v6878_v5  ;;  %v6962_v4 = vld [vmem:[%s9380_s1 + $0x106c] ss:$16 sps:$4 sm:$0xff]   ;;  %v6957_v5 = vld [vmem:[%s9380_s1 + $0x1060] ss:$16 sps:$4 sm:$0xff]  }
 0x1d7   :  { %4396 = vmatpush1.bf16.msra.mxu0 %v6873_v6  ;;  %4847 = vmatpush1.bf16.msra.mxu1 %v6876_v7  ;;  %v6960_v6 = vld [vmem:[%s9380_s1 + $0x1068] ss:$16 sps:$4 sm:$0xff]   ;;  %v6965_v7 = vld [vmem:[%s9380_s1 + $0x1084] ss:$16 sps:$4 sm:$0xff]  }
 0x1d8   :  { %4397 = vmatprep.subr.bf16.mxu0 %v6881_v8  ;;  %4848 = vmatprep.subr.bf16.mxu1 %v6884_v9  ;;  %v6968_v8 = vld [vmem:[%s9380_s1 + $0x108c] ss:$16 sps:$4 sm:$0xff]   ;;  %v6963_v9 = vld [vmem:[%s9380_s1 + $0x1080] ss:$16 sps:$4 sm:$0xff]  }
 0x1db   :  { %4398 = vmatpush1.bf16.msra.mxu0 %v6879_v10  ;;  %4849 = vmatpush1.bf16.msra.mxu1 %v6882_v11  ;;  %v6966_v10 = vld [vmem:[%s9380_s1 + $0x1088] ss:$16 sps:$4 sm:$0xff]   ;;  %v6971_v11 = vld [vmem:[%s9380_s1 + $0x10a4] ss:$16 sps:$4 sm:$0xff]  }
 0x1dc   :  { %4399 = vmatprep.subr.bf16.mxu0 %v6887_v12  ;;  %4850 = vmatprep.subr.bf16.mxu1 %v6890_v52  ;;  %v6974_v12 = vld [vmem:[%s9380_s1 + $0x10ac] ss:$16 sps:$4 sm:$0xff]   ;;  %v6969_v52 = vld [vmem:[%s9380_s1 + $0x10a0] ss:$16 sps:$4 sm:$0xff]  }
 0x1df   :  { %4400 = vmatpush1.bf16.msra.mxu0 %v6885_v15  ;;  %4851 = vmatpush1.bf16.msra.mxu1 %v6888_v16  ;;  %v6972_v15 = vld [vmem:[%s9380_s1 + $0x10a8] ss:$16 sps:$4 sm:$0xff]   ;;  %v6977_v16 = vld [vmem:[%s9380_s1 + $0x10c4] ss:$16 sps:$4 sm:$0xff]  }
 0x1e0   :  { %4401 = vmatprep.subr.bf16.mxu0 %v6893_v17  ;;  %4852 = vmatprep.subr.bf16.mxu1 %v6896_v18  ;;  %v6980_v17 = vld [vmem:[%s9380_s1 + $0x10cc] ss:$16 sps:$4 sm:$0xff]   ;;  %v6975_v18 = vld [vmem:[%s9380_s1 + $0x10c0] ss:$16 sps:$4 sm:$0xff]  }
 0x1e3   :  { %4402 = vmatpush1.bf16.msra.mxu0 %v6891_v19  ;;  %4853 = vmatpush1.bf16.msra.mxu1 %v6894_v20  ;;  %v6978_v19 = vld [vmem:[%s9380_s1 + $0x10c8] ss:$16 sps:$4 sm:$0xff]   ;;  %v6983_v20 = vld [vmem:[%s9380_s1 + $0x10e4] ss:$16 sps:$4 sm:$0xff]  }
 0x1e4   :  { %4403 = vmatprep.subr.bf16.mxu0 %v6899_v22  ;;  %4854 = vmatprep.subr.bf16.mxu1 %v6902_v23  ;;  %v6986_v22 = vld [vmem:[%s9380_s1 + $0x10ec] ss:$16 sps:$4 sm:$0xff]   ;;  %v6981_v23 = vld [vmem:[%s9380_s1 + $0x10e0] ss:$16 sps:$4 sm:$0xff]  }
 0x1e7   :  { %4404 = vmatpush1.bf16.msra.mxu0 %v6897_v24  ;;  %4855 = vmatpush1.bf16.msra.mxu1 %v6900_v13  ;;  %v6984_v24 = vld [vmem:[%s9380_s1 + $0x10e8] ss:$16 sps:$4 sm:$0xff]   ;;  %v6989_v13 = vld [vmem:[%s9380_s1 + $0x1104] ss:$16 sps:$4 sm:$0xff]  }
 0x1e8   :  { %4405 = vmatprep.subr.bf16.mxu0 %v6905_v27  ;;  %4856 = vmatprep.subr.bf16.mxu1 %v6908_v28  ;;  %v6992_v27 = vld [vmem:[%s9380_s1 + $0x110c] ss:$16 sps:$4 sm:$0xff]   ;;  %v6987_v28 = vld [vmem:[%s9380_s1 + $0x1100] ss:$16 sps:$4 sm:$0xff]  }
 0x1eb   :  { %4406 = vmatpush1.bf16.msra.mxu0 %v6903_v29  ;;  %4857 = vmatpush1.bf16.msra.mxu1 %v6906_v14  ;;  %v6990_v29 = vld [vmem:[%s9380_s1 + $0x1108] ss:$16 sps:$4 sm:$0xff]   ;;  %v6995_v14 = vld [vmem:[%s9380_s1 + $0x1124] ss:$16 sps:$4 sm:$0xff]  }
 0x1ec   :  { %4407 = vmatprep.subr.bf16.mxu0 %v6911_v30  ;;  %4858 = vmatprep.subr.bf16.mxu1 %v6914_v31  ;;  %v6998_v30 = vld [vmem:[%s9380_s1 + $0x112c] ss:$16 sps:$4 sm:$0xff]   ;;  %v6993_v31 = vld [vmem:[%s9380_s1 + $0x1120] ss:$16 sps:$4 sm:$0xff]  }
 0x1ef   :  { %4408 = vmatpush1.bf16.msra.mxu0 %v6909_v25  ;;  %4859 = vmatpush1.bf16.msra.mxu1 %v6912_v32  ;;  %v6996_v25 = vld [vmem:[%s9380_s1 + $0x1128] ss:$16 sps:$4 sm:$0xff]   ;;  %v7001_v32 = vld [vmem:[%s9380_s1 + $0x1144] ss:$16 sps:$4 sm:$0xff]  }
 0x1f0   :  { %4409 = vmatprep.subr.bf16.mxu0 %v6917_v33  ;;  %4860 = vmatprep.subr.bf16.mxu1 %v6920_v26  ;;  %v7004_v33 = vld [vmem:[%s9380_s1 + $0x114c] ss:$16 sps:$4 sm:$0xff]   ;;  %v6999_v26 = vld [vmem:[%s9380_s1 + $0x1140] ss:$16 sps:$4 sm:$0xff]  }
 0x1f3   :  { %4410 = vmatpush1.bf16.msra.mxu0 %v6915_v36  ;;  %4861 = vmatpush1.bf16.msra.mxu1 %v6918_v37  ;;  %v7002_v36 = vld [vmem:[%s9380_s1 + $0x1148] ss:$16 sps:$4 sm:$0xff]   ;;  %v7007_v37 = vld [vmem:[%s9380_s1 + $0x1164] ss:$16 sps:$4 sm:$0xff]  }
 0x1f4   :  { %4411 = vmatprep.subr.bf16.mxu0 %v6923_v21  ;;  %4862 = vmatprep.subr.bf16.mxu1 %v6926_v39  ;;  %v7010_v21 = vld [vmem:[%s9380_s1 + $0x116c] ss:$16 sps:$4 sm:$0xff]   ;;  %v7005_v39 = vld [vmem:[%s9380_s1 + $0x1160] ss:$16 sps:$4 sm:$0xff]  }
 0x1f7   :  { %4412 = vmatpush1.bf16.msra.mxu0 %v6921_v40  ;;  %4863 = vmatpush1.bf16.msra.mxu1 %v6924_v41  ;;  %v7008_v40 = vld [vmem:[%s9380_s1 + $0x1168] ss:$16 sps:$4 sm:$0xff]   ;;  %v7013_v41 = vld [vmem:[%s9380_s1 + $0x1184] ss:$16 sps:$4 sm:$0xff]  }
 0x1f8   :  { %4413 = vmatprep.subr.bf16.mxu0 %v6929_v34  ;;  %4864 = vmatprep.subr.bf16.mxu1 %v6932_v43  ;;  %v7016_v34 = vld [vmem:[%s9380_s1 + $0x118c] ss:$16 sps:$4 sm:$0xff]   ;;  %v7011_v43 = vld [vmem:[%s9380_s1 + $0x1180] ss:$16 sps:$4 sm:$0xff]  }
 0x1fb   :  { %4414 = vmatpush1.bf16.msra.mxu0 %v6927_v45  ;;  %4865 = vmatpush1.bf16.msra.mxu1 %v6930_v46  ;;  %v7014_v45 = vld [vmem:[%s9380_s1 + $0x1188] ss:$16 sps:$4 sm:$0xff]   ;;  %v7019_v46 = vld [vmem:[%s9380_s1 + $0x11a4] ss:$16 sps:$4 sm:$0xff]  }
 0x1fc   :  { %4415 = vmatprep.subr.bf16.mxu0 %v6935_v35  ;;  %4866 = vmatprep.subr.bf16.mxu1 %v6938_v50  ;;  %v7022_v35 = vld [vmem:[%s9380_s1 + $0x11ac] ss:$16 sps:$4 sm:$0xff]   ;;  %v7017_v50 = vld [vmem:[%s9380_s1 + $0x11a0] ss:$16 sps:$4 sm:$0xff]  }
 0x1ff   :  { %4416 = vmatpush1.bf16.msra.mxu0 %v6933_v53  ;;  %4867 = vmatpush1.bf16.msra.mxu1 %v6936_v38  ;;  %v7020_v53 = vld [vmem:[%s9380_s1 + $0x11a8] ss:$16 sps:$4 sm:$0xff]   ;;  %v7025_v38 = vld [vmem:[%s9380_s1 + $0x11c4] ss:$16 sps:$4 sm:$0xff]  }
 0x200   :  { %4426 = vmatprep.subr.bf16.mxu0 %v6941_v54  ;;  %4877 = vmatprep.subr.bf16.mxu1 %v6944_v55  ;;  %v7028_v54 = vld [vmem:[%s9380_s1 + $0x11cc] ss:$16 sps:$4 sm:$0xff]   ;;  %v7023_v55 = vld [vmem:[%s9380_s1 + $0x11c0] ss:$16 sps:$4 sm:$0xff]  }
 0x202   :  { %4418 = vmatmul.mubr.bf16.vlgmr.msra.gmra.mrb[0].mxu0 %v792_v47  ;;  %4869 = vmatmul.mubr.bf16.vlgmr.msra.gmra.mrb[0].mxu1 %v792_v47  ;;  %v7031_v47 = vld [vmem:[%s9380_s1 + $0x11e4] ss:$16 sps:$4 sm:$0xff]  }
 0x203   :  { %4427 = vmatpush1.bf16.msra.mxu0 %v6939_v57  ;;  %4878 = vmatpush1.bf16.msra.mxu1 %v6942_v58  ;;  %v7034_v57 = vld [vmem:[%s9380_s1 + $0x11ec] ss:$16 sps:$4 sm:$0xff]   ;;  %v7029_v58 = vld [vmem:[%s9380_s1 + $0x11e0] ss:$16 sps:$4 sm:$0xff]  }
 0x204   :  { %4428 = vmatprep.subr.bf16.mxu0 %v6947_v59  ;;  %4879 = vmatprep.subr.bf16.mxu1 %v6950_v48  ;;  %v7032_v59 = vld [vmem:[%s9380_s1 + $0x11e8] ss:$16 sps:$4 sm:$0xff]   ;;  %v7038_v48 = vld [vmem:[%s9380_s1 + $0x1204] ss:$16 sps:$4 sm:$0xff]  }
 0x205   :  { %4458 = vmatprep.mubr.bf16.mxu0 %v8863_v60  ;;  %4909 = vmatprep.mubr.bf16.mxu1 %v8863_v60 }
 0x207   :  { %4429 = vmatpush1.bf16.msra.mxu0 %v6945_v61  ;;  %4880 = vmatpush1.bf16.msra.mxu1 %v6948_v62  ;;  %v7041_v61 = vld [vmem:[%s9380_s1 + $0x120c] ss:$16 sps:$4 sm:$0xff]   ;;  %v9049_v62 = vrot.slane %v8832_v51, %v7345_v49 }
 0x208   :  { %4430 = vmatprep.subr.bf16.mxu0 %v6953_v63  ;;  %4881 = vmatprep.subr.bf16.mxu1 %v6956_v0  ;;  %v7036_v63 = vld [vmem:[%s9380_s1 + $0x1200] ss:$16 sps:$4 sm:$0xff]   ;;  %v7039_v0 = vld [vmem:[%s9380_s1 + $0x1208] ss:$16 sps:$4 sm:$0xff]   ;;  %v7047_v51 = vld [vmem:[%s9380_s1 + $0x122c] ss:$16 sps:$4 sm:$0xff]  }
 0x20b   :  { %4431 = vmatpush1.bf16.msra.mxu0 %v6951_v1  ;;  %4882 = vmatpush1.bf16.msra.mxu1 %v6954_v2  ;;  %v7044_v1 = vld [vmem:[%s9380_s1 + $0x1224] ss:$16 sps:$4 sm:$0xff]   ;;  %v833_v2 = vcombine.high %v8863_v60, %v8863_v60 }
 0x20c   :  { %4432 = vmatprep.subr.bf16.mxu0 %v6959_v3  ;;  %4883 = vmatprep.subr.bf16.mxu1 %v6962_v4  ;;  %v7042_v3 = vld [vmem:[%s9380_s1 + $0x1220] ss:$16 sps:$4 sm:$0xff]   ;;  %v7045_v4 = vld [vmem:[%s9380_s1 + $0x1228] ss:$16 sps:$4 sm:$0xff]   ;;  %v7050_v60 = vld [vmem:[%s9380_s1 + $0x1244] ss:$16 sps:$4 sm:$0xff]  }
 0x20f   :  { %4433 = vmatpush1.bf16.msra.mxu0 %v6957_v5  ;;  %4884 = vmatpush1.bf16.msra.mxu1 %v6960_v6  ;;  %v7053_v5 = vld [vmem:[%s9380_s1 + $0x124c] ss:$16 sps:$4 sm:$0xff]   ;;  %v7048_v6 = vld [vmem:[%s9380_s1 + $0x1240] ss:$16 sps:$4 sm:$0xff]  }
 0x210   :  { %4434 = vmatprep.subr.bf16.mxu0 %v6965_v7  ;;  %4885 = vmatprep.subr.bf16.mxu1 %v6968_v8  ;;  %v7051_v7 = vld [vmem:[%s9380_s1 + $0x1248] ss:$16 sps:$4 sm:$0xff]   ;;  %v7056_v8 = vld [vmem:[%s9380_s1 + $0x1264] ss:$16 sps:$4 sm:$0xff]  }
 0x213   :  { %4435 = vmatpush1.bf16.msra.mxu0 %v6963_v9  ;;  %4886 = vmatpush1.bf16.msra.mxu1 %v6966_v10  ;;  %v7059_v9 = vld [vmem:[%s9380_s1 + $0x126c] ss:$16 sps:$4 sm:$0xff]   ;;  %v7054_v10 = vld [vmem:[%s9380_s1 + $0x1260] ss:$16 sps:$4 sm:$0xff]  }
 0x214   :  { %4436 = vmatprep.subr.bf16.mxu0 %v6971_v11  ;;  %4887 = vmatprep.subr.bf16.mxu1 %v6974_v12  ;;  %v7057_v11 = vld [vmem:[%s9380_s1 + $0x1268] ss:$16 sps:$4 sm:$0xff]   ;;  %v7062_v12 = vld [vmem:[%s9380_s1 + $0x1284] ss:$16 sps:$4 sm:$0xff]  }
 0x217   :  { %4437 = vmatpush1.bf16.msra.mxu0 %v6969_v52  ;;  %4888 = vmatpush1.bf16.msra.mxu1 %v6972_v15  ;;  %v7065_v52 = vld [vmem:[%s9380_s1 + $0x128c] ss:$16 sps:$4 sm:$0xff]   ;;  %v7060_v15 = vld [vmem:[%s9380_s1 + $0x1280] ss:$16 sps:$4 sm:$0xff]  }
 0x218   :  { %4438 = vmatprep.subr.bf16.mxu0 %v6977_v16  ;;  %4889 = vmatprep.subr.bf16.mxu1 %v6980_v17  ;;  %v7063_v16 = vld [vmem:[%s9380_s1 + $0x1288] ss:$16 sps:$4 sm:$0xff]   ;;  %v7068_v17 = vld [vmem:[%s9380_s1 + $0x12a4] ss:$16 sps:$4 sm:$0xff]  }
 0x21b   :  { %4439 = vmatpush1.bf16.msra.mxu0 %v6975_v18  ;;  %4890 = vmatpush1.bf16.msra.mxu1 %v6978_v19  ;;  %v7071_v18 = vld [vmem:[%s9380_s1 + $0x12ac] ss:$16 sps:$4 sm:$0xff]   ;;  %v7066_v19 = vld [vmem:[%s9380_s1 + $0x12a0] ss:$16 sps:$4 sm:$0xff]  }
 0x21c   :  { %4440 = vmatprep.subr.bf16.mxu0 %v6983_v20  ;;  %4891 = vmatprep.subr.bf16.mxu1 %v6986_v22  ;;  %v7069_v20 = vld [vmem:[%s9380_s1 + $0x12a8] ss:$16 sps:$4 sm:$0xff]   ;;  %v7074_v22 = vld [vmem:[%s9380_s1 + $0x12c4] ss:$16 sps:$4 sm:$0xff]  }
 0x21f   :  { %4441 = vmatpush1.bf16.msra.mxu0 %v6981_v23  ;;  %4892 = vmatpush1.bf16.msra.mxu1 %v6984_v24  ;;  %v7077_v23 = vld [vmem:[%s9380_s1 + $0x12cc] ss:$16 sps:$4 sm:$0xff]   ;;  %v7072_v24 = vld [vmem:[%s9380_s1 + $0x12c0] ss:$16 sps:$4 sm:$0xff]  }
 0x220   :  { %4442 = vmatprep.subr.bf16.mxu0 %v6989_v13  ;;  %4893 = vmatprep.subr.bf16.mxu1 %v6992_v27  ;;  %v7075_v13 = vld [vmem:[%s9380_s1 + $0x12c8] ss:$16 sps:$4 sm:$0xff]   ;;  %v7080_v27 = vld [vmem:[%s9380_s1 + $0x12e4] ss:$16 sps:$4 sm:$0xff]  }
 0x223   :  { %4443 = vmatpush1.bf16.msra.mxu0 %v6987_v28  ;;  %4894 = vmatpush1.bf16.msra.mxu1 %v6990_v29  ;;  %v7083_v28 = vld [vmem:[%s9380_s1 + $0x12ec] ss:$16 sps:$4 sm:$0xff]   ;;  %v7078_v29 = vld [vmem:[%s9380_s1 + $0x12e0] ss:$16 sps:$4 sm:$0xff]  }
 0x224   :  { %4444 = vmatprep.subr.bf16.mxu0 %v6995_v14  ;;  %4895 = vmatprep.subr.bf16.mxu1 %v6998_v30  ;;  %v7081_v14 = vld [vmem:[%s9380_s1 + $0x12e8] ss:$16 sps:$4 sm:$0xff]   ;;  %v7086_v30 = vld [vmem:[%s9380_s1 + $0x1304] ss:$16 sps:$4 sm:$0xff]  }
 0x227   :  { %4445 = vmatpush1.bf16.msra.mxu0 %v6993_v31  ;;  %4896 = vmatpush1.bf16.msra.mxu1 %v6996_v25  ;;  %v7089_v31 = vld [vmem:[%s9380_s1 + $0x130c] ss:$16 sps:$4 sm:$0xff]   ;;  %v7084_v25 = vld [vmem:[%s9380_s1 + $0x1300] ss:$16 sps:$4 sm:$0xff]  }
 0x228   :  { %4446 = vmatprep.subr.bf16.mxu0 %v7001_v32  ;;  %4897 = vmatprep.subr.bf16.mxu1 %v7004_v33  ;;  %v7087_v32 = vld [vmem:[%s9380_s1 + $0x1308] ss:$16 sps:$4 sm:$0xff]   ;;  %v7092_v33 = vld [vmem:[%s9380_s1 + $0x1324] ss:$16 sps:$4 sm:$0xff]  }
 0x22b   :  { %4447 = vmatpush1.bf16.msra.mxu0 %v6999_v26  ;;  %4898 = vmatpush1.bf16.msra.mxu1 %v7002_v36  ;;  %v7095_v26 = vld [vmem:[%s9380_s1 + $0x132c] ss:$16 sps:$4 sm:$0xff]   ;;  %v7090_v36 = vld [vmem:[%s9380_s1 + $0x1320] ss:$16 sps:$4 sm:$0xff]  }
 0x22c   :  { %4448 = vmatprep.subr.bf16.mxu0 %v7007_v37  ;;  %4899 = vmatprep.subr.bf16.mxu1 %v7010_v21  ;;  %v7093_v37 = vld [vmem:[%s9380_s1 + $0x1328] ss:$16 sps:$4 sm:$0xff]   ;;  %v7098_v21 = vld [vmem:[%s9380_s1 + $0x1344] ss:$16 sps:$4 sm:$0xff]  }
 0x22f   :  { %4449 = vmatpush1.bf16.msra.mxu0 %v7005_v39  ;;  %4900 = vmatpush1.bf16.msra.mxu1 %v7008_v40  ;;  %v7101_v39 = vld [vmem:[%s9380_s1 + $0x134c] ss:$16 sps:$4 sm:$0xff]   ;;  %v7096_v40 = vld [vmem:[%s9380_s1 + $0x1340] ss:$16 sps:$4 sm:$0xff]  }
 0x230   :  { %4450 = vmatprep.subr.bf16.mxu0 %v7013_v41  ;;  %4901 = vmatprep.subr.bf16.mxu1 %v7016_v34  ;;  %v7099_v41 = vld [vmem:[%s9380_s1 + $0x1348] ss:$16 sps:$4 sm:$0xff]   ;;  %v7104_v34 = vld [vmem:[%s9380_s1 + $0x1364] ss:$16 sps:$4 sm:$0xff]  }
 0x233   :  { %4451 = vmatpush1.bf16.msra.mxu0 %v7011_v43  ;;  %4902 = vmatpush1.bf16.msra.mxu1 %v7014_v45  ;;  %v7107_v43 = vld [vmem:[%s9380_s1 + $0x136c] ss:$16 sps:$4 sm:$0xff]   ;;  %v7102_v45 = vld [vmem:[%s9380_s1 + $0x1360] ss:$16 sps:$4 sm:$0xff]  }
 0x234   :  { %4452 = vmatprep.subr.bf16.mxu0 %v7019_v46  ;;  %4903 = vmatprep.subr.bf16.mxu1 %v7022_v35  ;;  %v7105_v46 = vld [vmem:[%s9380_s1 + $0x1368] ss:$16 sps:$4 sm:$0xff]   ;;  %v7110_v35 = vld [vmem:[%s9380_s1 + $0x1384] ss:$16 sps:$4 sm:$0xff]  }
 0x237   :  { %4453 = vmatpush1.bf16.msra.mxu0 %v7017_v50  ;;  %4904 = vmatpush1.bf16.msra.mxu1 %v7020_v53  ;;  %v7113_v50 = vld [vmem:[%s9380_s1 + $0x138c] ss:$16 sps:$4 sm:$0xff]   ;;  %v7108_v53 = vld [vmem:[%s9380_s1 + $0x1380] ss:$16 sps:$4 sm:$0xff]  }
 0x238   :  { %4454 = vmatprep.subr.bf16.mxu0 %v7025_v38  ;;  %4905 = vmatprep.subr.bf16.mxu1 %v7028_v54  ;;  %v7111_v38 = vld [vmem:[%s9380_s1 + $0x1388] ss:$16 sps:$4 sm:$0xff]   ;;  %v7116_v54 = vld [vmem:[%s9380_s1 + $0x13a4] ss:$16 sps:$4 sm:$0xff]  }
 0x23b   :  { %4455 = vmatpush1.bf16.msra.mxu0 %v7023_v55  ;;  %4906 = vmatpush1.bf16.msra.mxu1 %v7026_v56  ;;  %v7119_v55 = vld [vmem:[%s9380_s1 + $0x13ac] ss:$16 sps:$4 sm:$0xff]   ;;  %v7114_v56 = vld [vmem:[%s9380_s1 + $0x13a0] ss:$16 sps:$4 sm:$0xff]  }
 0x23c   :  { %4456 = vmatprep.subr.bf16.mxu0 %v7031_v47  ;;  %4907 = vmatprep.subr.bf16.mxu1 %v7034_v57  ;;  %v7117_v47 = vld [vmem:[%s9380_s1 + $0x13a8] ss:$16 sps:$4 sm:$0xff]   ;;  %v7122_v57 = vld [vmem:[%s9380_s1 + $0x13c4] ss:$16 sps:$4 sm:$0xff]  }
 0x23f   :  { %4457 = vmatpush1.bf16.msra.mxu0 %v7029_v58  ;;  %4908 = vmatpush1.bf16.msra.mxu1 %v7032_v59  ;;  %v7125_v58 = vld [vmem:[%s9380_s1 + $0x13cc] ss:$16 sps:$4 sm:$0xff]   ;;  %v7120_v59 = vld [vmem:[%s9380_s1 + $0x13c0] ss:$16 sps:$4 sm:$0xff]  }
 0x240   :  { %4467 = vmatprep.subr.bf16.mxu0 %v7038_v48  ;;  %4918 = vmatprep.subr.bf16.mxu1 %v7041_v61  ;;  %v7123_v48 = vld [vmem:[%s9380_s1 + $0x13c8] ss:$16 sps:$4 sm:$0xff]   ;;  %v7128_v61 = vld [vmem:[%s9380_s1 + $0x13e4] ss:$16 sps:$4 sm:$0xff]  }
 0x242   :  { %4459 = vmatmul.mubr.bf16.vlgmr.msra.gmra.mrb[0].mxu0 %v9049_v62  ;;  %4910 = vmatmul.mubr.bf16.vlgmr.msra.gmra.mrb[0].mxu1 %v9049_v62 }
 0x243   :  { %4468 = vmatpush1.bf16.msra.mxu0 %v7036_v63  ;;  %4919 = vmatpush1.bf16.msra.mxu1 %v7039_v0  ;;  %v7131_v63 = vld [vmem:[%s9380_s1 + $0x13ec] ss:$16 sps:$4 sm:$0xff]   ;;  %v7126_v0 = vld [vmem:[%s9380_s1 + $0x13e0] ss:$16 sps:$4 sm:$0xff]  }
 0x244   :  { %4469 = vmatprep.subr.bf16.mxu0 %v7044_v1  ;;  %4920 = vmatprep.subr.bf16.mxu1 %v7047_v51  ;;  %v7129_v1 = vld [vmem:[%s9380_s1 + $0x13e8] ss:$16 sps:$4 sm:$0xff]   ;;  %v7134_v51 = vld [vmem:[%s9380_s1 + $0x1404] ss:$16 sps:$4 sm:$0xff]  }
 0x245   :  { %4499 = vmatprep.mubr.bf16.mxu0 %v833_v2  ;;  %4950 = vmatprep.mubr.bf16.mxu1 %v833_v2  ;;  %v7137_v2 = vld [vmem:[%s9380_s1 + $0x140c] ss:$16 sps:$4 sm:$0xff]  }
 0x247   :  { %4470 = vmatpush1.bf16.msra.mxu0 %v7042_v3  ;;  %4921 = vmatpush1.bf16.msra.mxu1 %v7045_v4  ;;  %v832_v3 = vcombine.high %v9049_v62, %v9049_v62  ;;  %v7132_v4 = vld [vmem:[%s9380_s1 + $0x1400] ss:$16 sps:$4 sm:$0xff]   ;;  %v7143_v62 = vld [vmem:[%s9380_s1 + $0x142c] ss:$16 sps:$4 sm:$0xff]  }
 0x248   :  { %4471 = vmatprep.subr.bf16.mxu0 %v7050_v60  ;;  %4922 = vmatprep.subr.bf16.mxu1 %v7053_v5  ;;  %v7135_v60 = vld [vmem:[%s9380_s1 + $0x1408] ss:$16 sps:$4 sm:$0xff]   ;;  %v7140_v5 = vld [vmem:[%s9380_s1 + $0x1424] ss:$16 sps:$4 sm:$0xff]  }
 0x24b   :  { %4472 = vmatpush1.bf16.msra.mxu0 %v7048_v6  ;;  %4923 = vmatpush1.bf16.msra.mxu1 %v7051_v7  ;;  %v795_v6 = vcombine.high %v8816_v44, %v8816_v44  ;;  %v7138_v7 = vld [vmem:[%s9380_s1 + $0x1420] ss:$16 sps:$4 sm:$0xff]  }
 0x24c   :  { %4473 = vmatprep.subr.bf16.mxu0 %v7056_v8  ;;  %4924 = vmatprep.subr.bf16.mxu1 %v7059_v9  ;;  %v7141_v8 = vld [vmem:[%s9380_s1 + $0x1428] ss:$16 sps:$4 sm:$0xff]   ;;  %v7144_v9 = vld [vmem:[%s9382_s3 + $0x40] sm:$0xff]  }
 0x24d   :  { %v7145_v44 = vld [vmem:[%s9382_s3 + $0xc0] sm:$0xff]  }
 0x24f   :  { %4474 = vmatpush1.bf16.msra.mxu0 %v7054_v10  ;;  %4925 = vmatpush1.bf16.msra.mxu1 %v7057_v11  ;;  %v7179_v10 = vmov 0   ;;  %v809_v11 = vrot.slane %v795_v6, %v7345_v49 }
 0x250   :  { %4475 = vmatprep.subr.bf16.mxu0 %v7062_v12  ;;  %4926 = vmatprep.subr.bf16.mxu1 %v7065_v52  ;;  %v7146_v52 = vld [vmem:[%s9382_s3] sm:$0xff]  }
 0x251   :  { %v824_v12 = vrot.slane %v809_v11, %v7345_v49  ;;  %v7150_v49 = vld [vmem:[%s9382_s3 + $0x8] sm:$0xff]  }
 0x253   :  { %4476 = vmatpush1.bf16.msra.mxu0 %v7060_v15  ;;  %4927 = vmatpush1.bf16.msra.mxu1 %v7063_v16  ;;  %v7147_v15 = vld [vmem:[%s9382_s3 + $0x80] sm:$0xff]   ;;  %v7148_v16 = vld [vmem:[%s9382_s3 + $0x48] sm:$0xff]  }
 0x254   :  { %4477 = vmatprep.subr.bf16.mxu0 %v7068_v17  ;;  %4928 = vmatprep.subr.bf16.mxu1 %v7071_v18  ;;  %v7149_v17 = vld [vmem:[%s9382_s3 + $0xc8] sm:$0xff]  }
 0x255   :  { %v7151_v18 = vld [vmem:[%s9382_s3 + $0x88] sm:$0xff]  }
 0x257   :  { %4478 = vmatpush1.bf16.msra.mxu0 %v7066_v19  ;;  %4929 = vmatpush1.bf16.msra.mxu1 %v7069_v20  ;;  %v7152_v19 = vld [vmem:[%s9382_s3 + $0x50] sm:$0xff]  }
 0x258   :  { %4479 = vmatprep.subr.bf16.mxu0 %v7074_v22  ;;  %4930 = vmatprep.subr.bf16.mxu1 %v7077_v23  ;;  %v7153_v20 = vld [vmem:[%s9382_s3 + $0xd0] sm:$0xff]  }
 0x259   :  { %v7154_v22 = vld [vmem:[%s9382_s3 + $0x10] sm:$0xff]  }
 0x25a   :  { %v7155_v23 = vld [vmem:[%s9382_s3 + $0x90] sm:$0xff]  }
 0x25b   :  { %4480 = vmatpush1.bf16.msra.mxu0 %v7072_v24  ;;  %4931 = vmatpush1.bf16.msra.mxu1 %v7075_v13  ;;  %v7156_v24 = vld [vmem:[%s9382_s3 + $0x58] sm:$0xff]  }
 0x25c   :  { %4481 = vmatprep.subr.bf16.mxu0 %v7080_v27  ;;  %4932 = vmatprep.subr.bf16.mxu1 %v7083_v28  ;;  %v7157_v13 = vld [vmem:[%s9382_s3 + $0xd8] sm:$0xff]  }
 0x25d   :  { %v7158_v27 = vld [vmem:[%s9382_s3 + $0x18] sm:$0xff]  }
 0x25e   :  { %v7159_v28 = vld [vmem:[%s9382_s3 + $0x98] sm:$0xff]  }
 0x25f   :  { %4482 = vmatpush1.bf16.msra.mxu0 %v7078_v29  ;;  %4933 = vmatpush1.bf16.msra.mxu1 %v7081_v14  ;;  %v7160_v29 = vld [vmem:[%s9382_s3 + $0x60] sm:$0xff]  }
 0x260   :  { %4483 = vmatprep.subr.bf16.mxu0 %v7086_v30  ;;  %4934 = vmatprep.subr.bf16.mxu1 %v7089_v31  ;;  %v7161_v14 = vld [vmem:[%s9382_s3 + $0xe0] sm:$0xff]  }
 0x261   :  { %v7162_v30 = vld [vmem:[%s9382_s3 + $0x20] sm:$0xff]  }
 0x262   :  { %v7163_v31 = vld [vmem:[%s9382_s3 + $0xa0] sm:$0xff]  }
 0x263   :  { %4484 = vmatpush1.bf16.msra.mxu0 %v7084_v25  ;;  %4935 = vmatpush1.bf16.msra.mxu1 %v7087_v32  ;;  %v7164_v25 = vld [vmem:[%s9382_s3 + $0x68] sm:$0xff]  }
 0x264   :  { %4485 = vmatprep.subr.bf16.mxu0 %v7092_v33  ;;  %4936 = vmatprep.subr.bf16.mxu1 %v7095_v26  ;;  %v7165_v32 = vld [vmem:[%s9382_s3 + $0xe8] sm:$0xff]  }
 0x265   :  { %v7166_v33 = vld [vmem:[%s9382_s3 + $0x28] sm:$0xff]  }
 0x266   :  { %v7167_v26 = vld [vmem:[%s9382_s3 + $0xa8] sm:$0xff]  }
 0x267   :  { %4486 = vmatpush1.bf16.msra.mxu0 %v7090_v36  ;;  %4937 = vmatpush1.bf16.msra.mxu1 %v7093_v37  ;;  %v7168_v36 = vld [vmem:[%s9382_s3 + $0x70] sm:$0xff]  }
 0x268   :  { %4487 = vmatprep.subr.bf16.mxu0 %v7098_v21  ;;  %4938 = vmatprep.subr.bf16.mxu1 %v7101_v39  ;;  %v7169_v37 = vld [vmem:[%s9382_s3 + $0xf0] sm:$0xff]  }
 0x269   :  { %v7170_v21 = vld [vmem:[%s9382_s3 + $0x30] sm:$0xff]  }
 0x26a   :  { %v7171_v39 = vld [vmem:[%s9382_s3 + $0xb0] sm:$0xff]  }
 0x26b   :  { %4488 = vmatpush1.bf16.msra.mxu0 %v7096_v40  ;;  %4939 = vmatpush1.bf16.msra.mxu1 %v7099_v41  ;;  %v7172_v40 = vld [vmem:[%s9382_s3 + $0x78] sm:$0xff]  }
 0x26c   :  { %4489 = vmatprep.subr.bf16.mxu0 %v7104_v34  ;;  %4940 = vmatprep.subr.bf16.mxu1 %v7107_v43  ;;  %v7173_v41 = vld [vmem:[%s9382_s3 + $0xf8] sm:$0xff]  }
 0x26d   :  { %v7174_v34 = vld [vmem:[%s9382_s3 + $0x38] sm:$0xff]  }
 0x26e   :  { %v7175_v43 = vld [vmem:[%s9382_s3 + $0xb8] sm:$0xff]  }
 0x26f   :  { %4490 = vmatpush1.bf16.msra.mxu0 %v7102_v45  ;;  %4941 = vmatpush1.bf16.msra.mxu1 %v7105_v46  ;;  %v676_v45 = vsub.s32 0, %v7327_v42  ;;  %v684_v46 = vsub.s32 2, %v7327_v42 }
 0x270   :  { %4491 = vmatprep.subr.bf16.mxu0 %v7110_v35  ;;  %4942 = vmatprep.subr.bf16.mxu1 %v7113_v50  ;;  %v672_v35 = vld [vmem:[%s9383_s2] sm:$0xf]  ;;  %v680_v50 = vsub.s32 1, %v7327_v42 }
 0x273   :  { %4492 = vmatpush1.bf16.msra.mxu0 %v7108_v53  ;;  %4943 = vmatpush1.bf16.msra.mxu1 %v7111_v38  ;;  %v688_v53 = vsub.s32 3, %v7327_v42  ;;  %v677_v38 = vrot.slane %v672_v35, %v676_v45 }
 0x274   :  { %4493 = vmatprep.subr.bf16.mxu0 %v7116_v54  ;;  %4944 = vmatprep.subr.bf16.mxu1 %v7119_v55  ;;  %v685_v54 = vrot.slane %v672_v35, %v684_v46  ;;  %v681_v55 = vrot.slane %v672_v35, %v680_v50 }
 0x277   :  { %4494 = vmatpush1.bf16.msra.mxu0 %v7114_v56  ;;  %4945 = vmatpush1.bf16.msra.mxu1 %v7117_v47  ;;  %v689_v56 = vrot.slane %v672_v35, %v688_v53 }
 0x278   :  { %4495 = vmatprep.subr.bf16.mxu0 %v7122_v57  ;;  %4946 = vmatprep.subr.bf16.mxu1 %v7125_v58 }
 0x27b   :  { %4496 = vmatpush1.bf16.msra.mxu0 %v7120_v59  ;;  %4947 = vmatpush1.bf16.msra.mxu1 %v7123_v48 }
 0x27c   :  { %4497 = vmatprep.subr.bf16.mxu0 %v7128_v61  ;;  %4948 = vmatprep.subr.bf16.mxu1 %v7131_v63 }
 0x27f   :  { %4498 = vmatpush1.bf16.msra.mxu0 %v7126_v0  ;;  %4949 = vmatpush1.bf16.msra.mxu1 %v7129_v1 }
 0x280   :  { %4508 = vmatprep.subr.bf16.mxu0 %v7134_v51  ;;  %4959 = vmatprep.subr.bf16.mxu1 %v7137_v2 }
 0x282   :  { %4500 = vmatmul.mubr.bf16.vlgmr.msra.gmra.mrb[0].mxu0 %v832_v3  ;;  %4951 = vmatmul.mubr.bf16.vlgmr.msra.gmra.mrb[0].mxu1 %v832_v3 }
 0x283   :  { %4509 = vmatpush1.bf16.msra.mxu0 %v7132_v4  ;;  %4960 = vmatpush1.bf16.msra.mxu1 %v7135_v60 }
 0x284   :  { %4510 = vmatprep.subr.bf16.mxu0 %v7140_v5  ;;  %4961 = vmatprep.subr.bf16.mxu1 %v7143_v62 }
 0x285   :  { %4540 = vmatprep.mubr.bf16.mxu0 %v7179_v10  ;;  %4991 = vmatprep.mubr.bf16.mxu1 %v7179_v10  ;;  %v6006_v10 = vld [vmem:[%s9384_s4] ss:$0 sm:$0xff] }
 0x287   :  { %4511 = vmatpush1.bf16.msra.mxu0 %v7138_v7  ;;  %4962 = vmatpush1.bf16.msra.mxu1 %v7141_v8 }
 0x288   :  { %6039 = vmatprep.subr.bf16.mxu0 %v7144_v9  ;;  %6061 = vmatprep.subr.bf16.mxu1 %v7145_v44 }
 0x28e   :  { %6004 = vmatmul.mubr.msk.bf16.vlgmr.msra.gmra.mrb[0].mxu0 %vm4094_vm0, %v824_v12  ;;  %6005 = vmatmul.mubr.msk.bf16.vlgmr.msra.gmra.mrb[0].mxu1 %vm4094_vm0, %v824_v12 }
 0x28f   :  { %6040 = vmatpush3.bf16.msra.mxu0 %v7146_v52  ;;  %6062 = vmatpush3.bf16.msra.mxu1 %v7147_v15 }
 0x290   :  { %6041 = vmatprep.subr.bf16.mxu0 %v7148_v16  ;;  %6063 = vmatprep.subr.bf16.mxu1 %v7149_v17 }
 0x293   :  { %6042 = vmatpush3.bf16.msra.mxu0 %v7150_v49  ;;  %6064 = vmatpush3.bf16.msra.mxu1 %v7151_v18 }
 0x294   :  { %6043 = vmatprep.subr.bf16.mxu0 %v7152_v19  ;;  %6065 = vmatprep.subr.bf16.mxu1 %v7153_v20 }
 0x297   :  { %6044 = vmatpush3.bf16.msra.mxu0 %v7154_v22  ;;  %6066 = vmatpush3.bf16.msra.mxu1 %v7155_v23 }
 0x298   :  { %6045 = vmatprep.subr.bf16.mxu0 %v7156_v24  ;;  %6067 = vmatprep.subr.bf16.mxu1 %v7157_v13 }
 0x29b   :  { %6046 = vmatpush3.bf16.msra.mxu0 %v7158_v27  ;;  %6068 = vmatpush3.bf16.msra.mxu1 %v7159_v28 }
 0x29c   :  { %6047 = vmatprep.subr.bf16.mxu0 %v7160_v29  ;;  %6069 = vmatprep.subr.bf16.mxu1 %v7161_v14 }
 0x29f   :  { %6048 = vmatpush3.bf16.msra.mxu0 %v7162_v30  ;;  %6070 = vmatpush3.bf16.msra.mxu1 %v7163_v31 }
 0x2a0   :  { %6049 = vmatprep.subr.bf16.mxu0 %v7164_v25  ;;  %6071 = vmatprep.subr.bf16.mxu1 %v7165_v32 }
 0x2a3   :  { %6050 = vmatpush3.bf16.msra.mxu0 %v7166_v33  ;;  %6072 = vmatpush3.bf16.msra.mxu1 %v7167_v26 }
 0x2a4   :  { %6051 = vmatprep.subr.bf16.mxu0 %v7168_v36  ;;  %6073 = vmatprep.subr.bf16.mxu1 %v7169_v37 }
 0x2a7   :  { %6052 = vmatpush3.bf16.msra.mxu0 %v7170_v21  ;;  %6074 = vmatpush3.bf16.msra.mxu1 %v7171_v39 }
 0x2a8   :  { %6053 = vmatprep.subr.bf16.mxu0 %v7172_v40  ;;  %6075 = vmatprep.subr.bf16.mxu1 %v7173_v41 }
 0x2ab   :  { %6054 = vmatpush3.bf16.msra.mxu0 %v7174_v34  ;;  %6076 = vmatpush3.bf16.msra.mxu1 %v7175_v43 }
 0x361   :  { %v4542_v47 = vpop.f32.mrb[0].mxu0  ;;  %v4993_v57 = vpop.f32.mrb[0].mxu1 }
 0x362   :  { %v6083_v58 = vadd.f32 %v4542_v47, %v677_v38  ;;  %v6085_v59 = vadd.f32 %v4993_v57, %v685_v54  ;;  %v4544_v48 = vpop.f32.mrb[1].mxu0  ;;  %v4995_v61 = vpop.f32.mrb[1].mxu1 }
 0x363   :  { %v6084_v63 = vadd.f32 %v4544_v48, %v681_v55  ;;  %v6086_v0 = vadd.f32 %v4995_v61, %v689_v56  ;;  %v4546_v1 = vpop.f32.mrb[2].mxu0  ;;  %v4997_v51 = vpop.f32.mrb[2].mxu1 }
 0x364   :  { %v5000_v2 = vmax.f32 %v6083_v58, 0.0  ;;  %v5002_v3 = vmax.f32 %v6085_v59, 0.0  ;;  %v4547_v4 = vpop.f32.mrb[3].mxu0  ;;  %v4998_v60 = vpop.f32.mrb[3].mxu1 }
 0x365   :  { %v5001_v5 = vmax.f32 %v6084_v63, 0.0  ;;  %v5003_v42 = vmax.f32 %v6086_v0, 0.0 }
 0x366   :  { %v5004_v7 = vpack.c.bf16 %v5000_v2, %v5000_v2  ;;  %v5006_v8 = vpack.c.bf16 %v5002_v3, %v5002_v3 }
 0x367   :  { %v5005_v62 = vpack.c.bf16 %v5001_v5, %v5001_v5  ;;  %v5007_v6 = vpack.c.bf16 %v5003_v42, %v5003_v42 }
 0x369   :  { %5303 = vmatprep.mubr.bf16.mxu0 %v5005_v62  ;;  %5343 = vmatprep.mubr.bf16.mxu1 %v5007_v6 }
 0x36a   :  { %5304 = vmatmul.mubr.bf16.vlgmr.msra.gmra.mrb[4].mxu0 %v5004_v7  ;;  %5344 = vmatmul.mubr.bf16.vlgmr.msra.gmra.mrb[4].mxu1 %v5006_v8 }
 0x43d   :  { %v6055_v9 = vpop.f32.mrb[4].mxu0  ;;  %v6077_v44 = vpop.f32.mrb[4].mxu1 }
 0x43e   :  { %v6056_v11 = vpop.f32.mrb[5].mxu0  ;;  %v6078_v12 = vpop.f32.mrb[5].mxu1 }
 0x43f   :  { %v6057_v52 = vadd.f32 %v6056_v11, %v6055_v9  ;;  %v6079_v15 = vadd.f32 %v6078_v12, %v6077_v44  ;;  %v6058_v16 = vpop.f32.mrb[6].mxu0  ;;  %v6080_v17 = vpop.f32.mrb[6].mxu1 }
 0x440   :  { %v6059_v49 = vpop.f32.mrb[7].mxu0  ;;  %v6081_v18 = vpop.f32.mrb[7].mxu1 }
 0x441   :  { %v5306_v19 = vadd.f32 %v6057_v52, %v6006_v10 }
 0x443   :  { %v5346_v20 = vadd.f32 %v6079_v15, %v5306_v19 }
 0x445   :  { %5351 = vst [vmem:[%s9385_s5] sm:$0x3] %v5346_v20 }

</bundles_post_ra>
